<compile_context>
chip_gen: v7x
topology: tpu7x:2x2x1
jax: 0.10.0
libtpu: 0.0.40
codegen_flags: <defaults>
</compile_context>

<pallas_src>
import functools

import numpy as np
import jax
import jax.numpy as jnp
from jax.experimental import pallas as pl
from jax.experimental.pallas import tpu as pltpu

NEG_SLOPE = 0.01   # nn.LeakyReLU default
BN_EPS = 1e-5      # nn.BatchNorm2d default
LANE = 128

ENC_COUT = (32, 64, 64, 64)   # encoder conv output channels (fixed by model)
DEC_COUT = (64, 64, 32, 3)    # decoder conv output channels (fixed by model)


def _round_up(n, m):
    return ((n + m - 1) // m) * m


# ----------------------------------------------------------------------------
# Pallas kernels
# ----------------------------------------------------------------------------
def _fused_matmul_kernel(x_ref, w_ref, b_ref, o_ref, *, activation):
    """o = act(x @ w + b). bf16 operands -> f32 accumulate -> f32 epilogue."""
    acc = jnp.dot(x_ref[...], w_ref[...], preferred_element_type=jnp.float32)
    acc = acc + b_ref[...]
    if activation == "leaky_relu":
        acc = jnp.where(acc >= 0, acc, NEG_SLOPE * acc)
    elif activation == "sigmoid":
        # exp + approx reciprocal both go to the EUP slot (no VALU divide).
        acc = pl.reciprocal(1.0 + jnp.exp(-acc), approx=True)
        acc = jnp.clip(acc, 0.0, 1.0)
    o_ref[...] = acc.astype(o_ref.dtype)


def fused_matmul(x, w, b, activation="none", out_dtype=jnp.float32):
    """x: (M, K); w: (K, Np) bf16 (Np lane-dense); b: (1, Np) f32."""
    M, K = x.shape
    Kw, Np = w.shape
    assert K == Kw, (K, Kw)
    x = x.astype(w.dtype)
    # Tile over M (>=2 grid steps on the big GEMMs for megacore sharding).
    TM = 256 if (M % 256 == 0) else M
    grid = (M // TM,)
    kernel = functools.partial(_fused_matmul_kernel, activation=activation)
    return pl.pallas_call(
        kernel,
        out_shape=jax.ShapeDtypeStruct((M, Np), out_dtype),
        grid_spec=pltpu.PrefetchScalarGridSpec(
            num_scalar_prefetch=0,
            grid=grid,
            in_specs=[
                pl.BlockSpec((TM, K), lambda i: (i, 0)),
                pl.BlockSpec((K, Np), lambda i: (0, 0)),
                pl.BlockSpec((1, Np), lambda i: (0, 0)),
            ],
            out_specs=pl.BlockSpec((TM, Np), lambda i: (i, 0)),
        ),
        compiler_params=pltpu.CompilerParams(
            dimension_semantics=("parallel",)),
    )(x, w, b)


def _latent_kernel(feat_ref, mu_w_ref, mu_b_ref, lv_w_ref, lv_b_ref,
                   eps_ref, dec_w_ref, dec_b_ref,
                   mu_ref, lv_ref, h_ref):
    """Fused: mu head, log_var head, reparam sampling, decoder_linear."""
    feat = feat_ref[...]
    mu = jnp.dot(feat, mu_w_ref[...], preferred_element_type=jnp.float32)
    mu = mu + mu_b_ref[...]
    mu = jnp.where(mu >= 0, mu, NEG_SLOPE * mu)

    lv = jnp.dot(feat, lv_w_ref[...], preferred_element_type=jnp.float32)
    lv = lv + lv_b_ref[...]
    lv = jnp.where(lv >= 0, lv, NEG_SLOPE * lv)

    # z = mu + eps * exp(log_var / 2)   (stays in vregs, never hits HBM)
    z = mu + eps_ref[...] * jnp.exp(0.5 * lv)

    h = jnp.dot(z.astype(dec_w_ref.dtype), dec_w_ref[...],
                preferred_element_type=jnp.float32)
    h = h + dec_b_ref[...]
    h = jnp.where(h >= 0, h, NEG_SLOPE * h)

    mu_ref[...] = mu
    lv_ref[...] = lv
    h_ref[...] = h.astype(h_ref.dtype)


def latent_path(feat, mu_w, mu_b, lv_w, lv_b, eps, dec_w, dec_b):
    B, F = feat.shape
    Z = mu_w.shape[1]

    def full(shape):
        return pl.BlockSpec(shape, lambda i, _s=shape: (0,) * len(_s))

    return pl.pallas_call(
        _latent_kernel,
        grid=(1,),
        in_specs=[full((B, F)), full((F, Z)), full((1, Z)), full((F, Z)),
                  full((1, Z)), full((B, Z)), full((Z, F)), full((1, F))],
        out_specs=(full((B, Z)), full((B, Z)), full((B, F))),
        out_shape=(jax.ShapeDtypeStruct((B, Z), jnp.float32),
                   jax.ShapeDtypeStruct((B, Z), jnp.float32),
                   jax.ShapeDtypeStruct((B, F), jnp.bfloat16)),
    )(feat.astype(mu_w.dtype), mu_w, mu_b, lv_w, lv_b, eps, dec_w, dec_b)


# ----------------------------------------------------------------------------
# Glue (plain JAX): im2col, fused upsample+im2col, weight conversion, BN fold
# ----------------------------------------------------------------------------
def im2col(x_nhwc, ksize=3, stride=1, padding=1):
    """Extract k x k patches; column order is (ki, kj) outer, Cin inner."""
    B, H, W, C = x_nhwc.shape
    xp = jnp.pad(x_nhwc, ((0, 0), (padding, padding), (padding, padding), (0, 0)))
    Ho = (H + 2 * padding - ksize) // stride + 1
    Wo = (W + 2 * padding - ksize) // stride + 1
    cols = []
    for ki in range(ksize):
        for kj in range(ksize):
            cols.append(xp[:, ki:ki + stride * Ho:stride,
                           kj:kj + stride * Wo:stride, :])
    cols = jnp.concatenate(cols, axis=-1)               # (B, Ho, Wo, k*k*C)
    return cols.reshape(B * Ho * Wo, ksize * ksize * C), (B, Ho, Wo)


def upsample2x_im2col(x_nhwc):
    """Nearest-2x upsample followed by 3x3 / stride-1 / pad-1 im2col, done with
    constant-index gathers on the 1-padded ORIGINAL tensor (the 4x upsampled
    intermediate is never materialized)."""
    B, H, W, C = x_nhwc.shape
    Ho, Wo = 2 * H, 2 * W
    xp = jnp.pad(x_nhwc, ((0, 0), (1, 1), (1, 1), (0, 0)))
    # upsampled-padded index h maps to padded-original index (h-1)//2 + 1
    # (index 0 and H+1 are the zero-pad rows/cols).
    cols = []
    for ki in range(3):
        h_src = jnp.asarray((np.arange(Ho) + ki - 1) // 2 + 1, dtype=jnp.int32)
        row = jnp.take(xp, h_src, axis=1)                # (B, Ho, W+2, C)
        for kj in range(3):
            w_src = jnp.asarray((np.arange(Wo) + kj - 1) // 2 + 1,
                                dtype=jnp.int32)
            cols.append(jnp.take(row, w_src, axis=2))    # (B, Ho, Wo, C)
    cols = jnp.concatenate(cols, axis=-1)                # (B, Ho, Wo, 9C)
    return cols.reshape(B * Ho * Wo, 9 * C), (B, Ho, Wo)


def conv_w_to_mat(w):
    """(Cout, Cin, kh, kw) -> (kh*kw*Cin, Cout), matching im2col column order."""
    cout = w.shape[0]
    return jnp.transpose(w, (2, 3, 1, 0)).reshape(-1, cout)


def convT_to_conv_w(wt):
    """ConvTranspose2d (stride=1, pad=1, k=3) == Conv2d with swapped in/out
    channels and spatially flipped kernel (pad = k-1-p = 1)."""
    return jnp.flip(jnp.transpose(wt, (1, 0, 2, 3)), axis=(2, 3))


def fold_bn(w_mat, b, gamma, beta, running_mean, running_var):
    scale = gamma / jnp.sqrt(running_var + BN_EPS)
    return w_mat * scale[None, :], (b - running_mean) * scale + beta


def pack_conv(w_mat, b, n):
    """Pad N to lane-dense width, cast weight to bf16, bias stays (1, Np) f32."""
    npad = _round_up(n, LANE)
    w_mat = jnp.pad(w_mat, ((0, 0), (0, npad - n)))
    b = jnp.pad(b, ((0, npad - n),))
    return {"w": w_mat.astype(jnp.bfloat16),
            "b": b.reshape(1, npad).astype(jnp.float32)}


# ----------------------------------------------------------------------------
# Parameter init (deterministic, synthetic)
# ----------------------------------------------------------------------------
def init_params(key, z_dim, input_shape):
    C, H, W = input_shape
    keys = iter(jax.random.split(key, 64))

    def nrm(shape, scale=0.05):
        return scale * jax.random.normal(next(keys), shape, dtype=jnp.float32)

    # encoder: Conv2d(3,32,3,s2,p1) -> ... -> Conv2d(64,64,3,s2,p1), each + BN
    enc = []
    for cin, cout in [(C, 32), (32, 64), (64, 64), (64, 64)]:
        w = nrm((cout, cin, 3, 3))
        b = nrm((cout,))
        gamma = 1.0 + 0.1 * jax.random.normal(next(keys), (cout,), jnp.float32)
        beta = 0.1 * jax.random.normal(next(keys), (cout,), jnp.float32)
        rm = jnp.zeros((cout,), jnp.float32)
        rv = jnp.ones((cout,), jnp.float32)
        wm, bf = fold_bn(conv_w_to_mat(w), b, gamma, beta, rm, rv)
        enc.append(pack_conv(wm, bf, cout))

    hc, wc = H // 16, W // 16          # four stride-2 convs
    conv_out_size = 64 * hc * wc

    mu_w = nrm((z_dim, conv_out_size))       # torch Linear weight (out, in)
    mu_b = nrm((z_dim,))
    lv_w = nrm((z_dim, conv_out_size))
    lv_b = nrm((z_dim,))
    dec_w = nrm((conv_out_size, z_dim))
    dec_b = nrm((conv_out_size,))

    # decoder convs: ConvTranspose2d weight shape (Cin, Cout, 3, 3)
    dec_conv = []
    for idx, (cin, cout) in enumerate([(64, 64), (64, 64), (64, 32), (32, C)]):
        wt = nrm((cin, cout, 3, 3))
        b = nrm((cout,))
        wm = conv_w_to_mat(convT_to_conv_w(wt))
        if idx < 3:  # last decoder conv has no BatchNorm
            gamma = 1.0 + 0.1 * jax.random.normal(next(keys), (cout,), jnp.float32)
            beta = 0.1 * jax.random.normal(next(keys), (cout,), jnp.float32)
            wm, b = fold_bn(wm, b, gamma, beta,
                            jnp.zeros((cout,), jnp.float32),
                            jnp.ones((cout,), jnp.float32))
        dec_conv.append(pack_conv(wm, b, cout))

    return {
        "enc": enc,
        "mu_w": mu_w.T.astype(jnp.bfloat16), "mu_b": mu_b.reshape(1, -1),
        "lv_w": lv_w.T.astype(jnp.bfloat16), "lv_b": lv_b.reshape(1, -1),
        "dec_w": dec_w.T.astype(jnp.bfloat16), "dec_b": dec_b.reshape(1, -1),
        "dec_conv": dec_conv,
    }


# ----------------------------------------------------------------------------
# VAE forward (mirrors VAE.forward(x, sampling=True))
# ----------------------------------------------------------------------------
def vae_forward(x_nchw, params, eps):
    x = jnp.transpose(x_nchw, (0, 2, 3, 1)).astype(jnp.bfloat16)   # NCHW->NHWC

    # ---- encoder_conv: 4 x (conv s2 + BN + LeakyReLU) ----
    for layer, cout in zip(params["enc"], ENC_COUT):
        cols, (B, Ho, Wo) = im2col(x, stride=2, padding=1)
        y = fused_matmul(cols, layer["w"], layer["b"],
                         activation="leaky_relu", out_dtype=jnp.bfloat16)
        x = y[:, :cout].reshape(B, Ho, Wo, cout)

    B, Hc, Wc, Cc = x.shape
    # flatten in NCHW channel-major order (matches torch .view(B, -1))
    feat = jnp.transpose(x, (0, 3, 1, 2)).reshape(B, -1)

    # ---- fused latent path: mu head + log_var head + sampling + dec linear ----
    mu_p, log_var_p, h = latent_path(
        feat, params["mu_w"], params["mu_b"], params["lv_w"], params["lv_b"],
        eps, params["dec_w"], params["dec_b"])

    x = jnp.transpose(h.reshape(B, Cc, Hc, Wc), (0, 2, 3, 1))      # -> NHWC

    # ---- decoder: 4 x (UpsamplingNearest2d(2) + convT(s1,p1) [+ BN] + act) ----
    n_layers = len(params["dec_conv"])
    for i, (layer, cout) in enumerate(zip(params["dec_conv"], DEC_COUT)):
        cols, (B, Ho, Wo) = upsample2x_im2col(x)
        last = (i == n_layers - 1)
        y = fused_matmul(cols, layer["w"], layer["b"],
                         activation="sigmoid" if last else "leaky_relu",
                         out_dtype=jnp.float32 if last else jnp.bfloat16)
        x = y[:, :cout].reshape(B, Ho, Wo, cout)

    images_p = jnp.transpose(x, (0, 3, 1, 2)).astype(jnp.float32)  # NHWC->NCHW
    return mu_p, log_var_p, images_p


# ----------------------------------------------------------------------------
if __name__ == "__main__":
    key = jax.random.PRNGKey(0)
    k_param, k_x, k_eps = jax.random.split(key, 3)

    B, C, H, W = 2, 3, 32, 32
    z_dim = 32

    params = init_params(k_param, z_dim, (C, H, W))
    x = jax.random.normal(k_x, (B, C, H, W), dtype=jnp.float32)
    # deterministic stand-in for np.random.normal(...).cuda() epsilon
    eps = jax.random.normal(k_eps, (B, z_dim), dtype=jnp.float32)

    fwd = jax.jit(vae_forward)
    mu_p, log_var_p, images_p = fwd(x, params, eps)
    jax.block_until_ready((mu_p, log_var_p, images_p))

    assert mu_p.shape == (B, z_dim)
    assert log_var_p.shape == (B, z_dim)
    assert images_p.shape == (B, C, H, W)
    assert bool(jnp.all(jnp.isfinite(mu_p)))
    assert bool(jnp.all(jnp.isfinite(log_var_p)))
    assert bool(jnp.all(jnp.isfinite(images_p)))
    assert bool(jnp.all((images_p >= 0.0) & (images_p <= 1.0)))  # sigmoid output

    print("KERNEL_OK")
</pallas_src>

<mosaic_0001>
module attributes {stable_mosaic.version = 11 : i64} {
  func.func @_fused_matmul_kernel(%arg0: i32, %arg1: memref<256x27xbf16, #tpu.memory_space<vmem>>, %arg2: memref<27x128xbf16, #tpu.memory_space<vmem>>, %arg3: memref<1x128xf32, #tpu.memory_space<vmem>>, %arg4: memref<256x128xbf16, #tpu.memory_space<vmem>>) attributes {dimension_semantics = [#tpu.dimension_semantics<parallel>], iteration_bounds = array<i64: 2>, scalar_prefetch = 0 : i64, scratch_operands = 0 : i64, tpu.core_type = #tpu.core_type<tc>, window_params = [{transform_indices = @transform_0, window_bounds = array<i64: 256, 27>}, {pipeline_mode = #tpu.pipeline_mode<synchronous>, transform_indices = @transform_1, window_bounds = array<i64: 27, 128>}, {pipeline_mode = #tpu.pipeline_mode<synchronous>, transform_indices = @transform_2, window_bounds = array<i64: 1, 128>}, {transform_indices = @transform_3, window_bounds = array<i64: 256, 128>}]} {
    %c0 = arith.constant 0 : index
    %c0_0 = arith.constant 0 : index
    %0 = vector.load %arg1[%c0, %c0_0] : memref<256x27xbf16, #tpu.memory_space<vmem>>, vector<256x27xbf16>
    %c0_1 = arith.constant 0 : index
    %c0_2 = arith.constant 0 : index
    %1 = vector.load %arg2[%c0_1, %c0_2] : memref<27x128xbf16, #tpu.memory_space<vmem>>, vector<27x128xbf16>
    %cst = arith.constant dense<0.000000e+00> : vector<256x128xf32>
    %2 = tpu.matmul %0, %1, %cst {dimension_numbers = #tpu.dot_dimension_numbers<[1], [0], [0], [1], [0, 0, 1, 1], [], []>} : vector<256x27xbf16>, vector<27x128xbf16>, vector<256x128xf32> -> vector<256x128xf32>
    %c0_3 = arith.constant 0 : index
    %c0_4 = arith.constant 0 : index
    %3 = vector.load %arg3[%c0_3, %c0_4] : memref<1x128xf32, #tpu.memory_space<vmem>>, vector<1x128xf32>
    %4 = vector.broadcast %3 : vector<1x128xf32> to vector<256x128xf32>
    %5 = arith.addf %2, %4 : vector<256x128xf32>
    %cst_5 = arith.constant 0.000000e+00 : f32
    %6 = vector.broadcast %cst_5 : f32 to vector<256x128xf32>
    %7 = arith.cmpf oge, %5, %6 : vector<256x128xf32>
    %cst_6 = arith.constant 0.00999999977 : f32
    %8 = vector.broadcast %cst_6 : f32 to vector<256x128xf32>
    %9 = arith.mulf %8, %5 : vector<256x128xf32>
    %10 = arith.select %7, %5, %9 : vector<256x128xi1>, vector<256x128xf32>
    %11 = arith.truncf %10 : vector<256x128xf32> to vector<256x128xbf16>
    %c0_7 = arith.constant 0 : index
    %c0_8 = arith.constant 0 : index
    %12 = vector.load %arg4[%c0_7, %c0_8] : memref<256x128xbf16, #tpu.memory_space<vmem>>, vector<256x128xbf16>
    tpu.vector_store %arg4[%c0_7, %c0_8], %11 {strides = array<i32>} : memref<256x128xbf16, #tpu.memory_space<vmem>>, vector<256x128xbf16>,
    return
  }
  func.func @transform_0(%arg0: i32) -> (i32, i32) {
    %c0_i32 = arith.constant 0 : i32
    %c0_i32_0 = arith.constant 0 : i32
    return %arg0, %c0_i32 : i32, i32
  }
  func.func @transform_1(%arg0: i32) -> (i32, i32) {
    %c0_i32 = arith.constant 0 : i32
    %c0_i32_0 = arith.constant 0 : i32
    %c0_i32_1 = arith.constant 0 : i32
    return %c0_i32, %c0_i32_0 : i32, i32
  }
  func.func @transform_2(%arg0: i32) -> (i32, i32) {
    %c0_i32 = arith.constant 0 : i32
    %c0_i32_0 = arith.constant 0 : i32
    %c0_i32_1 = arith.constant 0 : i32
    return %c0_i32, %c0_i32_0 : i32, i32
  }
  func.func @transform_3(%arg0: i32) -> (i32, i32) {
    %c0_i32 = arith.constant 0 : i32
    %c0_i32_0 = arith.constant 0 : i32
    return %arg0, %c0_i32 : i32, i32
  }
}

module attributes {stable_mosaic.version = 11 : i64} {
  func.func @_fused_matmul_kernel(%arg0: i32, %arg1: memref<128x288xbf16, #tpu.memory_space<vmem>>, %arg2: memref<288x128xbf16, #tpu.memory_space<vmem>>, %arg3: memref<1x128xf32, #tpu.memory_space<vmem>>, %arg4: memref<128x128xbf16, #tpu.memory_space<vmem>>) attributes {dimension_semantics = [#tpu.dimension_semantics<parallel>], iteration_bounds = array<i64: 1>, scalar_prefetch = 0 : i64, scratch_operands = 0 : i64, tpu.core_type = #tpu.core_type<tc>, window_params = [{transform_indices = @transform_0, window_bounds = array<i64: 128, 288>}, {pipeline_mode = #tpu.pipeline_mode<synchronous>, transform_indices = @transform_1, window_bounds = array<i64: 288, 128>}, {pipeline_mode = #tpu.pipeline_mode<synchronous>, transform_indices = @transform_2, window_bounds = array<i64: 1, 128>}, {transform_indices = @transform_3, window_bounds = array<i64: 128, 128>}]} {
    %c0 = arith.constant 0 : index
    %c0_0 = arith.constant 0 : index
    %0 = vector.load %arg1[%c0, %c0_0] : memref<128x288xbf16, #tpu.memory_space<vmem>>, vector<128x288xbf16>
    %c0_1 = arith.constant 0 : index
    %c0_2 = arith.constant 0 : index
    %1 = vector.load %arg2[%c0_1, %c0_2] : memref<288x128xbf16, #tpu.memory_space<vmem>>, vector<288x128xbf16>
    %cst = arith.constant dense<0.000000e+00> : vector<128x128xf32>
    %2 = tpu.matmul %0, %1, %cst {dimension_numbers = #tpu.dot_dimension_numbers<[1], [0], [0], [1], [0, 0, 1, 1], [], []>} : vector<128x288xbf16>, vector<288x128xbf16>, vector<128x128xf32> -> vector<128x128xf32>
    %c0_3 = arith.constant 0 : index
    %c0_4 = arith.constant 0 : index
    %3 = vector.load %arg3[%c0_3, %c0_4] : memref<1x128xf32, #tpu.memory_space<vmem>>, vector<1x128xf32>
    %4 = vector.broadcast %3 : vector<1x128xf32> to vector<128x128xf32>
    %5 = arith.addf %2, %4 : vector<128x128xf32>
    %cst_5 = arith.constant 0.000000e+00 : f32
    %6 = vector.broadcast %cst_5 : f32 to vector<128x128xf32>
    %7 = arith.cmpf oge, %5, %6 : vector<128x128xf32>
    %cst_6 = arith.constant 0.00999999977 : f32
    %8 = vector.broadcast %cst_6 : f32 to vector<128x128xf32>
    %9 = arith.mulf %8, %5 : vector<128x128xf32>
    %10 = arith.select %7, %5, %9 : vector<128x128xi1>, vector<128x128xf32>
    %11 = arith.truncf %10 : vector<128x128xf32> to vector<128x128xbf16>
    %c0_7 = arith.constant 0 : index
    %c0_8 = arith.constant 0 : index
    %12 = vector.load %arg4[%c0_7, %c0_8] : memref<128x128xbf16, #tpu.memory_space<vmem>>, vector<128x128xbf16>
    tpu.vector_store %arg4[%c0_7, %c0_8], %11 {strides = array<i32>} : memref<128x128xbf16, #tpu.memory_space<vmem>>, vector<128x128xbf16>,
    return
  }
  func.func @transform_0(%arg0: i32) -> (i32, i32) {
    %c0_i32 = arith.constant 0 : i32
    %c0_i32_0 = arith.constant 0 : i32
    return %arg0, %c0_i32 : i32, i32
  }
  func.func @transform_1(%arg0: i32) -> (i32, i32) {
    %c0_i32 = arith.constant 0 : i32
    %c0_i32_0 = arith.constant 0 : i32
    %c0_i32_1 = arith.constant 0 : i32
    return %c0_i32, %c0_i32_0 : i32, i32
  }
  func.func @transform_2(%arg0: i32) -> (i32, i32) {
    %c0_i32 = arith.constant 0 : i32
    %c0_i32_0 = arith.constant 0 : i32
    %c0_i32_1 = arith.constant 0 : i32
    return %c0_i32, %c0_i32_0 : i32, i32
  }
  func.func @transform_3(%arg0: i32) -> (i32, i32) {
    %c0_i32 = arith.constant 0 : i32
    %c0_i32_0 = arith.constant 0 : i32
    return %arg0, %c0_i32 : i32, i32
  }
}

module attributes {stable_mosaic.version = 11 : i64} {
  func.func @_fused_matmul_kernel(%arg0: i32, %arg1: memref<32x576xbf16, #tpu.memory_space<vmem>>, %arg2: memref<576x128xbf16, #tpu.memory_space<vmem>>, %arg3: memref<1x128xf32, #tpu.memory_space<vmem>>, %arg4: memref<32x128xbf16, #tpu.memory_space<vmem>>) attributes {dimension_semantics = [#tpu.dimension_semantics<parallel>], iteration_bounds = array<i64: 1>, scalar_prefetch = 0 : i64, scratch_operands = 0 : i64, tpu.core_type = #tpu.core_type<tc>, window_params = [{transform_indices = @transform_0, window_bounds = array<i64: 32, 576>}, {pipeline_mode = #tpu.pipeline_mode<synchronous>, transform_indices = @transform_1, window_bounds = array<i64: 576, 128>}, {pipeline_mode = #tpu.pipeline_mode<synchronous>, transform_indices = @transform_2, window_bounds = array<i64: 1, 128>}, {transform_indices = @transform_3, window_bounds = array<i64: 32, 128>}]} {
    %c0 = arith.constant 0 : index
    %c0_0 = arith.constant 0 : index
    %0 = vector.load %arg1[%c0, %c0_0] : memref<32x576xbf16, #tpu.memory_space<vmem>>, vector<32x576xbf16>
    %c0_1 = arith.constant 0 : index
    %c0_2 = arith.constant 0 : index
    %1 = vector.load %arg2[%c0_1, %c0_2] : memref<576x128xbf16, #tpu.memory_space<vmem>>, vector<576x128xbf16>
    %cst = arith.constant dense<0.000000e+00> : vector<32x128xf32>
    %2 = tpu.matmul %0, %1, %cst {dimension_numbers = #tpu.dot_dimension_numbers<[1], [0], [0], [1], [0, 0, 1, 1], [], []>} : vector<32x576xbf16>, vector<576x128xbf16>, vector<32x128xf32> -> vector<32x128xf32>
    %c0_3 = arith.constant 0 : index
    %c0_4 = arith.constant 0 : index
    %3 = vector.load %arg3[%c0_3, %c0_4] : memref<1x128xf32, #tpu.memory_space<vmem>>, vector<1x128xf32>
    %4 = vector.broadcast %3 : vector<1x128xf32> to vector<32x128xf32>
    %5 = arith.addf %2, %4 : vector<32x128xf32>
    %cst_5 = arith.constant 0.000000e+00 : f32
    %6 = vector.broadcast %cst_5 : f32 to vector<32x128xf32>
    %7 = arith.cmpf oge, %5, %6 : vector<32x128xf32>
    %cst_6 = arith.constant 0.00999999977 : f32
    %8 = vector.broadcast %cst_6 : f32 to vector<32x128xf32>
    %9 = arith.mulf %8, %5 : vector<32x128xf32>
    %10 = arith.select %7, %5, %9 : vector<32x128xi1>, vector<32x128xf32>
    %11 = arith.truncf %10 : vector<32x128xf32> to vector<32x128xbf16>
    %c0_7 = arith.constant 0 : index
    %c0_8 = arith.constant 0 : index
    %12 = vector.load %arg4[%c0_7, %c0_8] : memref<32x128xbf16, #tpu.memory_space<vmem>>, vector<32x128xbf16>
    tpu.vector_store %arg4[%c0_7, %c0_8], %11 {strides = array<i32>} : memref<32x128xbf16, #tpu.memory_space<vmem>>, vector<32x128xbf16>,
    return
  }
  func.func @transform_0(%arg0: i32) -> (i32, i32) {
    %c0_i32 = arith.constant 0 : i32
    %c0_i32_0 = arith.constant 0 : i32
    return %arg0, %c0_i32 : i32, i32
  }
  func.func @transform_1(%arg0: i32) -> (i32, i32) {
    %c0_i32 = arith.constant 0 : i32
    %c0_i32_0 = arith.constant 0 : i32
    %c0_i32_1 = arith.constant 0 : i32
    return %c0_i32, %c0_i32_0 : i32, i32
  }
  func.func @transform_2(%arg0: i32) -> (i32, i32) {
    %c0_i32 = arith.constant 0 : i32
    %c0_i32_0 = arith.constant 0 : i32
    %c0_i32_1 = arith.constant 0 : i32
    return %c0_i32, %c0_i32_0 : i32, i32
  }
  func.func @transform_3(%arg0: i32) -> (i32, i32) {
    %c0_i32 = arith.constant 0 : i32
    %c0_i32_0 = arith.constant 0 : i32
    return %arg0, %c0_i32 : i32, i32
  }
}

module attributes {stable_mosaic.version = 11 : i64} {
  func.func @_fused_matmul_kernel(%arg0: i32, %arg1: memref<8x576xbf16, #tpu.memory_space<vmem>>, %arg2: memref<576x128xbf16, #tpu.memory_space<vmem>>, %arg3: memref<1x128xf32, #tpu.memory_space<vmem>>, %arg4: memref<8x128xbf16, #tpu.memory_space<vmem>>) attributes {dimension_semantics = [#tpu.dimension_semantics<parallel>], iteration_bounds = array<i64: 1>, scalar_prefetch = 0 : i64, scratch_operands = 0 : i64, tpu.core_type = #tpu.core_type<tc>, window_params = [{transform_indices = @transform_0, window_bounds = array<i64: 8, 576>}, {pipeline_mode = #tpu.pipeline_mode<synchronous>, transform_indices = @transform_1, window_bounds = array<i64: 576, 128>}, {pipeline_mode = #tpu.pipeline_mode<synchronous>, transform_indices = @transform_2, window_bounds = array<i64: 1, 128>}, {transform_indices = @transform_3, window_bounds = array<i64: 8, 128>}]} {
    %c0 = arith.constant 0 : index
    %c0_0 = arith.constant 0 : index
    %0 = vector.load %arg1[%c0, %c0_0] : memref<8x576xbf16, #tpu.memory_space<vmem>>, vector<8x576xbf16>
    %c0_1 = arith.constant 0 : index
    %c0_2 = arith.constant 0 : index
    %1 = vector.load %arg2[%c0_1, %c0_2] : memref<576x128xbf16, #tpu.memory_space<vmem>>, vector<576x128xbf16>
    %cst = arith.constant dense<0.000000e+00> : vector<8x128xf32>
    %2 = tpu.matmul %0, %1, %cst {dimension_numbers = #tpu.dot_dimension_numbers<[1], [0], [0], [1], [0, 0, 1, 1], [], []>} : vector<8x576xbf16>, vector<576x128xbf16>, vector<8x128xf32> -> vector<8x128xf32>
    %c0_3 = arith.constant 0 : index
    %c0_4 = arith.constant 0 : index
    %3 = vector.load %arg3[%c0_3, %c0_4] : memref<1x128xf32, #tpu.memory_space<vmem>>, vector<1x128xf32>
    %4 = vector.broadcast %3 : vector<1x128xf32> to vector<8x128xf32>
    %5 = arith.addf %2, %4 : vector<8x128xf32>
    %cst_5 = arith.constant 0.000000e+00 : f32
    %6 = vector.broadcast %cst_5 : f32 to vector<8x128xf32>
    %7 = arith.cmpf oge, %5, %6 : vector<8x128xf32>
    %cst_6 = arith.constant 0.00999999977 : f32
    %8 = vector.broadcast %cst_6 : f32 to vector<8x128xf32>
    %9 = arith.mulf %8, %5 : vector<8x128xf32>
    %10 = arith.select %7, %5, %9 : vector<8x128xi1>, vector<8x128xf32>
    %11 = arith.truncf %10 : vector<8x128xf32> to vector<8x128xbf16>
    %c0_7 = arith.constant 0 : index
    %c0_8 = arith.constant 0 : index
    %12 = vector.load %arg4[%c0_7, %c0_8] : memref<8x128xbf16, #tpu.memory_space<vmem>>, vector<8x128xbf16>
    tpu.vector_store %arg4[%c0_7, %c0_8], %11 {strides = array<i32>} : memref<8x128xbf16, #tpu.memory_space<vmem>>, vector<8x128xbf16>,
    return
  }
  func.func @transform_0(%arg0: i32) -> (i32, i32) {
    %c0_i32 = arith.constant 0 : i32
    %c0_i32_0 = arith.constant 0 : i32
    return %arg0, %c0_i32 : i32, i32
  }
  func.func @transform_1(%arg0: i32) -> (i32, i32) {
    %c0_i32 = arith.constant 0 : i32
    %c0_i32_0 = arith.constant 0 : i32
    %c0_i32_1 = arith.constant 0 : i32
    return %c0_i32, %c0_i32_0 : i32, i32
  }
  func.func @transform_2(%arg0: i32) -> (i32, i32) {
    %c0_i32 = arith.constant 0 : i32
    %c0_i32_0 = arith.constant 0 : i32
    %c0_i32_1 = arith.constant 0 : i32
    return %c0_i32, %c0_i32_0 : i32, i32
  }
  func.func @transform_3(%arg0: i32) -> (i32, i32) {
    %c0_i32 = arith.constant 0 : i32
    %c0_i32_0 = arith.constant 0 : i32
    return %arg0, %c0_i32 : i32, i32
  }
}

module attributes {stable_mosaic.version = 11 : i64} {
  func.func @_latent_kernel(%arg0: i32, %arg1: memref<2x256xbf16, #tpu.memory_space<vmem>>, %arg2: memref<256x32xbf16, #tpu.memory_space<vmem>>, %arg3: memref<1x32xf32, #tpu.memory_space<vmem>>, %arg4: memref<256x32xbf16, #tpu.memory_space<vmem>>, %arg5: memref<1x32xf32, #tpu.memory_space<vmem>>, %arg6: memref<2x32xf32, #tpu.memory_space<vmem>>, %arg7: memref<32x256xbf16, #tpu.memory_space<vmem>>, %arg8: memref<1x256xf32, #tpu.memory_space<vmem>>, %arg9: memref<2x32xf32, #tpu.memory_space<vmem>>, %arg10: memref<2x32xf32, #tpu.memory_space<vmem>>, %arg11: memref<2x256xbf16, #tpu.memory_space<vmem>>) attributes {dimension_semantics = [#tpu.dimension_semantics<arbitrary>], iteration_bounds = array<i64: 1>, scalar_prefetch = 0 : i64, scratch_operands = 0 : i64, tpu.core_type = #tpu.core_type<tc>, window_params = [{pipeline_mode = #tpu.pipeline_mode<synchronous>, transform_indices = @transform_0, window_bounds = array<i64: 2, 256>}, {pipeline_mode = #tpu.pipeline_mode<synchronous>, transform_indices = @transform_1, window_bounds = array<i64: 256, 32>}, {pipeline_mode = #tpu.pipeline_mode<synchronous>, transform_indices = @transform_2, window_bounds = array<i64: 1, 32>}, {pipeline_mode = #tpu.pipeline_mode<synchronous>, transform_indices = @transform_3, window_bounds = array<i64: 256, 32>}, {pipeline_mode = #tpu.pipeline_mode<synchronous>, transform_indices = @transform_4, window_bounds = array<i64: 1, 32>}, {pipeline_mode = #tpu.pipeline_mode<synchronous>, transform_indices = @transform_5, window_bounds = array<i64: 2, 32>}, {pipeline_mode = #tpu.pipeline_mode<synchronous>, transform_indices = @transform_6, window_bounds = array<i64: 32, 256>}, {pipeline_mode = #tpu.pipeline_mode<synchronous>, transform_indices = @transform_7, window_bounds = array<i64: 1, 256>}, {pipeline_mode = #tpu.pipeline_mode<synchronous>, transform_indices = @transform_8, window_bounds = array<i64: 2, 32>}, {pipeline_mode = #tpu.pipeline_mode<synchronous>, transform_indices = @transform_9, window_bounds = array<i64: 2, 32>}, {pipeline_mode = #tpu.pipeline_mode<synchronous>, transform_indices = @transform_10, window_bounds = array<i64: 2, 256>}]} {
    %c0 = arith.constant 0 : index
    %c0_0 = arith.constant 0 : index
    %0 = vector.load %arg1[%c0, %c0_0] : memref<2x256xbf16, #tpu.memory_space<vmem>>, vector<2x256xbf16>
    %c0_1 = arith.constant 0 : index
    %c0_2 = arith.constant 0 : index
    %1 = vector.load %arg2[%c0_1, %c0_2] : memref<256x32xbf16, #tpu.memory_space<vmem>>, vector<256x32xbf16>
    %cst = arith.constant dense<0.000000e+00> : vector<2x32xf32>
    %2 = tpu.matmul %0, %1, %cst {dimension_numbers = #tpu.dot_dimension_numbers<[1], [0], [0], [1], [0, 0, 1, 1], [], []>} : vector<2x256xbf16>, vector<256x32xbf16>, vector<2x32xf32> -> vector<2x32xf32>
    %c0_3 = arith.constant 0 : index
    %c0_4 = arith.constant 0 : index
    %3 = vector.load %arg3[%c0_3, %c0_4] : memref<1x32xf32, #tpu.memory_space<vmem>>, vector<1x32xf32>
    %4 = vector.broadcast %3 : vector<1x32xf32> to vector<2x32xf32>
    %5 = arith.addf %2, %4 : vector<2x32xf32>
    %cst_5 = arith.constant 0.000000e+00 : f32
    %6 = vector.broadcast %cst_5 : f32 to vector<2x32xf32>
    %7 = arith.cmpf oge, %5, %6 : vector<2x32xf32>
    %cst_6 = arith.constant 0.00999999977 : f32
    %8 = vector.broadcast %cst_6 : f32 to vector<2x32xf32>
    %9 = arith.mulf %8, %5 : vector<2x32xf32>
    %10 = arith.select %7, %5, %9 : vector<2x32xi1>, vector<2x32xf32>
    %c0_7 = arith.constant 0 : index
    %c0_8 = arith.constant 0 : index
    %11 = vector.load %arg4[%c0_7, %c0_8] : memref<256x32xbf16, #tpu.memory_space<vmem>>, vector<256x32xbf16>
    %cst_9 = arith.constant dense<0.000000e+00> : vector<2x32xf32>
    %12 = tpu.matmul %0, %11, %cst_9 {dimension_numbers = #tpu.dot_dimension_numbers<[1], [0], [0], [1], [0, 0, 1, 1], [], []>} : vector<2x256xbf16>, vector<256x32xbf16>, vector<2x32xf32> -> vector<2x32xf32>
    %c0_10 = arith.constant 0 : index
    %c0_11 = arith.constant 0 : index
    %13 = vector.load %arg5[%c0_10, %c0_11] : memref<1x32xf32, #tpu.memory_space<vmem>>, vector<1x32xf32>
    %14 = vector.broadcast %13 : vector<1x32xf32> to vector<2x32xf32>
    %15 = arith.addf %12, %14 : vector<2x32xf32>
    %cst_12 = arith.constant 0.000000e+00 : f32
    %16 = vector.broadcast %cst_12 : f32 to vector<2x32xf32>
    %17 = arith.cmpf oge, %15, %16 : vector<2x32xf32>
    %cst_13 = arith.constant 0.00999999977 : f32
    %18 = vector.broadcast %cst_13 : f32 to vector<2x32xf32>
    %19 = arith.mulf %18, %15 : vector<2x32xf32>
    %20 = arith.select %17, %15, %19 : vector<2x32xi1>, vector<2x32xf32>
    %c0_14 = arith.constant 0 : index
    %c0_15 = arith.constant 0 : index
    %21 = vector.load %arg6[%c0_14, %c0_15] : memref<2x32xf32, #tpu.memory_space<vmem>>, vector<2x32xf32>
    %cst_16 = arith.constant 5.000000e-01 : f32
    %22 = vector.broadcast %cst_16 : f32 to vector<2x32xf32>
    %23 = arith.mulf %22, %20 : vector<2x32xf32>
    %24 = math.exp %23 : vector<2x32xf32>
    %25 = arith.mulf %21, %24 : vector<2x32xf32>
    %26 = arith.addf %10, %25 : vector<2x32xf32>
    %27 = arith.truncf %26 : vector<2x32xf32> to vector<2x32xbf16>
    %c0_17 = arith.constant 0 : index
    %c0_18 = arith.constant 0 : index
    %28 = vector.load %arg7[%c0_17, %c0_18] : memref<32x256xbf16, #tpu.memory_space<vmem>>, vector<32x256xbf16>
    %cst_19 = arith.constant dense<0.000000e+00> : vector<2x256xf32>
    %29 = tpu.matmul %27, %28, %cst_19 {dimension_numbers = #tpu.dot_dimension_numbers<[1], [0], [0], [1], [0, 0, 1, 1], [], []>} : vector<2x32xbf16>, vector<32x256xbf16>, vector<2x256xf32> -> vector<2x256xf32>
    %c0_20 = arith.constant 0 : index
    %c0_21 = arith.constant 0 : index
    %30 = vector.load %arg8[%c0_20, %c0_21] : memref<1x256xf32, #tpu.memory_space<vmem>>, vector<1x256xf32>
    %31 = vector.broadcast %30 : vector<1x256xf32> to vector<2x256xf32>
    %32 = arith.addf %29, %31 : vector<2x256xf32>
    %cst_22 = arith.constant 0.000000e+00 : f32
    %33 = vector.broadcast %cst_22 : f32 to vector<2x256xf32>
    %34 = arith.cmpf oge, %32, %33 : vector<2x256xf32>
    %cst_23 = arith.constant 0.00999999977 : f32
    %35 = vector.broadcast %cst_23 : f32 to vector<2x256xf32>
    %36 = arith.mulf %35, %32 : vector<2x256xf32>
    %37 = arith.select %34, %32, %36 : vector<2x256xi1>, vector<2x256xf32>
    %c0_24 = arith.constant 0 : index
    %c0_25 = arith.constant 0 : index
    %38 = vector.load %arg9[%c0_24, %c0_25] : memref<2x32xf32, #tpu.memory_space<vmem>>, vector<2x32xf32>
    tpu.vector_store %arg9[%c0_24, %c0_25], %10 {strides = array<i32>} : memref<2x32xf32, #tpu.memory_space<vmem>>, vector<2x32xf32>,
    %c0_26 = arith.constant 0 : index
    %c0_27 = arith.constant 0 : index
    %39 = vector.load %arg10[%c0_26, %c0_27] : memref<2x32xf32, #tpu.memory_space<vmem>>, vector<2x32xf32>
    tpu.vector_store %arg10[%c0_26, %c0_27], %20 {strides = array<i32>} : memref<2x32xf32, #tpu.memory_space<vmem>>, vector<2x32xf32>,
    %40 = arith.truncf %37 : vector<2x256xf32> to vector<2x256xbf16>
    %c0_28 = arith.constant 0 : index
    %c0_29 = arith.constant 0 : index
    %41 = vector.load %arg11[%c0_28, %c0_29] : memref<2x256xbf16, #tpu.memory_space<vmem>>, vector<2x256xbf16>
    tpu.vector_store %arg11[%c0_28, %c0_29], %40 {strides = array<i32>} : memref<2x256xbf16, #tpu.memory_space<vmem>>, vector<2x256xbf16>,
    return
  }
  func.func @transform_0(%arg0: i32) -> (i32, i32) {
    %c0_i32 = arith.constant 0 : i32
    %c0_i32_0 = arith.constant 0 : i32
    %c0_i32_1 = arith.constant 0 : i32
    return %c0_i32, %c0_i32_0 : i32, i32
  }
  func.func @transform_1(%arg0: i32) -> (i32, i32) {
    %c0_i32 = arith.constant 0 : i32
    %c0_i32_0 = arith.constant 0 : i32
    %c0_i32_1 = arith.constant 0 : i32
    return %c0_i32, %c0_i32_0 : i32, i32
  }
  func.func @transform_2(%arg0: i32) -> (i32, i32) {
    %c0_i32 = arith.constant 0 : i32
    %c0_i32_0 = arith.constant 0 : i32
    %c0_i32_1 = arith.constant 0 : i32
    return %c0_i32, %c0_i32_0 : i32, i32
  }
  func.func @transform_3(%arg0: i32) -> (i32, i32) {
    %c0_i32 = arith.constant 0 : i32
    %c0_i32_0 = arith.constant 0 : i32
    %c0_i32_1 = arith.constant 0 : i32
    return %c0_i32, %c0_i32_0 : i32, i32
  }
  func.func @transform_4(%arg0: i32) -> (i32, i32) {
    %c0_i32 = arith.constant 0 : i32
    %c0_i32_0 = arith.constant 0 : i32
    %c0_i32_1 = arith.constant 0 : i32
    return %c0_i32, %c0_i32_0 : i32, i32
  }
  func.func @transform_5(%arg0: i32) -> (i32, i32) {
    %c0_i32 = arith.constant 0 : i32
    %c0_i32_0 = arith.constant 0 : i32
    %c0_i32_1 = arith.constant 0 : i32
    return %c0_i32, %c0_i32_0 : i32, i32
  }
  func.func @transform_6(%arg0: i32) -> (i32, i32) {
    %c0_i32 = arith.constant 0 : i32
    %c0_i32_0 = arith.constant 0 : i32
    %c0_i32_1 = arith.constant 0 : i32
    return %c0_i32, %c0_i32_0 : i32, i32
  }
  func.func @transform_7(%arg0: i32) -> (i32, i32) {
    %c0_i32 = arith.constant 0 : i32
    %c0_i32_0 = arith.constant 0 : i32
    %c0_i32_1 = arith.constant 0 : i32
    return %c0_i32, %c0_i32_0 : i32, i32
  }
  func.func @transform_8(%arg0: i32) -> (i32, i32) {
    %c0_i32 = arith.constant 0 : i32
    %c0_i32_0 = arith.constant 0 : i32
    %c0_i32_1 = arith.constant 0 : i32
    return %c0_i32, %c0_i32_0 : i32, i32
  }
  func.func @transform_9(%arg0: i32) -> (i32, i32) {
    %c0_i32 = arith.constant 0 : i32
    %c0_i32_0 = arith.constant 0 : i32
    %c0_i32_1 = arith.constant 0 : i32
    return %c0_i32, %c0_i32_0 : i32, i32
  }
  func.func @transform_10(%arg0: i32) -> (i32, i32) {
    %c0_i32 = arith.constant 0 : i32
    %c0_i32_0 = arith.constant 0 : i32
    %c0_i32_1 = arith.constant 0 : i32
    return %c0_i32, %c0_i32_0 : i32, i32
  }
}

module attributes {stable_mosaic.version = 11 : i64} {
  func.func @_fused_matmul_kernel(%arg0: i32, %arg1: memref<128x576xbf16, #tpu.memory_space<vmem>>, %arg2: memref<576x128xbf16, #tpu.memory_space<vmem>>, %arg3: memref<1x128xf32, #tpu.memory_space<vmem>>, %arg4: memref<128x128xbf16, #tpu.memory_space<vmem>>) attributes {dimension_semantics = [#tpu.dimension_semantics<parallel>], iteration_bounds = array<i64: 1>, scalar_prefetch = 0 : i64, scratch_operands = 0 : i64, tpu.core_type = #tpu.core_type<tc>, window_params = [{transform_indices = @transform_0, window_bounds = array<i64: 128, 576>}, {pipeline_mode = #tpu.pipeline_mode<synchronous>, transform_indices = @transform_1, window_bounds = array<i64: 576, 128>}, {pipeline_mode = #tpu.pipeline_mode<synchronous>, transform_indices = @transform_2, window_bounds = array<i64: 1, 128>}, {transform_indices = @transform_3, window_bounds = array<i64: 128, 128>}]} {
    %c0 = arith.constant 0 : index
    %c0_0 = arith.constant 0 : index
    %0 = vector.load %arg1[%c0, %c0_0] : memref<128x576xbf16, #tpu.memory_space<vmem>>, vector<128x576xbf16>
    %c0_1 = arith.constant 0 : index
    %c0_2 = arith.constant 0 : index
    %1 = vector.load %arg2[%c0_1, %c0_2] : memref<576x128xbf16, #tpu.memory_space<vmem>>, vector<576x128xbf16>
    %cst = arith.constant dense<0.000000e+00> : vector<128x128xf32>
    %2 = tpu.matmul %0, %1, %cst {dimension_numbers = #tpu.dot_dimension_numbers<[1], [0], [0], [1], [0, 0, 1, 1], [], []>} : vector<128x576xbf16>, vector<576x128xbf16>, vector<128x128xf32> -> vector<128x128xf32>
    %c0_3 = arith.constant 0 : index
    %c0_4 = arith.constant 0 : index
    %3 = vector.load %arg3[%c0_3, %c0_4] : memref<1x128xf32, #tpu.memory_space<vmem>>, vector<1x128xf32>
    %4 = vector.broadcast %3 : vector<1x128xf32> to vector<128x128xf32>
    %5 = arith.addf %2, %4 : vector<128x128xf32>
    %cst_5 = arith.constant 0.000000e+00 : f32
    %6 = vector.broadcast %cst_5 : f32 to vector<128x128xf32>
    %7 = arith.cmpf oge, %5, %6 : vector<128x128xf32>
    %cst_6 = arith.constant 0.00999999977 : f32
    %8 = vector.broadcast %cst_6 : f32 to vector<128x128xf32>
    %9 = arith.mulf %8, %5 : vector<128x128xf32>
    %10 = arith.select %7, %5, %9 : vector<128x128xi1>, vector<128x128xf32>
    %11 = arith.truncf %10 : vector<128x128xf32> to vector<128x128xbf16>
    %c0_7 = arith.constant 0 : index
    %c0_8 = arith.constant 0 : index
    %12 = vector.load %arg4[%c0_7, %c0_8] : memref<128x128xbf16, #tpu.memory_space<vmem>>, vector<128x128xbf16>
    tpu.vector_store %arg4[%c0_7, %c0_8], %11 {strides = array<i32>} : memref<128x128xbf16, #tpu.memory_space<vmem>>, vector<128x128xbf16>,
    return
  }
  func.func @transform_0(%arg0: i32) -> (i32, i32) {
    %c0_i32 = arith.constant 0 : i32
    %c0_i32_0 = arith.constant 0 : i32
    return %arg0, %c0_i32 : i32, i32
  }
  func.func @transform_1(%arg0: i32) -> (i32, i32) {
    %c0_i32 = arith.constant 0 : i32
    %c0_i32_0 = arith.constant 0 : i32
    %c0_i32_1 = arith.constant 0 : i32
    return %c0_i32, %c0_i32_0 : i32, i32
  }
  func.func @transform_2(%arg0: i32) -> (i32, i32) {
    %c0_i32 = arith.constant 0 : i32
    %c0_i32_0 = arith.constant 0 : i32
    %c0_i32_1 = arith.constant 0 : i32
    return %c0_i32, %c0_i32_0 : i32, i32
  }
  func.func @transform_3(%arg0: i32) -> (i32, i32) {
    %c0_i32 = arith.constant 0 : i32
    %c0_i32_0 = arith.constant 0 : i32
    return %arg0, %c0_i32 : i32, i32
  }
}

module attributes {stable_mosaic.version = 11 : i64} {
  func.func @_fused_matmul_kernel(%arg0: i32, %arg1: memref<256x576xbf16, #tpu.memory_space<vmem>>, %arg2: memref<576x128xbf16, #tpu.memory_space<vmem>>, %arg3: memref<1x128xf32, #tpu.memory_space<vmem>>, %arg4: memref<256x128xbf16, #tpu.memory_space<vmem>>) attributes {dimension_semantics = [#tpu.dimension_semantics<parallel>], iteration_bounds = array<i64: 2>, scalar_prefetch = 0 : i64, scratch_operands = 0 : i64, tpu.core_type = #tpu.core_type<tc>, window_params = [{transform_indices = @transform_0, window_bounds = array<i64: 256, 576>}, {pipeline_mode = #tpu.pipeline_mode<synchronous>, transform_indices = @transform_1, window_bounds = array<i64: 576, 128>}, {pipeline_mode = #tpu.pipeline_mode<synchronous>, transform_indices = @transform_2, window_bounds = array<i64: 1, 128>}, {transform_indices = @transform_3, window_bounds = array<i64: 256, 128>}]} {
    %c0 = arith.constant 0 : index
    %c0_0 = arith.constant 0 : index
    %0 = vector.load %arg1[%c0, %c0_0] : memref<256x576xbf16, #tpu.memory_space<vmem>>, vector<256x576xbf16>
    %c0_1 = arith.constant 0 : index
    %c0_2 = arith.constant 0 : index
    %1 = vector.load %arg2[%c0_1, %c0_2] : memref<576x128xbf16, #tpu.memory_space<vmem>>, vector<576x128xbf16>
    %cst = arith.constant dense<0.000000e+00> : vector<256x128xf32>
    %2 = tpu.matmul %0, %1, %cst {dimension_numbers = #tpu.dot_dimension_numbers<[1], [0], [0], [1], [0, 0, 1, 1], [], []>} : vector<256x576xbf16>, vector<576x128xbf16>, vector<256x128xf32> -> vector<256x128xf32>
    %c0_3 = arith.constant 0 : index
    %c0_4 = arith.constant 0 : index
    %3 = vector.load %arg3[%c0_3, %c0_4] : memref<1x128xf32, #tpu.memory_space<vmem>>, vector<1x128xf32>
    %4 = vector.broadcast %3 : vector<1x128xf32> to vector<256x128xf32>
    %5 = arith.addf %2, %4 : vector<256x128xf32>
    %cst_5 = arith.constant 0.000000e+00 : f32
    %6 = vector.broadcast %cst_5 : f32 to vector<256x128xf32>
    %7 = arith.cmpf oge, %5, %6 : vector<256x128xf32>
    %cst_6 = arith.constant 0.00999999977 : f32
    %8 = vector.broadcast %cst_6 : f32 to vector<256x128xf32>
    %9 = arith.mulf %8, %5 : vector<256x128xf32>
    %10 = arith.select %7, %5, %9 : vector<256x128xi1>, vector<256x128xf32>
    %11 = arith.truncf %10 : vector<256x128xf32> to vector<256x128xbf16>
    %c0_7 = arith.constant 0 : index
    %c0_8 = arith.constant 0 : index
    %12 = vector.load %arg4[%c0_7, %c0_8] : memref<256x128xbf16, #tpu.memory_space<vmem>>, vector<256x128xbf16>
    tpu.vector_store %arg4[%c0_7, %c0_8], %11 {strides = array<i32>} : memref<256x128xbf16, #tpu.memory_space<vmem>>, vector<256x128xbf16>,
    return
  }
  func.func @transform_0(%arg0: i32) -> (i32, i32) {
    %c0_i32 = arith.constant 0 : i32
    %c0_i32_0 = arith.constant 0 : i32
    return %arg0, %c0_i32 : i32, i32
  }
  func.func @transform_1(%arg0: i32) -> (i32, i32) {
    %c0_i32 = arith.constant 0 : i32
    %c0_i32_0 = arith.constant 0 : i32
    %c0_i32_1 = arith.constant 0 : i32
    return %c0_i32, %c0_i32_0 : i32, i32
  }
  func.func @transform_2(%arg0: i32) -> (i32, i32) {
    %c0_i32 = arith.constant 0 : i32
    %c0_i32_0 = arith.constant 0 : i32
    %c0_i32_1 = arith.constant 0 : i32
    return %c0_i32, %c0_i32_0 : i32, i32
  }
  func.func @transform_3(%arg0: i32) -> (i32, i32) {
    %c0_i32 = arith.constant 0 : i32
    %c0_i32_0 = arith.constant 0 : i32
    return %arg0, %c0_i32 : i32, i32
  }
}

module attributes {stable_mosaic.version = 11 : i64} {
  func.func @_fused_matmul_kernel(%arg0: i32, %arg1: memref<256x288xbf16, #tpu.memory_space<vmem>>, %arg2: memref<288x128xbf16, #tpu.memory_space<vmem>>, %arg3: memref<1x128xf32, #tpu.memory_space<vmem>>, %arg4: memref<256x128xf32, #tpu.memory_space<vmem>>) attributes {dimension_semantics = [#tpu.dimension_semantics<parallel>], iteration_bounds = array<i64: 8>, scalar_prefetch = 0 : i64, scratch_operands = 0 : i64, tpu.core_type = #tpu.core_type<tc>, window_params = [{transform_indices = @transform_0, window_bounds = array<i64: 256, 288>}, {pipeline_mode = #tpu.pipeline_mode<synchronous>, transform_indices = @transform_1, window_bounds = array<i64: 288, 128>}, {pipeline_mode = #tpu.pipeline_mode<synchronous>, transform_indices = @transform_2, window_bounds = array<i64: 1, 128>}, {transform_indices = @transform_3, window_bounds = array<i64: 256, 128>}]} {
    %c0 = arith.constant 0 : index
    %c0_0 = arith.constant 0 : index
    %0 = vector.load %arg1[%c0, %c0_0] : memref<256x288xbf16, #tpu.memory_space<vmem>>, vector<256x288xbf16>
    %c0_1 = arith.constant 0 : index
    %c0_2 = arith.constant 0 : index
    %1 = vector.load %arg2[%c0_1, %c0_2] : memref<288x128xbf16, #tpu.memory_space<vmem>>, vector<288x128xbf16>
    %cst = arith.constant dense<0.000000e+00> : vector<256x128xf32>
    %2 = tpu.matmul %0, %1, %cst {dimension_numbers = #tpu.dot_dimension_numbers<[1], [0], [0], [1], [0, 0, 1, 1], [], []>} : vector<256x288xbf16>, vector<288x128xbf16>, vector<256x128xf32> -> vector<256x128xf32>
    %c0_3 = arith.constant 0 : index
    %c0_4 = arith.constant 0 : index
    %3 = vector.load %arg3[%c0_3, %c0_4] : memref<1x128xf32, #tpu.memory_space<vmem>>, vector<1x128xf32>
    %4 = vector.broadcast %3 : vector<1x128xf32> to vector<256x128xf32>
    %5 = arith.addf %2, %4 : vector<256x128xf32>
    %cst_5 = arith.constant 0.000000e+00 : f32
    %6 = vector.broadcast %cst_5 : f32 to vector<256x128xf32>
    %7 = arith.subf %6, %5 : vector<256x128xf32>
    %8 = math.exp %7 : vector<256x128xf32>
    %cst_6 = arith.constant 1.000000e+00 : f32
    %9 = vector.broadcast %cst_6 : f32 to vector<256x128xf32>
    %10 = arith.addf %9, %8 : vector<256x128xf32>
    %11 = tpu.reciprocal %10 {approx = true} : vector<256x128xf32> -> vector<256x128xf32>
    %cst_7 = arith.constant 0.000000e+00 : f32
    %cst_8 = arith.constant 1.000000e+00 : f32
    %12 = vector.broadcast %cst_7 : f32 to vector<256x128xf32>
    %13 = arith.maximumf %12, %11 : vector<256x128xf32>
    %14 = vector.broadcast %cst_8 : f32 to vector<256x128xf32>
    %15 = arith.minimumf %14, %13 : vector<256x128xf32>
    %c0_9 = arith.constant 0 : index
    %c0_10 = arith.constant 0 : index
    %16 = vector.load %arg4[%c0_9, %c0_10] : memref<256x128xf32, #tpu.memory_space<vmem>>, vector<256x128xf32>
    tpu.vector_store %arg4[%c0_9, %c0_10], %15 {strides = array<i32>} : memref<256x128xf32, #tpu.memory_space<vmem>>, vector<256x128xf32>,
    return
  }
  func.func @transform_0(%arg0: i32) -> (i32, i32) {
    %c0_i32 = arith.constant 0 : i32
    %c0_i32_0 = arith.constant 0 : i32
    return %arg0, %c0_i32 : i32, i32
  }
  func.func @transform_1(%arg0: i32) -> (i32, i32) {
    %c0_i32 = arith.constant 0 : i32
    %c0_i32_0 = arith.constant 0 : i32
    %c0_i32_1 = arith.constant 0 : i32
    return %c0_i32, %c0_i32_0 : i32, i32
  }
  func.func @transform_2(%arg0: i32) -> (i32, i32) {
    %c0_i32 = arith.constant 0 : i32
    %c0_i32_0 = arith.constant 0 : i32
    %c0_i32_1 = arith.constant 0 : i32
    return %c0_i32, %c0_i32_0 : i32, i32
  }
  func.func @transform_3(%arg0: i32) -> (i32, i32) {
    %c0_i32 = arith.constant 0 : i32
    %c0_i32_0 = arith.constant 0 : i32
    return %arg0, %c0_i32 : i32, i32
  }
}

</mosaic_0001>

<bundles_post_ra>
// kernel: vae_forward.9
= control target key start
LH: loop header
LB: loop body
LE: loop exit
PB: predicated region body
PF: predicated region fallthrough
CT: control target
= control target key end

     0   :  { %s1157_s12 = smov 0   ;;  %s1281_s0 = inlined_call_operand.vmem [shape: bf16[512,27], index: 0, kind: input, shape index: {}]   ;;  %s1282_s1 = inlined_call_operand.vmem [shape: bf16[27,128], index: 1, kind: input, shape index: {}]   ;;  %s1283_s2 = inlined_call_operand.vmem [shape: f32[1,128], index: 2, kind: input, shape index: {}]   ;;  %s1284_s3 = inlined_call_operand.vmem [shape: bf16[512,128], index: 3, kind: output, shape index: {}]  }
   0x1 LB: > { %s838_s13 = sadd.s32 4294967295, %s1134_s12   ;;  %p842_p0 = scmp.ge.s32.totalorder %s1134_s12, 1  ;;  %s1134_s12 = sphi %s1157_s12, %s13_s12  }
   0x2   : > { %p138_p1 = scmp.lt.s32.totalorder %s1134_s12, 3 }
   0x4   : > { %p139_p2 = pnand %p842_p0, %p138_p1 }
   0x5   : > { %v1110_v0 = vld [vmem:[%s1282_s1] sm:$0xff] (!%p139_p2)   ;;  %vm358_vm0 = vcmask (!%p139_p2), 1044480   ;;  %v1111_v1 = vld [vmem:[%s1282_s1 + $0x8] sm:$0x3f] (!%p139_p2)   ;;  %vm359_vm1 = vcmask (!%p139_p2), 1045504   ;;  %s843_s18 = sshll.u32 (!%p139_p2), %s838_s13, 5 }
   0x6   : > { %142 = sbr.rel (%p139_p2) target bundleno = 271 (0x10f), region = 32  ;;  %1061 = vmatprep.subr.bf16.mxu0 (!%p139_p2), %v1110_v0  ;;  %1097 = vmatprep.subr.bf16.mxu1 (!%p139_p2), %v1110_v0  ;;  %v1136_v2 = vmov (!%p139_p2), 65535   ;;  %p163_p3 = scmp.lt.s32.totalorder (!%p139_p2), %s843_s18, 63  ;;  %vm309_vm2 = vcmask (!%p139_p2), 220160   ;;  %v1216_v22 = vld [vmem:[%s1283_s2] ss:$0 sm:$0xff] (!%p139_p2) }
   0x7   : > { %1062 = vmatpush3.bf16.msra.mxu0 (!%p139_p2), %v1110_v0  ;;  %1099 = vmatpush3.bf16.msra.mxu1 (!%p139_p2), %v1110_v0  ;;  %v360_v3 = vsel (!%p139_p2), %vm358_vm0, 4294967295, %v1136_v2 }
   0x8   : > { %v361_v4 = vsel (!%p139_p2), %vm359_vm1, %v360_v3, 0 }
   0x9   : > { %v363_v5 = vand.u32 (!%p139_p2), %v1111_v1, %v361_v4 }
   0xb   : > { %1063 = vmatprep.subr.bf16.mxu0 (!%p139_p2), %v363_v5  ;;  %1098 = vmatprep.subr.bf16.mxu1 (!%p139_p2), %v363_v5 }
   0xc   : > { %1064 = vmatpush3.bf16.msra.mxu0 (!%p139_p2), %v363_v5  ;;  %1100 = vmatpush3.bf16.msra.mxu1 (!%p139_p2), %v363_v5 }
   0xd   : > { %s1286_s18 = smov (!%p163_p3, %s843_s18), 63 }
   0xe   : > { %s844_s19 = sshll.u32 %s1286_s18, 2 }
   0xf   : > { %s1179_s22 = scalar_lea.vmem %s1281_s0, %s844_s19  ;;  %s1231_s27 = scalar_lea.vmem %s1284_s3, %s844_s19 }
  0x10   : > { %v1112_v6 = vld [vmem:[%s1179_s22] sm:$0xff]   ;;  %v1114_v8 = vld [vmem:[%s1179_s22 + $0x8] sm:$0xff]   ;;  %v1116_v10 = vld [vmem:[%s1179_s22 + $0x10] sm:$0xff]  }
  0x11   : > { %v1113_v7 = vld [vmem:[%s1179_s22 + $0x40] sm:$0xff]   ;;  %1065 = vmatprep.mubr.msk.bf16.mxu0 %vm309_vm2, %v1112_v6  ;;  %v1115_v9 = vld [vmem:[%s1179_s22 + $0x48] sm:$0xff]   ;;  %v1117_v11 = vld [vmem:[%s1179_s22 + $0x50] sm:$0xff]  }
  0x12   : > { %1081 = vmatprep.mubr.msk.bf16.mxu1 %vm309_vm2, %v1113_v7  ;;  %1066 = vmatmul.mubr.msk.bf16.vlgmr.msra.gmra.mrb[0].mxu0 %vm309_vm2, %v1114_v8  ;;  %v1118_v12 = vld [vmem:[%s1179_s22 + $0x18] sm:$0xff]   ;;  %v1120_v14 = vld [vmem:[%s1179_s22 + $0x20] sm:$0xff]   ;;  %v1122_v16 = vld [vmem:[%s1179_s22 + $0x28] sm:$0xff]  }
  0x13   : > { %1082 = vmatmul.mubr.msk.bf16.vlgmr.msra.gmra.mrb[0].mxu1 %vm309_vm2, %v1115_v9  ;;  %1069 = vmatprep.mubr.msk.bf16.mxu0 %vm309_vm2, %v1116_v10  ;;  %v1119_v13 = vld [vmem:[%s1179_s22 + $0x58] sm:$0xff]   ;;  %v1121_v15 = vld [vmem:[%s1179_s22 + $0x60] sm:$0xff]   ;;  %v1123_v17 = vld [vmem:[%s1179_s22 + $0x68] sm:$0xff]  }
  0x14   : > { %1085 = vmatprep.mubr.msk.bf16.mxu1 %vm309_vm2, %v1117_v11  ;;  %v1124_v18 = vld [vmem:[%s1179_s22 + $0x30] sm:$0xff]   ;;  %v1126_v20 = vld [vmem:[%s1179_s22 + $0x38] sm:$0xff]  }
  0x15   : > { %v1125_v19 = vld [vmem:[%s1179_s22 + $0x70] sm:$0xff]   ;;  %v1127_v21 = vld [vmem:[%s1179_s22 + $0x78] sm:$0xff]  }
  0x1a   : > { %1070 = vmatmul.mubr.msk.bf16.gmra.mrb[4].mxu0 %vm309_vm2, %v1118_v12 }
  0x1b   : > { %1086 = vmatmul.mubr.msk.bf16.gmra.mrb[4].mxu1 %vm309_vm2, %v1119_v13  ;;  %1073 = vmatprep.mubr.msk.bf16.mxu0 %vm309_vm2, %v1120_v14 }
  0x1c   : > { %1089 = vmatprep.mubr.msk.bf16.mxu1 %vm309_vm2, %v1121_v15 }
  0x22   : > { %1074 = vmatmul.mubr.msk.bf16.gmra.mrb[8].mxu0 %vm309_vm2, %v1122_v16 }
  0x23   : > { %1090 = vmatmul.mubr.msk.bf16.gmra.mrb[8].mxu1 %vm309_vm2, %v1123_v17  ;;  %1077 = vmatprep.mubr.msk.bf16.mxu0 %vm309_vm2, %v1124_v18 }
  0x24   : > { %1093 = vmatprep.mubr.msk.bf16.mxu1 %vm309_vm2, %v1125_v19 }
  0x2a   : > { %1078 = vmatmul.mubr.msk.bf16.gmra.mrb[12].mxu0 %vm309_vm2, %v1126_v20 }
  0x2b   : > { %1094 = vmatmul.mubr.msk.bf16.gmra.mrb[12].mxu1 %vm309_vm2, %v1127_v21 }
  0xe5   : > { %v1067_v23 = vpop.f32.mrb[0].mxu0 }
  0xe6   : > { %v408_v24 = vadd.f32 %v1067_v23, %v1216_v22  ;;  %v1083_v25 = vpop.f32.mrb[0].mxu1  ;;  %v399_v26 = vpop.f32.mrb[1].mxu0 }
  0xe7   : > { %v472_v27 = vadd.f32 %v1083_v25, %v1216_v22  ;;  %v400_v28 = vadd.f32 %v1216_v22, %v399_v26  ;;  %v463_v29 = vpop.f32.mrb[1].mxu1  ;;  %v1068_v30 = vpop.f32.mrb[2].mxu0 }
  0xe8   : > { %vm528_vm3 = vcmp.ge.f32.partialorder %v408_v24, 0.0  ;;  %v560_v31 = vmul.f32 0.01, %v408_v24  ;;  %v464_v32 = vadd.f32 %v1216_v22, %v463_v29  ;;  %v411_v33 = vadd.f32 %v1068_v30, %v1216_v22  ;;  %v1084_v34 = vpop.f32.mrb[2].mxu1  ;;  %v402_v35 = vpop.f32.mrb[3].mxu0 }
  0xe9   : > { %vm544_vm4 = vcmp.ge.f32.partialorder %v472_v27, 0.0  ;;  %v576_v36 = vmul.f32 0.01, %v472_v27  ;;  %vm526_vm5 = vcmp.ge.f32.partialorder %v400_v28, 0.0  ;;  %v558_v37 = vmul.f32 0.01, %v400_v28 }
  0xea   : > { %vm542_vm6 = vcmp.ge.f32.partialorder %v464_v32, 0.0  ;;  %v574_v38 = vmul.f32 0.01, %v464_v32  ;;  %vm529_vm7 = vcmp.ge.f32.partialorder %v411_v33, 0.0  ;;  %v466_v39 = vpop.f32.mrb[3].mxu1  ;;  %v592_v40 = vsel %vm528_vm3, %v408_v24, %v560_v31 }
  0xeb   : > { %v561_v41 = vmul.f32 0.01, %v411_v33  ;;  %v475_v42 = vadd.f32 %v1084_v34, %v1216_v22  ;;  %v608_v43 = vsel %vm544_vm4, %v472_v27, %v576_v36  ;;  %v590_v44 = vsel %vm526_vm5, %v400_v28, %v558_v37 }
  0xec   : > { %v403_v45 = vadd.f32 %v1216_v22, %v402_v35  ;;  %v467_v46 = vadd.f32 %v1216_v22, %v466_v39  ;;  %v606_v47 = vsel %vm542_vm6, %v464_v32, %v574_v38 }
  0xed   : > { %v593_v48 = vsel %vm529_vm7, %v411_v33, %v561_v41  ;;  %vm545_vm8 = vcmp.ge.f32.partialorder %v475_v42, 0.0  ;;  %v577_v49 = vmul.f32 0.01, %v475_v42  ;;  %v1071_v50 = vpop.f32.mrb[4].mxu0 }
  0xee   : > { %v956_v51 = vpack.c.bf16 %v593_v48, %v592_v40  ;;  %vm527_vm9 = vcmp.ge.f32.partialorder %v403_v45, 0.0  ;;  %v559_v52 = vmul.f32 0.01, %v403_v45  ;;  %vm543_vm10 = vcmp.ge.f32.partialorder %v467_v46, 0.0  ;;  %v1087_v53 = vpop.f32.mrb[4].mxu1  ;;  %v415_v54 = vpop.f32.mrb[5].mxu0 }
  0xef   : > { %v609_v55 = vsel %vm545_vm8, %v475_v42, %v577_v49  ;;  %v575_v56 = vmul.f32 0.01, %v467_v46  ;;  %v424_v57 = vadd.f32 %v1071_v50, %v1216_v22  ;;  %v488_v58 = vadd.f32 %v1087_v53, %v1216_v22  ;;  %v479_v59 = vpop.f32.mrb[5].mxu1  ;;  %v1072_v60 = vpop.f32.mrb[6].mxu0 }
  0xf0   : > { %1028 = vst [vmem:[%s1231_s27 + $0x8] sm:$0xff] %v956_v51   ;;  %v996_v61 = vpack.c.bf16 %v609_v55, %v608_v43  ;;  %v591_v62 = vsel %vm527_vm9, %v403_v45, %v559_v52  ;;  %v416_v63 = vadd.f32 %v1216_v22, %v415_v54  ;;  %v480_v0 = vadd.f32 %v1216_v22, %v479_v59  ;;  %v1088_v1 = vpop.f32.mrb[6].mxu1  ;;  %v418_v2 = vpop.f32.mrb[7].mxu0 }
  0xf1   : > { %v951_v3 = vpack.c.bf16 %v591_v62, %v590_v44  ;;  %v607_v4 = vsel %vm543_vm10, %v467_v46, %v575_v56  ;;  %vm532_vm11 = vcmp.ge.f32.partialorder %v424_v57, 0.0  ;;  %v564_v5 = vmul.f32 0.01, %v424_v57  ;;  %v482_v6 = vpop.f32.mrb[7].mxu1 }
  0xf2   : > { %1036 = vst [vmem:[%s1231_s27 + $0x48] sm:$0xff] %v996_v61   ;;  %v991_v7 = vpack.c.bf16 %v607_v4, %v606_v47  ;;  %vm548_vm12 = vcmp.ge.f32.partialorder %v488_v58, 0.0  ;;  %v580_v8 = vmul.f32 0.01, %v488_v58  ;;  %vm530_vm13 = vcmp.ge.f32.partialorder %v416_v63, 0.0 }
  0xf3   : > { %952 = vst [vmem:[%s1231_s27] sm:$0xff] %v951_v3   ;;  %v596_v9 = vsel %vm532_vm11, %v424_v57, %v564_v5  ;;  %v562_v10 = vmul.f32 0.01, %v416_v63  ;;  %v578_v11 = vmul.f32 0.01, %v480_v0  ;;  %v427_v12 = vadd.f32 %v1072_v60, %v1216_v22 }
  0xf4   : > { %1035 = vst [vmem:[%s1231_s27 + $0x40] sm:$0xff] %v991_v7   ;;  %v491_v13 = vadd.f32 %v1088_v1, %v1216_v22  ;;  %v419_v14 = vadd.f32 %v1216_v22, %v418_v2  ;;  %v612_v15 = vsel %vm548_vm12, %v488_v58, %v580_v8  ;;  %vm546_vm14 = vcmp.ge.f32.partialorder %v480_v0, 0.0 }
  0xf5   : > { %v594_v16 = vsel %vm530_vm13, %v416_v63, %v562_v10  ;;  %v483_v17 = vadd.f32 %v1216_v22, %v482_v6  ;;  %v1075_v18 = vpop.f32.mrb[8].mxu0  ;;  %vm533_vm15 = vcmp.ge.f32.partialorder %v427_v12, 0.0  ;;  %v565_v19 = vmul.f32 0.01, %v427_v12 }
  0xf6   : > { %vm549_vm0 = vcmp.ge.f32.partialorder %v491_v13, 0.0  ;;  %v581_v20 = vmul.f32 0.01, %v491_v13  ;;  %vm531_vm1 = vcmp.ge.f32.partialorder %v419_v14, 0.0  ;;  %v563_v21 = vmul.f32 0.01, %v419_v14 }
  0xf7   : > { %vm547_vm2 = vcmp.ge.f32.partialorder %v483_v17, 0.0  ;;  %v579_v23 = vmul.f32 0.01, %v483_v17  ;;  %v610_v24 = vsel %vm546_vm14, %v480_v0, %v578_v11  ;;  %v597_v25 = vsel %vm533_vm15, %v427_v12, %v565_v19  ;;  %v1091_v28 = vpop.f32.mrb[8].mxu1  ;;  %v431_v29 = vpop.f32.mrb[9].mxu0 }
  0xf8   : > { %v613_v26 = vsel %vm549_vm0, %v491_v13, %v581_v20  ;;  %v440_v27 = vadd.f32 %v1075_v18, %v1216_v22  ;;  %v966_v30 = vpack.c.bf16 %v597_v25, %v596_v9  ;;  %v595_v32 = vsel %vm531_vm1, %v419_v14, %v563_v21  ;;  %v495_v34 = vpop.f32.mrb[9].mxu1  ;;  %v1076_v35 = vpop.f32.mrb[10].mxu0 }
  0xf9   : > { %v1006_v31 = vpack.c.bf16 %v613_v26, %v612_v15  ;;  %v611_v33 = vsel %vm547_vm2, %v483_v17, %v579_v23  ;;  %v961_v36 = vpack.c.bf16 %v595_v32, %v594_v16  ;;  %v1092_v39 = vpop.f32.mrb[10].mxu1  ;;  %v434_v40 = vpop.f32.mrb[11].mxu0  ;;  %v504_v41 = vadd.f32 %v1091_v28, %v1216_v22 }
  0xfa   : > { %v1001_v37 = vpack.c.bf16 %v611_v33, %v610_v24  ;;  %vm536_vm3 = vcmp.ge.f32.partialorder %v440_v27, 0.0  ;;  %v568_v38 = vmul.f32 0.01, %v440_v27  ;;  %1030 = vst [vmem:[%s1231_s27 + $0x18] sm:$0xff] %v966_v30   ;;  %v432_v42 = vadd.f32 %v1216_v22, %v431_v29  ;;  %v498_v45 = vpop.f32.mrb[11].mxu1 }
  0xfb   : > { %1038 = vst [vmem:[%s1231_s27 + $0x58] sm:$0xff] %v1006_v31   ;;  %v496_v43 = vadd.f32 %v1216_v22, %v495_v34  ;;  %v443_v44 = vadd.f32 %v1076_v35, %v1216_v22  ;;  %1029 = vst [vmem:[%s1231_s27 + $0x10] sm:$0xff] %v961_v36   ;;  %v507_v47 = vadd.f32 %v1092_v39, %v1216_v22  ;;  %vm552_vm4 = vcmp.ge.f32.partialorder %v504_v41, 0.0 }
  0xfc   : > { %1037 = vst [vmem:[%s1231_s27 + $0x50] sm:$0xff] %v1001_v37   ;;  %v600_v46 = vsel %vm536_vm3, %v440_v27, %v568_v38  ;;  %v435_v48 = vadd.f32 %v1216_v22, %v434_v40  ;;  %v499_v49 = vadd.f32 %v1216_v22, %v498_v45  ;;  %v584_v50 = vmul.f32 0.01, %v504_v41 }
  0xfd   : > { %vm534_vm5 = vcmp.ge.f32.partialorder %v432_v42, 0.0  ;;  %v566_v51 = vmul.f32 0.01, %v432_v42  ;;  %vm550_vm6 = vcmp.ge.f32.partialorder %v496_v43, 0.0  ;;  %v582_v52 = vmul.f32 0.01, %v496_v43 }
  0xfe   : > { %vm537_vm7 = vcmp.ge.f32.partialorder %v443_v44, 0.0  ;;  %v569_v53 = vmul.f32 0.01, %v443_v44  ;;  %v616_v54 = vsel %vm552_vm4, %v504_v41, %v584_v50  ;;  %vm553_vm8 = vcmp.ge.f32.partialorder %v507_v47, 0.0  ;;  %v1079_v57 = vpop.f32.mrb[12].mxu0  ;;  %v1095_v58 = vpop.f32.mrb[12].mxu1 }
  0xff   : > { %v598_v55 = vsel %vm534_vm5, %v432_v42, %v566_v51  ;;  %v585_v56 = vmul.f32 0.01, %v507_v47  ;;  %v614_v59 = vsel %vm550_vm6, %v496_v43, %v582_v52  ;;  %vm535_vm9 = vcmp.ge.f32.partialorder %v435_v48, 0.0  ;;  %v447_v62 = vpop.f32.mrb[13].mxu0  ;;  %v511_v63 = vpop.f32.mrb[13].mxu1 }
 0x100   : > { %v601_v60 = vsel %vm537_vm7, %v443_v44, %v569_v53  ;;  %v567_v61 = vmul.f32 0.01, %v435_v48  ;;  %vm551_vm10 = vcmp.ge.f32.partialorder %v499_v49, 0.0  ;;  %v583_v2 = vmul.f32 0.01, %v499_v49  ;;  %v1080_v3 = vpop.f32.mrb[14].mxu0 }
 0x101   : > { %v976_v0 = vpack.c.bf16 %v601_v60, %v600_v46  ;;  %v617_v1 = vsel %vm553_vm8, %v507_v47, %v585_v56  ;;  %v1096_v4 = vpop.f32.mrb[14].mxu1  ;;  %v456_v7 = vadd.f32 %v1079_v57, %v1216_v22  ;;  %v520_v8 = vadd.f32 %v1095_v58, %v1216_v22  ;;  %v450_v9 = vpop.f32.mrb[15].mxu0 }
 0x102   : > { %v1016_v5 = vpack.c.bf16 %v617_v1, %v616_v54  ;;  %v599_v6 = vsel %vm535_vm9, %v435_v48, %v567_v61  ;;  %v514_v10 = vpop.f32.mrb[15].mxu1  ;;  %v615_v12 = vsel %vm551_vm10, %v499_v49, %v583_v2  ;;  %v448_v13 = vadd.f32 %v1216_v22, %v447_v62 }
 0x103   : > { %1032 = vst [vmem:[%s1231_s27 + $0x28] sm:$0xff] %v976_v0   ;;  %v971_v11 = vpack.c.bf16 %v599_v6, %v598_v55  ;;  %v512_v14 = vadd.f32 %v1216_v22, %v511_v63  ;;  %v1011_v15 = vpack.c.bf16 %v615_v12, %v614_v59  ;;  %vm540_vm11 = vcmp.ge.f32.partialorder %v456_v7, 0.0 }
 0x104   : > { %1040 = vst [vmem:[%s1231_s27 + $0x68] sm:$0xff] %v1016_v5   ;;  %v572_v16 = vmul.f32 0.01, %v456_v7  ;;  %vm556_vm12 = vcmp.ge.f32.partialorder %v520_v8, 0.0  ;;  %v588_v17 = vmul.f32 0.01, %v520_v8  ;;  %v459_v18 = vadd.f32 %v1080_v3, %v1216_v22 }
 0x105   : > { %1031 = vst [vmem:[%s1231_s27 + $0x20] sm:$0xff] %v971_v11   ;;  %1039 = vst [vmem:[%s1231_s27 + $0x60] sm:$0xff] %v1011_v15   ;;  %vm538_vm13 = vcmp.ge.f32.partialorder %v448_v13, 0.0  ;;  %v523_v19 = vadd.f32 %v1096_v4, %v1216_v22  ;;  %v570_v20 = vmul.f32 0.01, %v448_v13  ;;  %vm554_vm14 = vcmp.ge.f32.partialorder %v512_v14, 0.0 }
 0x106   : > { %v451_v21 = vadd.f32 %v1216_v22, %v450_v9  ;;  %v515_v23 = vadd.f32 %v1216_v22, %v514_v10  ;;  %v586_v24 = vmul.f32 0.01, %v512_v14  ;;  %vm541_vm15 = vcmp.ge.f32.partialorder %v459_v18, 0.0 }
 0x107   : > { %v573_v25 = vmul.f32 0.01, %v459_v18  ;;  %vm557_vm0 = vcmp.ge.f32.partialorder %v523_v19, 0.0  ;;  %v589_v26 = vmul.f32 0.01, %v523_v19  ;;  %v604_v28 = vsel %vm540_vm11, %v456_v7, %v572_v16 }
 0x108   : > { %vm539_vm1 = vcmp.ge.f32.partialorder %v451_v21, 0.0  ;;  %v571_v27 = vmul.f32 0.01, %v451_v21  ;;  %vm555_vm2 = vcmp.ge.f32.partialorder %v515_v23, 0.0  ;;  %v620_v29 = vsel %vm556_vm12, %v520_v8, %v588_v17 }
 0x109   : > { %v605_v30 = vsel %vm541_vm15, %v459_v18, %v573_v25  ;;  %v587_v31 = vmul.f32 0.01, %v515_v23  ;;  %v602_v22 = vsel %vm538_vm13, %v448_v13, %v570_v20  ;;  %v621_v33 = vsel %vm557_vm0, %v523_v19, %v589_v26 }
 0x10a   : > { %v986_v32 = vpack.c.bf16 %v605_v30, %v604_v28  ;;  %v603_v34 = vsel %vm539_vm1, %v451_v21, %v571_v27  ;;  %v618_v35 = vsel %vm554_vm14, %v512_v14, %v586_v24  ;;  %v1026_v36 = vpack.c.bf16 %v621_v33, %v620_v29 }
 0x10b   : > { %v981_v37 = vpack.c.bf16 %v603_v34, %v602_v22  ;;  %v619_v38 = vsel %vm555_vm2, %v515_v23, %v587_v31 }
 0x10c   : > { %1034 = vst [vmem:[%s1231_s27 + $0x38] sm:$0xff] %v986_v32   ;;  %v1021_v39 = vpack.c.bf16 %v619_v38, %v618_v35  ;;  %1042 = vst [vmem:[%s1231_s27 + $0x78] sm:$0xff] %v1026_v36  }
 0x10d   : > { %1033 = vst [vmem:[%s1231_s27 + $0x30] sm:$0xff] %v981_v37  }
 0x10e   : > { %1041 = vst [vmem:[%s1231_s27 + $0x70] sm:$0xff] %v1021_v39  }
 0x10f PF: > { %s13_s12 = sadd.s32 1, %s1134_s12  }
 0x110   : > { %p10_p4 = scmp.ge.s32.totalorder %s13_s12, 4  }
 0x112   :  { %12 = sbr.rel (!%p10_p4) target bundleno = 1 (0x1), region = 62 }

// kernel: vae_forward.10
= control target key start
LH: loop header
LB: loop body
LE: loop exit
PB: predicated region body
PF: predicated region fallthrough
CT: control target
= control target key end

     0   :  { %vm318_vm0 = vcmask 261120   ;;  %s1171_s1 = inlined_call_operand.vmem [shape: bf16[288,128], index: 1, kind: input, shape index: {}]   ;;  %s1172_s0 = inlined_call_operand.vmem [shape: bf16[128,288], index: 0, kind: input, shape index: {}]   ;;  %s1173_s2 = inlined_call_operand.vmem [shape: f32[1,128], index: 2, kind: input, shape index: {}]   ;;  %s1174_s3 = inlined_call_operand.vmem [shape: bf16[128,128], index: 3, kind: output, shape index: {}]  }
   0x1   :  { %v909_v0 = vld [vmem:[%s1171_s1 + $0x40] sm:$0xff]   ;;  %v911_v2 = vld [vmem:[%s1171_s1 + $0x48] sm:$0xff]   ;;  %v913_v4 = vld [vmem:[%s1171_s1 + $0x50] sm:$0xff]  }
   0x2   :  { %v910_v1 = vld [vmem:[%s1171_s1] sm:$0xff]   ;;  %799 = vmatprep.subr.bf16.mxu0 %v909_v0  ;;  %893 = vmatprep.subr.bf16.mxu1 %v909_v0  ;;  %v912_v3 = vld [vmem:[%s1171_s1 + $0x8] sm:$0xff]   ;;  %v914_v5 = vld [vmem:[%s1171_s1 + $0x10] sm:$0xff]  }
   0x3   :  { %800 = vmatpush3.bf16.msra.mxu0 %v910_v1  ;;  %901 = vmatpush3.bf16.msra.mxu1 %v910_v1  ;;  %v915_v6 = vld [vmem:[%s1171_s1 + $0x58] sm:$0xff]   ;;  %v917_v8 = vld [vmem:[%s1171_s1 + $0x60] sm:$0xff]   ;;  %v919_v10 = vld [vmem:[%s1171_s1 + $0x68] sm:$0xff]  }
   0x4   :  { %801 = vmatprep.subr.bf16.mxu0 %v911_v2  ;;  %894 = vmatprep.subr.bf16.mxu1 %v911_v2  ;;  %v916_v7 = vld [vmem:[%s1171_s1 + $0x18] sm:$0xff]   ;;  %v918_v9 = vld [vmem:[%s1171_s1 + $0x20] sm:$0xff]   ;;  %v920_v13 = vld [vmem:[%s1171_s1 + $0x28] sm:$0xff]  }
   0x5   :  { %v927_v11 = vld [vmem:[%s1172_s0 + $0x4] ss:$12 sps:$4 sm:$0xff]   ;;  %v930_v12 = vld [vmem:[%s1172_s0 + $0x94] ss:$12 sps:$4 sm:$0xff]   ;;  %v923_v16 = vld [vmem:[%s1171_s1 + $0x78] sm:$0xff]  }
   0x6   :  { %v921_v14 = vld [vmem:[%s1171_s1 + $0x70] sm:$0xff]   ;;  %375 = vmatprep.mubr.bf16.mxu0 %v927_v11  ;;  %423 = vmatprep.mubr.bf16.mxu1 %v930_v12  ;;  %v924_v17 = vld [vmem:[%s1171_s1 + $0x38] sm:$0xff]   ;;  %v925_v18 = vld [vmem:[%s1172_s0] ss:$12 sps:$4 sm:$0xff]  }
   0x7   :  { %802 = vmatpush3.bf16.msra.mxu0 %v912_v3  ;;  %902 = vmatpush3.bf16.msra.mxu1 %v912_v3  ;;  %v922_v15 = vld [vmem:[%s1171_s1 + $0x30] sm:$0xff]   ;;  %v931_v19 = vld [vmem:[%s1171_s1 + $0x80] sm:$0xff]   ;;  %v932_v21 = vld [vmem:[%s1172_s0 + $0x1c] ss:$12 sps:$4 sm:$0xff]  }
   0x8   :  { %803 = vmatprep.subr.bf16.mxu0 %v913_v4  ;;  %895 = vmatprep.subr.bf16.mxu1 %v913_v4  ;;  %v928_v20 = vld [vmem:[%s1172_s0 + $0x90] ss:$12 sps:$4 sm:$0xff]   ;;  %v934_v22 = vld [vmem:[%s1172_s0 + $0xac] ss:$12 sps:$4 sm:$0xff]   ;;  %v937_v25 = vld [vmem:[%s1172_s0 + $0xa8] ss:$12 sps:$4 sm:$0xff]  }
   0x9   :  { %v938_v23 = vld [vmem:[%s1171_s1 + $0x88] sm:$0xff]   ;;  %v936_v24 = vld [vmem:[%s1172_s0 + $0x18] ss:$12 sps:$4 sm:$0xff]   ;;  %v939_v26 = vld [vmem:[%s1172_s0 + $0x34] ss:$12 sps:$4 sm:$0xff]  }
   0xa   :  { %v941_v27 = vld [vmem:[%s1172_s0 + $0x8] ss:$12 sps:$4 sm:$0xff]   ;;  %v942_v28 = vld [vmem:[%s1172_s0 + $0x30] ss:$12 sps:$4 sm:$0xff]   ;;  %v943_v29 = vld [vmem:[%s1172_s0 + $0x20] ss:$12 sps:$4 sm:$0xff]  }
   0xb   :  { %804 = vmatpush3.bf16.msra.mxu0 %v914_v5  ;;  %903 = vmatpush3.bf16.msra.mxu1 %v914_v5  ;;  %v944_v30 = vld [vmem:[%s1172_s0 + $0x4c] ss:$12 sps:$4 sm:$0xff]   ;;  %v947_v32 = vld [vmem:[%s1172_s0 + $0x48] ss:$12 sps:$4 sm:$0xff]   ;;  %v948_v33 = vld [vmem:[%s1172_s0 + $0x50] ss:$12 sps:$4 sm:$0xff]  }
   0xc   :  { %805 = vmatprep.subr.bf16.mxu0 %v915_v6  ;;  %896 = vmatprep.subr.bf16.mxu1 %v915_v6  ;;  %v946_v31 = vld [vmem:[%s1172_s0 + $0x38] ss:$12 sps:$4 sm:$0xff]   ;;  %v951_v35 = vld [vmem:[%s1172_s0 + $0x68] ss:$12 sps:$4 sm:$0xff]   ;;  %v952_v36 = vld [vmem:[%s1172_s0 + $0x60] ss:$12 sps:$4 sm:$0xff]  }
   0xd   :  { %v949_v34 = vld [vmem:[%s1172_s0 + $0x64] ss:$12 sps:$4 sm:$0xff]   ;;  %v953_v37 = vld [vmem:[%s1172_s0 + $0x80] ss:$12 sps:$4 sm:$0xff]   ;;  %v954_v38 = vld [vmem:[%s1172_s0 + $0x7c] ss:$12 sps:$4 sm:$0xff]  }
   0xe   :  { %v956_v39 = vld [vmem:[%s1172_s0 + $0x98] ss:$12 sps:$4 sm:$0xff]   ;;  %v958_v41 = vld [vmem:[%s1172_s0 + $0xb0] ss:$12 sps:$4 sm:$0xff]   ;;  %v1124_v2 = vld [vmem:[%s1173_s2] ss:$0 sm:$0xff] }
   0xf   :  { %806 = vmatpush3.bf16.msra.mxu0 %v916_v7  ;;  %904 = vmatpush3.bf16.msra.mxu1 %v916_v7  ;;  %v957_v40 = vld [vmem:[%s1172_s0 + $0x78] ss:$12 sps:$4 sm:$0xff]  }
  0x10   :  { %807 = vmatprep.subr.bf16.mxu0 %v917_v8  ;;  %897 = vmatprep.subr.bf16.mxu1 %v917_v8 }
  0x13   :  { %808 = vmatpush3.bf16.msra.mxu0 %v918_v9  ;;  %905 = vmatpush3.bf16.msra.mxu1 %v918_v9 }
  0x14   :  { %809 = vmatprep.subr.bf16.mxu0 %v919_v10  ;;  %898 = vmatprep.subr.bf16.mxu1 %v919_v10 }
  0x17   :  { %810 = vmatpush3.bf16.msra.mxu0 %v920_v13  ;;  %906 = vmatpush3.bf16.msra.mxu1 %v920_v13 }
  0x18   :  { %811 = vmatprep.subr.bf16.mxu0 %v921_v14  ;;  %899 = vmatprep.subr.bf16.mxu1 %v921_v14 }
  0x1b   :  { %812 = vmatpush3.bf16.msra.mxu0 %v922_v15  ;;  %907 = vmatpush3.bf16.msra.mxu1 %v922_v15 }
  0x1c   :  { %813 = vmatprep.subr.bf16.mxu0 %v923_v16  ;;  %900 = vmatprep.subr.bf16.mxu1 %v923_v16 }
  0x1f   :  { %814 = vmatpush3.bf16.msra.mxu0 %v924_v17  ;;  %908 = vmatpush3.bf16.msra.mxu1 %v924_v17 }
  0x20   :  { %873 = vmatprep.subr.bf16.mxu1 %v931_v19 }
  0x22   :  { %376 = vmatmul.mubr.bf16.vlgmr.msra.gmra.mrb[0].mxu0 %v925_v18  ;;  %424 = vmatmul.mubr.bf16.vlgmr.msra.gmra.mrb[0].mxu1 %v928_v20 }
  0x23   :  { %874 = vmatpush3.bf16.msra.mxu1 %v931_v19  ;;  %383 = vmatprep.mubr.bf16.mxu0 %v932_v21 }
  0x24   :  { %431 = vmatprep.mubr.bf16.mxu1 %v934_v22  ;;  %875 = vmatprep.subr.bf16.mxu1 %v938_v23 }
  0x27   :  { %876 = vmatpush3.bf16.msra.mxu1 %v938_v23 }
  0x2a   :  { %384 = vmatmul.mubr.bf16.gmra.mrb[4].mxu0 %v936_v24  ;;  %432 = vmatmul.mubr.bf16.gmra.mrb[4].mxu1 %v937_v25 }
  0x2b   :  { %391 = vmatprep.mubr.bf16.mxu0 %v939_v26  ;;  %877 = vmatprep.mubr.msk.bf16.mxu1 %vm318_vm0, %v941_v27 }
  0x32   :  { %392 = vmatmul.mubr.bf16.gmra.mrb[8].mxu0 %v942_v28  ;;  %878 = vmatmul.mubr.msk.bf16.vlgmr.msra.gmra.mrb[8].mxu1 %vm318_vm0, %v943_v29 }
  0x33   :  { %399 = vmatprep.mubr.bf16.mxu0 %v944_v30  ;;  %881 = vmatprep.mubr.msk.bf16.mxu1 %vm318_vm0, %v946_v31 }
  0x3a   :  { %400 = vmatmul.mubr.bf16.gmra.mrb[12].mxu0 %v947_v32  ;;  %882 = vmatmul.mubr.msk.bf16.gmra.mrb[12].mxu1 %vm318_vm0, %v948_v33 }
  0x3b   :  { %407 = vmatprep.mubr.bf16.mxu0 %v949_v34  ;;  %885 = vmatprep.mubr.msk.bf16.mxu1 %vm318_vm0, %v951_v35 }
  0x42   :  { %408 = vmatmul.mubr.bf16.gmra.mrb[16].mxu0 %v952_v36  ;;  %886 = vmatmul.mubr.msk.bf16.gmra.mrb[16].mxu1 %vm318_vm0, %v953_v37 }
  0x43   :  { %415 = vmatprep.mubr.bf16.mxu0 %v954_v38  ;;  %889 = vmatprep.mubr.msk.bf16.mxu1 %vm318_vm0, %v956_v39 }
  0x4a   :  { %416 = vmatmul.mubr.bf16.gmra.mrb[20].mxu0 %v957_v40  ;;  %890 = vmatmul.mubr.msk.bf16.gmra.mrb[20].mxu1 %vm318_vm0, %v958_v41 }
  0xf5   :  { %v815_v42 = vpop.f32.mrb[0].mxu0  ;;  %v851_v43 = vpop.f32.mrb[0].mxu1 }
  0xf6   :  { %v816_v44 = vpop.f32.mrb[1].mxu0  ;;  %v852_v45 = vpop.f32.mrb[1].mxu1 }
  0xf7   :  { %v817_v46 = vadd.f32 %v816_v44, %v815_v42  ;;  %v818_v47 = vpop.f32.mrb[2].mxu0  ;;  %v1113_v48 = vadd.f32 %v852_v45, %v851_v43  ;;  %v854_v49 = vpop.f32.mrb[2].mxu1 }
  0xf8   :  { %v819_v50 = vpop.f32.mrb[3].mxu0  ;;  %v855_v51 = vpop.f32.mrb[3].mxu1 }
  0xf9   :  { %v820_v52 = vadd.f32 %v819_v50, %v818_v47  ;;  %v1115_v53 = vadd.f32 %v855_v51, %v854_v49  ;;  %v378_v6 = vadd.f32 %v817_v46, %v1124_v2 }
  0xfb   :  { %v381_v15 = vadd.f32 %v820_v52, %v1124_v2 }
  0xfd   :  { %v821_v54 = vpop.f32.mrb[4].mxu0  ;;  %v857_v55 = vpop.f32.mrb[4].mxu1 }
  0xfe   :  { %v822_v56 = vpop.f32.mrb[5].mxu0  ;;  %v858_v57 = vpop.f32.mrb[5].mxu1 }
  0xff   :  { %v823_v58 = vadd.f32 %v822_v56, %v821_v54  ;;  %v824_v59 = vpop.f32.mrb[6].mxu0  ;;  %v1117_v60 = vadd.f32 %v858_v57, %v857_v55  ;;  %v860_v61 = vpop.f32.mrb[6].mxu1 }
 0x100   :  { %v825_v62 = vpop.f32.mrb[7].mxu0  ;;  %v861_v63 = vpop.f32.mrb[7].mxu1 }
 0x101   :  { %v826_v0 = vadd.f32 %v825_v62, %v824_v59  ;;  %v1119_v1 = vadd.f32 %v861_v63, %v860_v61  ;;  %v386_v3 = vadd.f32 %v823_v58, %v1124_v2 }
 0x103   :  { %v389_v10 = vadd.f32 %v826_v0, %v1124_v2 }
 0x105   :  { %v827_v4 = vpop.f32.mrb[8].mxu0  ;;  %v879_v5 = vpop.f32.mrb[8].mxu1 }
 0x106   :  { %v483_v7 = vadd.f32 %v879_v5, %v386_v3  ;;  %v828_v8 = vpop.f32.mrb[9].mxu0  ;;  %v474_v9 = vpop.f32.mrb[9].mxu1 }
 0x107   :  { %v829_v11 = vadd.f32 %v828_v8, %v827_v4  ;;  %v475_v12 = vadd.f32 %v474_v9, %v378_v6  ;;  %v830_v13 = vpop.f32.mrb[10].mxu0  ;;  %v880_v14 = vpop.f32.mrb[10].mxu1 }
 0x108   :  { %v555_v16 = vmul.f32 0.01, %v483_v7  ;;  %v486_v17 = vadd.f32 %v880_v14, %v389_v10  ;;  %v831_v18 = vpop.f32.mrb[11].mxu0  ;;  %v477_v19 = vpop.f32.mrb[11].mxu1  ;;  %vm539_vm1 = vcmp.ge.f32.partialorder %v483_v7, 0.0 }
 0x109   :  { %v553_v20 = vmul.f32 0.01, %v475_v12  ;;  %v832_v21 = vadd.f32 %v831_v18, %v830_v13  ;;  %v478_v22 = vadd.f32 %v477_v19, %v381_v15  ;;  %vm537_vm2 = vcmp.ge.f32.partialorder %v475_v12, 0.0 }
 0x10a   :  { %vm540_vm3 = vcmp.ge.f32.partialorder %v486_v17, 0.0  ;;  %v556_v23 = vmul.f32 0.01, %v486_v17  ;;  %v571_v25 = vsel %vm539_vm1, %v483_v7, %v555_v16  ;;  %v394_v32 = vadd.f32 %v829_v11, %v1124_v2 }
 0x10b   :  { %vm538_vm4 = vcmp.ge.f32.partialorder %v478_v22, 0.0  ;;  %v554_v24 = vmul.f32 0.01, %v478_v22  ;;  %v569_v27 = vsel %vm537_vm2, %v475_v12, %v553_v20  ;;  %v397_v41 = vadd.f32 %v832_v21, %v1124_v2 }
 0x10c   :  { %v572_v26 = vsel %vm540_vm3, %v486_v17, %v556_v23  ;;  %v434_v13 = vadd.f32 %v1117_v60, %v1124_v2  ;;  %v426_v17 = vadd.f32 %v1113_v48, %v1124_v2  ;;  %v429_v48 = vadd.f32 %v1115_v53, %v1124_v2 }
 0x10d   :  { %v760_v28 = vpack.c.bf16 %v572_v26, %v571_v25  ;;  %v570_v29 = vsel %vm538_vm4, %v478_v22, %v554_v24  ;;  %v833_v30 = vpop.f32.mrb[12].mxu0  ;;  %v883_v31 = vpop.f32.mrb[12].mxu1  ;;  %v437_v22 = vadd.f32 %v1119_v1, %v1124_v2 }
 0x10e   :  { %v755_v33 = vpack.c.bf16 %v570_v29, %v569_v27  ;;  %v834_v34 = vpop.f32.mrb[13].mxu0  ;;  %v490_v35 = vpop.f32.mrb[13].mxu1 }
 0x10f   :  { %792 = vst [vmem:[%s1174_s3 + $0x8] sm:$0xff] %v760_v28   ;;  %v835_v36 = vadd.f32 %v834_v34, %v833_v30  ;;  %v491_v37 = vadd.f32 %v490_v35, %v394_v32  ;;  %v836_v38 = vpop.f32.mrb[14].mxu0  ;;  %v884_v39 = vpop.f32.mrb[14].mxu1 }
 0x110   :  { %756 = vst [vmem:[%s1174_s3] sm:$0xff] %v755_v33   ;;  %v837_v40 = vpop.f32.mrb[15].mxu0  ;;  %v493_v42 = vpop.f32.mrb[15].mxu1 }
 0x111   :  { %v402_v43 = vadd.f32 %v835_v36, %v1124_v2  ;;  %v838_v44 = vadd.f32 %v837_v40, %v836_v38  ;;  %v557_v45 = vmul.f32 0.01, %v491_v37  ;;  %v494_v46 = vadd.f32 %v493_v42, %v397_v41 }
 0x112   :  { %vm541_vm5 = vcmp.ge.f32.partialorder %v491_v37, 0.0 }
 0x113   :  { %v499_v47 = vadd.f32 %v883_v31, %v402_v43  ;;  %v405_v49 = vadd.f32 %v838_v44, %v1124_v2  ;;  %vm542_vm6 = vcmp.ge.f32.partialorder %v494_v46, 0.0  ;;  %v558_v50 = vmul.f32 0.01, %v494_v46 }
 0x114   :  { %v573_v56 = vsel %vm541_vm5, %v491_v37, %v557_v45 }
 0x115   :  { %v559_v51 = vmul.f32 0.01, %v499_v47  ;;  %v502_v52 = vadd.f32 %v884_v39, %v405_v49  ;;  %v839_v54 = vpop.f32.mrb[16].mxu0  ;;  %v887_v55 = vpop.f32.mrb[16].mxu1  ;;  %vm543_vm7 = vcmp.ge.f32.partialorder %v499_v47, 0.0  ;;  %v574_v57 = vsel %vm542_vm6, %v494_v46, %v558_v50 }
 0x116   :  { %v840_v58 = vpop.f32.mrb[17].mxu0  ;;  %v506_v59 = vpop.f32.mrb[17].mxu1  ;;  %v765_v62 = vpack.c.bf16 %v574_v57, %v573_v56 }
 0x117   :  { %vm544_vm8 = vcmp.ge.f32.partialorder %v502_v52, 0.0  ;;  %v560_v61 = vmul.f32 0.01, %v502_v52  ;;  %v842_v63 = vpop.f32.mrb[18].mxu0  ;;  %v888_v0 = vpop.f32.mrb[18].mxu1  ;;  %v841_v3 = vadd.f32 %v840_v58, %v839_v54  ;;  %v575_v6 = vsel %vm543_vm7, %v499_v47, %v559_v51 }
 0x118   :  { %v843_v4 = vpop.f32.mrb[19].mxu0  ;;  %v509_v5 = vpop.f32.mrb[19].mxu1  ;;  %793 = vst [vmem:[%s1174_s3 + $0x10] sm:$0xff] %v765_v62  }
 0x119   :  { %v576_v7 = vsel %vm544_vm8, %v502_v52, %v560_v61  ;;  %v844_v8 = vadd.f32 %v843_v4, %v842_v63  ;;  %v410_v10 = vadd.f32 %v841_v3, %v1124_v2 }
 0x11a   :  { %v770_v9 = vpack.c.bf16 %v576_v7, %v575_v6 }
 0x11b   :  { %v413_v11 = vadd.f32 %v844_v8, %v1124_v2  ;;  %v507_v12 = vadd.f32 %v506_v59, %v410_v10 }
 0x11c   :  { %794 = vst [vmem:[%s1174_s3 + $0x18] sm:$0xff] %v770_v9  }
 0x11d   :  { %v510_v14 = vadd.f32 %v509_v5, %v413_v11  ;;  %v845_v15 = vpop.f32.mrb[20].mxu0  ;;  %v891_v16 = vpop.f32.mrb[20].mxu1  ;;  %vm545_vm9 = vcmp.ge.f32.partialorder %v507_v12, 0.0  ;;  %v561_v18 = vmul.f32 0.01, %v507_v12 }
 0x11e   :  { %v531_v19 = vadd.f32 %v891_v16, %v434_v13  ;;  %v846_v20 = vpop.f32.mrb[21].mxu0  ;;  %v522_v21 = vpop.f32.mrb[21].mxu1 }
 0x11f   :  { %vm546_vm10 = vcmp.ge.f32.partialorder %v510_v14, 0.0  ;;  %v562_v23 = vmul.f32 0.01, %v510_v14  ;;  %v847_v24 = vadd.f32 %v846_v20, %v845_v15  ;;  %v523_v25 = vadd.f32 %v522_v21, %v426_v17  ;;  %v848_v26 = vpop.f32.mrb[22].mxu0  ;;  %v892_v60 = vpop.f32.mrb[22].mxu1 }
 0x120   :  { %v567_v27 = vmul.f32 0.01, %v531_v19  ;;  %v534_v28 = vadd.f32 %v892_v60, %v437_v22  ;;  %v849_v29 = vpop.f32.mrb[23].mxu0  ;;  %v525_v30 = vpop.f32.mrb[23].mxu1  ;;  %v577_v31 = vsel %vm545_vm9, %v507_v12, %v561_v18  ;;  %vm551_vm11 = vcmp.ge.f32.partialorder %v531_v19, 0.0 }
 0x121   :  { %v578_v32 = vsel %vm546_vm10, %v510_v14, %v562_v23  ;;  %v418_v33 = vadd.f32 %v847_v24, %v1124_v2  ;;  %v850_v36 = vadd.f32 %v849_v29, %v848_v26  ;;  %v526_v37 = vadd.f32 %v525_v30, %v429_v48 }
 0x122   :  { %v775_v1 = vpack.c.bf16 %v578_v32, %v577_v31  ;;  %vm552_vm12 = vcmp.ge.f32.partialorder %v534_v28, 0.0  ;;  %v568_v34 = vmul.f32 0.01, %v534_v28  ;;  %v583_v38 = vsel %vm551_vm11, %v531_v19, %v567_v27 }
 0x123   :  { %v515_v35 = vadd.f32 %v887_v55, %v418_v33  ;;  %v565_v39 = vmul.f32 0.01, %v523_v25  ;;  %vm549_vm13 = vcmp.ge.f32.partialorder %v523_v25, 0.0  ;;  %v421_v41 = vadd.f32 %v850_v36, %v1124_v2 }
 0x124   :  { %795 = vst [vmem:[%s1174_s3 + $0x20] sm:$0xff] %v775_v1   ;;  %v584_v53 = vsel %vm552_vm12, %v534_v28, %v568_v34  ;;  %vm550_vm14 = vcmp.ge.f32.partialorder %v526_v37, 0.0  ;;  %v566_v42 = vmul.f32 0.01, %v526_v37 }
 0x125   :  { %v790_v40 = vpack.c.bf16 %v584_v53, %v583_v38  ;;  %v563_v43 = vmul.f32 0.01, %v515_v35  ;;  %v518_v44 = vadd.f32 %v888_v0, %v421_v41  ;;  %vm547_vm15 = vcmp.ge.f32.partialorder %v515_v35, 0.0 }
 0x126   :  { %v581_v45 = vsel %vm549_vm13, %v523_v25, %v565_v39  ;;  %v582_v46 = vsel %vm550_vm14, %v526_v37, %v566_v42 }
 0x127   :  { %798 = vst [vmem:[%s1174_s3 + $0x38] sm:$0xff] %v790_v40   ;;  %vm548_vm0 = vcmp.ge.f32.partialorder %v518_v44, 0.0  ;;  %v564_v47 = vmul.f32 0.01, %v518_v44  ;;  %v785_v49 = vpack.c.bf16 %v582_v46, %v581_v45  ;;  %v579_v50 = vsel %vm547_vm15, %v515_v35, %v563_v43 }
 0x129   :  { %v580_v51 = vsel %vm548_vm0, %v518_v44, %v564_v47  ;;  %797 = vst [vmem:[%s1174_s3 + $0x30] sm:$0xff] %v785_v49  }
 0x12a   :  { %v780_v2 = vpack.c.bf16 %v580_v51, %v579_v50 }
 0x12c   :  { %796 = vst [vmem:[%s1174_s3 + $0x28] sm:$0xff] %v780_v2  }

// kernel: vae_forward.11
= control target key start
LH: loop header
LB: loop body
LE: loop exit
PB: predicated region body
PF: predicated region fallthrough
CT: control target
= control target key end

     0   :  { %vm372_vm0 = vcmask 523264   ;;  %s921_s1 = inlined_call_operand.vmem [shape: bf16[576,128], index: 1, kind: input, shape index: {}]   ;;  %s922_s0 = inlined_call_operand.vmem [shape: bf16[32,576], index: 0, kind: input, shape index: {}]   ;;  %s923_s2 = inlined_call_operand.vmem [shape: f32[1,128], index: 2, kind: input, shape index: {}]   ;;  %s924_s3 = inlined_call_operand.vmem [shape: bf16[32,128], index: 3, kind: output, shape index: {}]  }
   0x1   :  { %v704_v0 = vld [vmem:[%s921_s1 + $0x40] sm:$0xff]   ;;  %v708_v4 = vld [vmem:[%s921_s1 + $0x48] sm:$0xff]   ;;  %v712_v8 = vld [vmem:[%s921_s1 + $0x50] sm:$0xff]  }
   0x2   :  { %v705_v1 = vld [vmem:[%s921_s1] sm:$0xff]   ;;  %630 = vmatprep.subr.bf16.mxu0 %v704_v0  ;;  %v709_v5 = vld [vmem:[%s921_s1 + $0x8] sm:$0xff]   ;;  %v713_v9 = vld [vmem:[%s921_s1 + $0x10] sm:$0xff]  }
   0x3   :  { %v706_v2 = vld [vmem:[%s921_s1 + $0xc0] sm:$0xff]   ;;  %631 = vmatpush3.bf16.msra.mxu0 %v705_v1  ;;  %v710_v6 = vld [vmem:[%s921_s1 + $0xc8] sm:$0xff]   ;;  %v714_v10 = vld [vmem:[%s921_s1 + $0xd0] sm:$0xff]  }
   0x4   :  { %v707_v3 = vld [vmem:[%s921_s1 + $0x80] sm:$0xff]   ;;  %658 = vmatprep.subr.bf16.mxu1 %v706_v2  ;;  %632 = vmatprep.subr.bf16.mxu0 %v708_v4  ;;  %v711_v7 = vld [vmem:[%s921_s1 + $0x88] sm:$0xff]   ;;  %v715_v11 = vld [vmem:[%s921_s1 + $0x90] sm:$0xff]  }
   0x5   :  { %659 = vmatpush3.bf16.msra.mxu1 %v707_v3  ;;  %v716_v12 = vld [vmem:[%s921_s1 + $0x58] sm:$0xff]   ;;  %v720_v16 = vld [vmem:[%s921_s1 + $0x60] sm:$0xff]   ;;  %v724_v20 = vld [vmem:[%s921_s1 + $0x68] sm:$0xff]  }
   0x6   :  { %660 = vmatprep.subr.bf16.mxu1 %v710_v6  ;;  %v717_v13 = vld [vmem:[%s921_s1 + $0x18] sm:$0xff]   ;;  %v721_v17 = vld [vmem:[%s921_s1 + $0x20] sm:$0xff]   ;;  %v725_v21 = vld [vmem:[%s921_s1 + $0x28] sm:$0xff]  }
   0x7   :  { %633 = vmatpush3.bf16.msra.mxu0 %v709_v5  ;;  %v718_v14 = vld [vmem:[%s921_s1 + $0xd8] sm:$0xff]   ;;  %v722_v18 = vld [vmem:[%s921_s1 + $0xe0] sm:$0xff]   ;;  %v726_v22 = vld [vmem:[%s921_s1 + $0xe8] sm:$0xff]  }
   0x8   :  { %634 = vmatprep.subr.bf16.mxu0 %v712_v8  ;;  %v719_v15 = vld [vmem:[%s921_s1 + $0x98] sm:$0xff]   ;;  %v723_v19 = vld [vmem:[%s921_s1 + $0xa0] sm:$0xff]   ;;  %v727_v23 = vld [vmem:[%s921_s1 + $0xa8] sm:$0xff]  }
   0x9   :  { %661 = vmatpush3.bf16.msra.mxu1 %v711_v7  ;;  %v728_v24 = vld [vmem:[%s921_s1 + $0x70] sm:$0xff]   ;;  %v732_v28 = vld [vmem:[%s921_s1 + $0x78] sm:$0xff]   ;;  %v739_v34 = vld [vmem:[%s921_s1 + $0x100] sm:$0xff]  }
   0xa   :  { %662 = vmatprep.subr.bf16.mxu1 %v714_v10  ;;  %v729_v25 = vld [vmem:[%s921_s1 + $0x30] sm:$0xff]   ;;  %v733_v29 = vld [vmem:[%s921_s1 + $0x38] sm:$0xff]   ;;  %v742_v36 = vld [vmem:[%s922_s0 + $0xc] ss:$20 sps:$4 sm:$0xff]  }
   0xb   :  { %635 = vmatpush3.bf16.msra.mxu0 %v713_v9  ;;  %v730_v26 = vld [vmem:[%s921_s1 + $0xf0] sm:$0xff]   ;;  %v734_v30 = vld [vmem:[%s921_s1 + $0xf8] sm:$0xff]   ;;  %v743_v37 = vld [vmem:[%s921_s1 + $0x108] sm:$0xff]   ;;  %460 = vmatprep.mubr.bf16.mxu1 %v742_v36 }
   0xc   :  { %636 = vmatprep.subr.bf16.mxu0 %v716_v12  ;;  %v731_v27 = vld [vmem:[%s921_s1 + $0xb0] sm:$0xff]   ;;  %v737_v32 = vld [vmem:[%s922_s0 + $0x4] ss:$20 sps:$4 sm:$0xff]   ;;  %v740_v35 = vld [vmem:[%s922_s0 + $0x8] ss:$20 sps:$4 sm:$0xff]  }
   0xd   :  { %663 = vmatpush3.bf16.msra.mxu1 %v715_v11  ;;  %v735_v31 = vld [vmem:[%s922_s0] ss:$20 sps:$4 sm:$0xff]   ;;  %v738_v33 = vld [vmem:[%s921_s1 + $0xb8] sm:$0xff]   ;;  %411 = vmatprep.mubr.bf16.mxu0 %v737_v32  ;;  %v750_v42 = vld [vmem:[%s922_s0 + $0x30] ss:$20 sps:$4 sm:$0xff]  }
   0xe   :  { %664 = vmatprep.subr.bf16.mxu1 %v718_v14  ;;  %v744_v38 = vld [vmem:[%s922_s0 + $0x2c] ss:$20 sps:$4 sm:$0xff]   ;;  %v746_v39 = vld [vmem:[%s922_s0 + $0x28] ss:$20 sps:$4 sm:$0xff]   ;;  %v747_v40 = vld [vmem:[%s921_s1 + $0x110] sm:$0xff]  }
   0xf   :  { %637 = vmatpush3.bf16.msra.mxu0 %v717_v13  ;;  %v748_v41 = vld [vmem:[%s922_s0 + $0x34] ss:$20 sps:$4 sm:$0xff]   ;;  %v751_v43 = vld [vmem:[%s921_s1 + $0x118] sm:$0xff]   ;;  %v752_v44 = vld [vmem:[%s922_s0 + $0x10] ss:$20 sps:$4 sm:$0xff]  }
  0x10   :  { %638 = vmatprep.subr.bf16.mxu0 %v720_v16  ;;  %v753_v45 = vld [vmem:[%s922_s0 + $0x38] ss:$20 sps:$4 sm:$0xff]   ;;  %v562_v47 = vld [vmem:[%s923_s2] ss:$0 sm:$0xff] }
  0x11   :  { %665 = vmatpush3.bf16.msra.mxu1 %v719_v15 }
  0x12   :  { %666 = vmatprep.subr.bf16.mxu1 %v722_v18 }
  0x13   :  { %639 = vmatpush3.bf16.msra.mxu0 %v721_v17 }
  0x14   :  { %640 = vmatprep.subr.bf16.mxu0 %v724_v20 }
  0x15   :  { %667 = vmatpush3.bf16.msra.mxu1 %v723_v19 }
  0x16   :  { %668 = vmatprep.subr.bf16.mxu1 %v726_v22 }
  0x17   :  { %641 = vmatpush3.bf16.msra.mxu0 %v725_v21 }
  0x18   :  { %642 = vmatprep.subr.bf16.mxu0 %v728_v24 }
  0x19   :  { %669 = vmatpush3.bf16.msra.mxu1 %v727_v23 }
  0x1a   :  { %670 = vmatprep.subr.bf16.mxu1 %v730_v26 }
  0x1b   :  { %643 = vmatpush3.bf16.msra.mxu0 %v729_v25 }
  0x1c   :  { %644 = vmatprep.subr.bf16.mxu0 %v732_v28 }
  0x1d   :  { %671 = vmatpush3.bf16.msra.mxu1 %v731_v27 }
  0x1e   :  { %672 = vmatprep.subr.bf16.mxu1 %v734_v30 }
  0x1f   :  { %645 = vmatpush3.bf16.msra.mxu0 %v733_v29 }
  0x20   :  { %692 = vmatprep.subr.bf16.mxu0 %v739_v34 }
  0x21   :  { %673 = vmatpush3.bf16.msra.mxu1 %v738_v33 }
  0x22   :  { %412 = vmatmul.mubr.bf16.vlgmr.msra.gmra.mrb[0].mxu0 %v735_v31 }
  0x23   :  { %693 = vmatpush3.bf16.msra.mxu0 %v739_v34  ;;  %419 = vmatprep.mubr.bf16.mxu0 %v744_v38 }
  0x24   :  { %461 = vmatmul.mubr.bf16.vlgmr.msra.gmra.mrb[0].mxu1 %v740_v35  ;;  %694 = vmatprep.subr.bf16.mxu0 %v743_v37 }
  0x25   :  { %468 = vmatprep.mubr.bf16.mxu1 %v748_v41 }
  0x27   :  { %695 = vmatpush3.bf16.msra.mxu0 %v743_v37 }
  0x28   :  { %696 = vmatprep.subr.bf16.mxu0 %v747_v40 }
  0x2a   :  { %420 = vmatmul.mubr.bf16.gmra.mrb[4].mxu0 %v746_v39 }
  0x2b   :  { %700 = vmatprep.mubr.msk.bf16.mxu0 %vm372_vm0, %v752_v44  ;;  %697 = vmatpush3.bf16.msra.mxu0 %v747_v40 }
  0x2c   :  { %469 = vmatmul.mubr.bf16.gmra.mrb[4].mxu1 %v750_v42  ;;  %698 = vmatprep.subr.bf16.mxu0 %v751_v43 }
  0x2f   :  { %699 = vmatpush3.bf16.msra.mxu0 %v751_v43 }
  0x32   :  { %701 = vmatmul.mubr.msk.bf16.vlgmr.msra.gmra.mrb[8].mxu0 %vm372_vm0, %v753_v45 }
  0xf5   :  { %v646_v46 = vpop.f32.mrb[0].mxu0 }
  0xf6   :  { %v647_v48 = vpop.f32.mrb[1].mxu0 }
  0xf7   :  { %v648_v49 = vadd.f32 %v647_v48, %v646_v46  ;;  %v649_v50 = vpop.f32.mrb[2].mxu0  ;;  %v674_v51 = vpop.f32.mrb[0].mxu1 }
  0xf8   :  { %v650_v52 = vpop.f32.mrb[3].mxu0  ;;  %v675_v55 = vpop.f32.mrb[1].mxu1 }
  0xf9   :  { %v414_v53 = vadd.f32 %v648_v49, %v562_v47  ;;  %v651_v54 = vadd.f32 %v650_v52, %v649_v50  ;;  %v676_v56 = vadd.f32 %v675_v55, %v674_v51  ;;  %v677_v57 = vpop.f32.mrb[2].mxu1 }
  0xfa   :  { %v678_v59 = vpop.f32.mrb[3].mxu1 }
  0xfb   :  { %v417_v58 = vadd.f32 %v651_v54, %v562_v47  ;;  %v679_v60 = vadd.f32 %v678_v59, %v677_v57  ;;  %v463_v61 = vadd.f32 %v676_v56, %v414_v53 }
  0xfd   :  { %v652_v62 = vpop.f32.mrb[4].mxu0  ;;  %v466_v0 = vadd.f32 %v679_v60, %v417_v58 }
  0xfe   :  { %v653_v63 = vpop.f32.mrb[5].mxu0 }
  0xff   :  { %v654_v1 = vadd.f32 %v653_v63, %v652_v62  ;;  %v655_v2 = vpop.f32.mrb[6].mxu0  ;;  %v680_v3 = vpop.f32.mrb[4].mxu1 }
 0x100   :  { %v656_v4 = vpop.f32.mrb[7].mxu0  ;;  %v681_v7 = vpop.f32.mrb[5].mxu1 }
 0x101   :  { %v422_v5 = vadd.f32 %v654_v1, %v562_v47  ;;  %v657_v6 = vadd.f32 %v656_v4, %v655_v2  ;;  %v682_v8 = vadd.f32 %v681_v7, %v680_v3  ;;  %v683_v9 = vpop.f32.mrb[6].mxu1 }
 0x102   :  { %v684_v11 = vpop.f32.mrb[7].mxu1 }
 0x103   :  { %v425_v10 = vadd.f32 %v657_v6, %v562_v47  ;;  %v685_v12 = vadd.f32 %v684_v11, %v683_v9  ;;  %v471_v13 = vadd.f32 %v682_v8, %v422_v5 }
 0x105   :  { %v702_v14 = vpop.f32.mrb[8].mxu0  ;;  %v474_v15 = vadd.f32 %v685_v12, %v425_v10 }
 0x106   :  { %v520_v16 = vadd.f32 %v702_v14, %v471_v13  ;;  %v511_v17 = vpop.f32.mrb[9].mxu0 }
 0x107   :  { %v512_v18 = vadd.f32 %v511_v17, %v463_v61  ;;  %v703_v19 = vpop.f32.mrb[10].mxu0 }
 0x108   :  { %v532_v20 = vmul.f32 0.01, %v520_v16  ;;  %v523_v21 = vadd.f32 %v703_v19, %v474_v15  ;;  %v514_v22 = vpop.f32.mrb[11].mxu0  ;;  %vm528_vm1 = vcmp.ge.f32.partialorder %v520_v16, 0.0 }
 0x109   :  { %v530_v23 = vmul.f32 0.01, %v512_v18  ;;  %v515_v24 = vadd.f32 %v514_v22, %v466_v0  ;;  %vm526_vm2 = vcmp.ge.f32.partialorder %v512_v18, 0.0 }
 0x10a   :  { %vm529_vm3 = vcmp.ge.f32.partialorder %v523_v21, 0.0  ;;  %v533_v25 = vmul.f32 0.01, %v523_v21  ;;  %v536_v27 = vsel %vm528_vm1, %v520_v16, %v532_v20 }
 0x10b   :  { %vm527_vm4 = vcmp.ge.f32.partialorder %v515_v24, 0.0  ;;  %v531_v26 = vmul.f32 0.01, %v515_v24  ;;  %v534_v29 = vsel %vm526_vm2, %v512_v18, %v530_v23 }
 0x10c   :  { %v537_v28 = vsel %vm529_vm3, %v523_v21, %v533_v25 }
 0x10d   :  { %v627_v30 = vpack.c.bf16 %v537_v28, %v536_v27  ;;  %v535_v31 = vsel %vm527_vm4, %v515_v24, %v531_v26 }
 0x10e   :  { %v622_v32 = vpack.c.bf16 %v535_v31, %v534_v29 }
 0x10f   :  { %629 = vst [vmem:[%s924_s3 + $0x8] sm:$0xff] %v627_v30  }
 0x110   :  { %623 = vst [vmem:[%s924_s3] sm:$0xff] %v622_v32  }

// kernel: vae_forward.12
= control target key start
LH: loop header
LB: loop body
LE: loop exit
PB: predicated region body
PF: predicated region fallthrough
CT: control target
= control target key end

     0   :  { %v610_v35 = vmov 0.0   ;;  %vm611_vm0 = vmmov 0   ;;  %vm330_vm1 = vcmask 523264   ;;  %s755_s1 = inlined_call_operand.vmem [shape: bf16[576,128], index: 1, kind: input, shape index: {}]   ;;  %s756_s0 = inlined_call_operand.vmem [shape: bf16[8,576], index: 0, kind: input, shape index: {}]   ;;  %s757_s2 = inlined_call_operand.vmem [shape: f32[1,128], index: 2, kind: input, shape index: {}]   ;;  %s758_s3 = inlined_call_operand.vmem [shape: bf16[8,128], index: 3, kind: output, shape index: {}]  }
   0x1   :  { %v569_v0 = vld [vmem:[%s755_s1 + $0x40] sm:$0xff]   ;;  %v573_v4 = vld [vmem:[%s755_s1 + $0x48] sm:$0xff]   ;;  %v577_v8 = vld [vmem:[%s755_s1 + $0x50] sm:$0xff]  }
   0x2   :  { %v570_v1 = vld [vmem:[%s755_s1] sm:$0xff]   ;;  %506 = vmatprep.subr.bf16.mxu0 %v569_v0  ;;  %v574_v5 = vld [vmem:[%s755_s1 + $0x8] sm:$0xff]   ;;  %v578_v9 = vld [vmem:[%s755_s1 + $0x10] sm:$0xff]  }
   0x3   :  { %v571_v2 = vld [vmem:[%s755_s1 + $0xc0] sm:$0xff]   ;;  %507 = vmatpush3.bf16.msra.mxu0 %v570_v1  ;;  %v575_v6 = vld [vmem:[%s755_s1 + $0xc8] sm:$0xff]   ;;  %v579_v10 = vld [vmem:[%s755_s1 + $0xd0] sm:$0xff]  }
   0x4   :  { %v572_v3 = vld [vmem:[%s755_s1 + $0x80] sm:$0xff]   ;;  %528 = vmatprep.subr.bf16.mxu1 %v571_v2  ;;  %508 = vmatprep.subr.bf16.mxu0 %v573_v4  ;;  %v576_v7 = vld [vmem:[%s755_s1 + $0x88] sm:$0xff]   ;;  %v580_v11 = vld [vmem:[%s755_s1 + $0x90] sm:$0xff]  }
   0x5   :  { %529 = vmatpush3.bf16.msra.mxu1 %v572_v3  ;;  %v581_v12 = vld [vmem:[%s755_s1 + $0x58] sm:$0xff]   ;;  %v585_v16 = vld [vmem:[%s755_s1 + $0x60] sm:$0xff]   ;;  %v589_v20 = vld [vmem:[%s755_s1 + $0x68] sm:$0xff]  }
   0x6   :  { %530 = vmatprep.subr.bf16.mxu1 %v575_v6  ;;  %v582_v13 = vld [vmem:[%s755_s1 + $0x18] sm:$0xff]   ;;  %v586_v17 = vld [vmem:[%s755_s1 + $0x20] sm:$0xff]   ;;  %v590_v21 = vld [vmem:[%s755_s1 + $0x28] sm:$0xff]  }
   0x7   :  { %509 = vmatpush3.bf16.msra.mxu0 %v574_v5  ;;  %v583_v14 = vld [vmem:[%s755_s1 + $0xd8] sm:$0xff]   ;;  %v587_v18 = vld [vmem:[%s755_s1 + $0xe0] sm:$0xff]   ;;  %v591_v22 = vld [vmem:[%s755_s1 + $0xe8] sm:$0xff]  }
   0x8   :  { %510 = vmatprep.subr.bf16.mxu0 %v577_v8  ;;  %v584_v15 = vld [vmem:[%s755_s1 + $0x98] sm:$0xff]   ;;  %v588_v19 = vld [vmem:[%s755_s1 + $0xa0] sm:$0xff]   ;;  %v592_v23 = vld [vmem:[%s755_s1 + $0xa8] sm:$0xff]  }
   0x9   :  { %531 = vmatpush3.bf16.msra.mxu1 %v576_v7  ;;  %v593_v24 = vld [vmem:[%s755_s1 + $0x70] sm:$0xff]   ;;  %v597_v28 = vld [vmem:[%s755_s1 + $0x78] sm:$0xff]   ;;  %v15_v31 = vld [vmem:[%s756_s0] sm:$0xff] }
   0xa   :  { %532 = vmatprep.subr.bf16.mxu1 %v579_v10  ;;  %v594_v25 = vld [vmem:[%s755_s1 + $0x30] sm:$0xff]   ;;  %v598_v29 = vld [vmem:[%s755_s1 + $0x38] sm:$0xff]   ;;  %v464_v32 = vcombine.low %v15_v31, %v15_v31  ;;  %v465_v33 = vcombine.high %v15_v31, %v15_v31  ;;  %v16_v36 = vld [vmem:[%s756_s0 + $0x8] sm:$0xff] }
   0xb   :  { %511 = vmatpush3.bf16.msra.mxu0 %v578_v9  ;;  %v595_v26 = vld [vmem:[%s755_s1 + $0xf0] sm:$0xff]   ;;  %v599_v30 = vld [vmem:[%s755_s1 + $0xf8] sm:$0xff]   ;;  %v466_v37 = vcombine.low %v16_v36, %v16_v36  ;;  %v467_v38 = vcombine.high %v16_v36, %v16_v36  ;;  %v606_v39 = vld [vmem:[%s755_s1 + $0x100] sm:$0xff]  }
   0xc   :  { %512 = vmatprep.subr.bf16.mxu0 %v581_v12  ;;  %v596_v27 = vld [vmem:[%s755_s1 + $0xb0] sm:$0xff]   ;;  %v603_v34 = vld [vmem:[%s755_s1 + $0xb8] sm:$0xff]   ;;  %366 = vmatprep.mubr.bf16.mxu0 %v465_v33  ;;  %v607_v40 = vld [vmem:[%s755_s1 + $0x108] sm:$0xff]  }
   0xd   :  { %533 = vmatpush3.bf16.msra.mxu1 %v580_v11  ;;  %406 = vmatprep.mubr.bf16.mxu1 %v467_v38  ;;  %v608_v41 = vld [vmem:[%s755_s1 + $0x110] sm:$0xff]   ;;  %v609_v42 = vld [vmem:[%s755_s1 + $0x118] sm:$0xff]   ;;  %v463_v45 = vld [vmem:[%s757_s2] ss:$0 sm:$0xff] }
   0xe   :  { %534 = vmatprep.subr.bf16.mxu1 %v583_v14  ;;  %v602_v43 = vld [vmem:[%s756_s0 + $0x10] ss:$0 sps:$4 sm:$0xff]  }
   0xf   :  { %513 = vmatpush3.bf16.msra.mxu0 %v582_v13 }
  0x10   :  { %514 = vmatprep.subr.bf16.mxu0 %v585_v16 }
  0x11   :  { %535 = vmatpush3.bf16.msra.mxu1 %v584_v15 }
  0x12   :  { %536 = vmatprep.subr.bf16.mxu1 %v587_v18 }
  0x13   :  { %515 = vmatpush3.bf16.msra.mxu0 %v586_v17 }
  0x14   :  { %516 = vmatprep.subr.bf16.mxu0 %v589_v20 }
  0x15   :  { %537 = vmatpush3.bf16.msra.mxu1 %v588_v19 }
  0x16   :  { %538 = vmatprep.subr.bf16.mxu1 %v591_v22 }
  0x17   :  { %517 = vmatpush3.bf16.msra.mxu0 %v590_v21 }
  0x18   :  { %518 = vmatprep.subr.bf16.mxu0 %v593_v24 }
  0x19   :  { %539 = vmatpush3.bf16.msra.mxu1 %v592_v23 }
  0x1a   :  { %540 = vmatprep.subr.bf16.mxu1 %v595_v26 }
  0x1b   :  { %519 = vmatpush3.bf16.msra.mxu0 %v594_v25 }
  0x1c   :  { %520 = vmatprep.subr.bf16.mxu0 %v597_v28 }
  0x1d   :  { %541 = vmatpush3.bf16.msra.mxu1 %v596_v27 }
  0x1e   :  { %542 = vmatprep.subr.bf16.mxu1 %v599_v30 }
  0x1f   :  { %521 = vmatpush3.bf16.msra.mxu0 %v598_v29 }
  0x20   :  { %555 = vmatprep.subr.bf16.mxu0 %v610_v35 }
  0x21   :  { %543 = vmatpush3.bf16.msra.mxu1 %v603_v34 }
  0x22   :  { %367 = vmatmul.mubr.bf16.vlgmr.msra.gmra.mrb[0].mxu0 %v464_v32 }
  0x23   :  { %556 = vmatpush3.bf16.msra.mxu0 %v606_v39  ;;  %563 = vmatprep.mubr.msk.bf16.mxu0 %vm611_vm0, %v610_v35 }
  0x24   :  { %407 = vmatmul.mubr.bf16.vlgmr.msra.gmra.mrb[0].mxu1 %v466_v37  ;;  %557 = vmatprep.subr.bf16.mxu0 %v610_v35 }
  0x27   :  { %558 = vmatpush3.bf16.msra.mxu0 %v607_v40 }
  0x28   :  { %559 = vmatprep.subr.bf16.mxu0 %v610_v35 }
  0x2b   :  { %560 = vmatpush3.bf16.msra.mxu0 %v608_v41 }
  0x2c   :  { %561 = vmatprep.subr.bf16.mxu0 %v610_v35 }
  0x2f   :  { %562 = vmatpush3.bf16.msra.mxu0 %v609_v42 }
  0x32   :  { %564 = vmatmul.mubr.msk.bf16.vlgmr.msra.gmra.mrb[4].mxu0 %vm330_vm1, %v602_v43 }
  0xf5   :  { %v522_v44 = vpop.f32.mrb[0].mxu0 }
  0xf6   :  { %v523_v46 = vpop.f32.mrb[1].mxu0 }
  0xf7   :  { %v524_v47 = vadd.f32 %v523_v46, %v522_v44  ;;  %v525_v48 = vpop.f32.mrb[2].mxu0  ;;  %v544_v49 = vpop.f32.mrb[0].mxu1 }
  0xf8   :  { %v526_v50 = vpop.f32.mrb[3].mxu0  ;;  %v545_v51 = vpop.f32.mrb[1].mxu1 }
  0xf9   :  { %v369_v52 = vadd.f32 %v524_v47, %v463_v45  ;;  %v546_v53 = vadd.f32 %v545_v51, %v544_v49  ;;  %v547_v54 = vpop.f32.mrb[2].mxu1 }
  0xfa   :  { %v548_v55 = vpop.f32.mrb[3].mxu1 }
  0xfb   :  { %v409_v56 = vadd.f32 %v546_v53, %v369_v52 }
 0x105   :  { %v448_v57 = vpop.f32.mrb[4].mxu0 }
 0x106   :  { %v449_v58 = vadd.f32 %v448_v57, %v409_v56  ;;  %v565_v59 = vpop.f32.mrb[5].mxu0 }
 0x107   :  { %v451_v60 = vpop.f32.mrb[6].mxu0 }
 0x108   :  { %vm454_vm2 = vcmp.ge.f32.partialorder %v449_v58, 0.0  ;;  %v455_v61 = vmul.f32 0.01, %v449_v58  ;;  %v566_v62 = vpop.f32.mrb[7].mxu0 }
 0x10a   :  { %v456_v63 = vsel %vm454_vm2, %v449_v58, %v455_v61 }
 0x10b   :  { %v457_v0 = vpack.c.bf16 %v456_v63, %v456_v63 }
 0x10d   :  { %458 = vst [vmem:[%s758_s3] sm:$0xf] %v457_v0 }

// kernel: vae_forward.13
= control target key start
LH: loop header
LB: loop body
LE: loop exit
PB: predicated region body
PF: predicated region fallthrough
CT: control target
= control target key end

     0   :  { %16 = vsyncpa [#allocation3], 0  ;;  %v87_v23 = vlaneseq  ;;  %v745_v28 = vmov 1966171168   ;;  %s964_s0 = inlined_call_operand.vmem [shape: bf16[2,256], index: 0, kind: input, shape index: {}]   ;;  %s965_s1 = inlined_call_operand.vmem [shape: bf16[256,32], index: 1, kind: input, shape index: {}]   ;;  %s966_s2 = inlined_call_operand.vmem [shape: f32[1,32], index: 2, kind: input, shape index: {}]   ;;  %s967_s3 = inlined_call_operand.vmem [shape: bf16[256,32], index: 3, kind: input, shape index: {}]   ;;  %s968_s4 = inlined_call_operand.vmem [shape: f32[1,32], index: 4, kind: input, shape index: {}]   ;;  %s969_s5 = inlined_call_operand.vmem [shape: f32[2,32], index: 5, kind: input, shape index: {}]   ;;  %s970_s6 = inlined_call_operand.vmem [shape: bf16[32,256], index: 6, kind: input, shape index: {}]   ;;  %s971_s7 = inlined_call_operand.vmem [shape: f32[1,256], index: 7, kind: input, shape index: {}]   ;;  %s972_s8 = inlined_call_operand.hbm [shape: f32[2,32], index: 8, kind: output, shape index: {0}]   ;;  %s973_s9 = inlined_call_operand.hbm [shape: f32[2,32], index: 9, kind: output, shape index: {1}]   ;;  %s974_s10 = inlined_call_operand.vmem [shape: bf16[2,256], index: 10, kind: output, shape index: {2}]  }
   0x1   :  { %v657_v0 = vld [vmem:[%s967_s3 + $0x40] sm:$0xff]   ;;  %v659_v2 = vld [vmem:[%s967_s3 + $0x48] sm:$0xff]   ;;  %v661_v4 = vld [vmem:[%s967_s3 + $0x50] sm:$0xff]   ;;  %v85_v29 = vunpack.c.l.s4 %v745_v28 }
   0x2   :  { %v658_v1 = vld [vmem:[%s967_s3] sm:$0xff]   ;;  %631 = vmatprep.subr.bf16.mxu1 %v657_v0  ;;  %v660_v3 = vld [vmem:[%s967_s3 + $0x8] sm:$0xff]   ;;  %v662_v5 = vld [vmem:[%s967_s3 + $0x10] sm:$0xff]   ;;  %v885_v30 = vshrl.u32 %v87_v23, 7 }
   0x3   :  { %632 = vmatpush3.bf16.msra.mxu1 %v658_v1  ;;  %v663_v6 = vld [vmem:[%s967_s3 + $0x58] sm:$0xff]   ;;  %v665_v7 = vld [vmem:[%s965_s1 + $0x40] sm:$0xff]   ;;  %v669_v11 = vld [vmem:[%s965_s1 + $0x48] sm:$0xff]   ;;  %v86_v34 = vunpack.c.0.s8 %v85_v29 }
   0x4   :  { %633 = vmatprep.subr.bf16.mxu1 %v659_v2  ;;  %v666_v8 = vld [vmem:[%s965_s1] sm:$0xff]   ;;  %v664_v9 = vld [vmem:[%s967_s3 + $0x18] sm:$0xff]   ;;  %609 = vmatprep.subr.bf16.mxu0 %v665_v7  ;;  %v670_v12 = vld [vmem:[%s965_s1 + $0x8] sm:$0xff]  }
   0x5   :  { %610 = vmatpush3.bf16.msra.mxu0 %v666_v8  ;;  %v667_v10 = vld [vmem:[%s967_s3 + $0x60] sm:$0xff]   ;;  %v671_v14 = vld [vmem:[%s967_s3 + $0x68] sm:$0xff]   ;;  %v673_v15 = vld [vmem:[%s965_s1 + $0x50] sm:$0xff]   ;;  %v897_v36 = vsub.s32 %v86_v34, %v885_v30 }
   0x6   :  { %v668_v13 = vld [vmem:[%s967_s3 + $0x20] sm:$0xff]   ;;  %611 = vmatprep.subr.bf16.mxu0 %v669_v11  ;;  %v674_v16 = vld [vmem:[%s965_s1 + $0x10] sm:$0xff]   ;;  %v672_v17 = vld [vmem:[%s967_s3 + $0x28] sm:$0xff]  }
   0x7   :  { %634 = vmatpush3.bf16.msra.mxu1 %v660_v3  ;;  %v675_v18 = vld [vmem:[%s967_s3 + $0x70] sm:$0xff]   ;;  %v677_v19 = vld [vmem:[%s965_s1 + $0x58] sm:$0xff]   ;;  %v681_v24 = vld [vmem:[%s965_s1 + $0x60] sm:$0xff]  }
   0x8   :  { %635 = vmatprep.subr.bf16.mxu1 %v661_v4  ;;  %v678_v20 = vld [vmem:[%s965_s1 + $0x18] sm:$0xff]   ;;  %v676_v21 = vld [vmem:[%s967_s3 + $0x30] sm:$0xff]   ;;  %v682_v26 = vld [vmem:[%s965_s1 + $0x20] sm:$0xff]  }
   0x9   :  { %612 = vmatpush3.bf16.msra.mxu0 %v670_v12  ;;  %v679_v22 = vld [vmem:[%s967_s3 + $0x78] sm:$0xff]   ;;  %v568_v27 = vld.sshfl [vmem:[%s964_s0] sm:$0x11 pattern:$0x75316420]  ;;  %v683_v31 = vld [vmem:[%s965_s1 + $0x68] sm:$0xff]  }
   0xa   :  { %613 = vmatprep.subr.bf16.mxu0 %v673_v15  ;;  %v680_v25 = vld [vmem:[%s967_s3 + $0x38] sm:$0xff]   ;;  %v684_v32 = vld [vmem:[%s965_s1 + $0x28] sm:$0xff]   ;;  %v83_v33 = vcombine.high %v568_v27, %v568_v27  ;;  %v685_v35 = vld [vmem:[%s965_s1 + $0x70] sm:$0xff]   ;;  %v90_v40 = vrot.slane %v568_v27, %v897_v36 }
   0xb   :  { %636 = vmatpush3.bf16.msra.mxu1 %v662_v5  ;;  %v686_v37 = vld [vmem:[%s965_s1 + $0x30] sm:$0xff]   ;;  %v687_v38 = vld [vmem:[%s965_s1 + $0x78] sm:$0xff]  }
   0xc   :  { %637 = vmatprep.subr.bf16.mxu1 %v663_v6  ;;  %v97_v39 = vrot.slane %v83_v33, %v897_v36 }
   0xd   :  { %614 = vmatpush3.bf16.msra.mxu0 %v674_v16 }
   0xe   :  { %615 = vmatprep.subr.bf16.mxu0 %v677_v19 }
   0xf   :  { %638 = vmatpush3.bf16.msra.mxu1 %v664_v9 }
  0x10   :  { %639 = vmatprep.subr.bf16.mxu1 %v667_v10 }
  0x11   :  { %616 = vmatpush3.bf16.msra.mxu0 %v678_v20 }
  0x12   :  { %617 = vmatprep.subr.bf16.mxu0 %v681_v24 }
  0x13   :  { %640 = vmatpush3.bf16.msra.mxu1 %v668_v13 }
  0x14   :  { %641 = vmatprep.subr.bf16.mxu1 %v671_v14 }
  0x15   :  { %618 = vmatpush3.bf16.msra.mxu0 %v682_v26 }
  0x16   :  { %619 = vmatprep.subr.bf16.mxu0 %v683_v31 }
  0x17   :  { %642 = vmatpush3.bf16.msra.mxu1 %v672_v17 }
  0x18   :  { %643 = vmatprep.subr.bf16.mxu1 %v675_v18 }
  0x19   :  { %620 = vmatpush3.bf16.msra.mxu0 %v684_v32 }
  0x1a   :  { %621 = vmatprep.subr.bf16.mxu0 %v685_v35 }
  0x1b   :  { %644 = vmatpush3.bf16.msra.mxu1 %v676_v21 }
  0x1c   :  { %645 = vmatprep.subr.bf16.mxu1 %v679_v22 }
  0x1f   :  { %646 = vmatpush3.bf16.msra.mxu1 %v680_v25 }
  0x20   :  { %17 = vsyncpa [#allocation5], 0  ;;  %406 = vmatprep.mubr.bf16.mxu1 %v97_v39  ;;  %622 = vmatpush3.bf16.msra.mxu0 %v686_v37  ;;  %v688_v41 = vld [vmem:[%s965_s1 + $0x38] sm:$0xff]   ;;  %v691_v42 = vld [vmem:[%s970_s6 + $0x4] ss:$8 sps:$4 sm:$0xff]   ;;  %v746_v46 = vmov 0  }
  0x21   :  { %623 = vmatprep.subr.bf16.mxu0 %v687_v38  ;;  %228 = vmatprep.mubr.bf16.mxu0 %v97_v39  ;;  %v689_v43 = vld [vmem:[%s970_s6] ss:$8 sps:$4 sm:$0xff]   ;;  %v694_v44 = vld [vmem:[%s970_s6 + $0x14] ss:$8 sps:$4 sm:$0xff]   ;;  %v692_v45 = vld [vmem:[%s970_s6 + $0x10] ss:$8 sps:$4 sm:$0xff]  }
  0x22   :  { %407 = vmatmul.mubr.bf16.vlgmr.msra.gmra.mrb[0].mxu1 %v90_v40  ;;  %v585_v48 = vld [vmem:[%s968_s4] ss:$0 sm:$0xff]  ;;  %vm511_vm1 = vcmask 254976   ;;  %vm460_vm3 = vcmask 261120   ;;  %s748_s3 = smov [#allocation4]  }
  0x23   :  { %v567_v56 = vld [vmem:[%s966_s2] ss:$0 sm:$0xff]  ;;  %s747_s2 = smov [#allocation2]   ;;  %s551_s29 = sshll.u32 %s748_s3, 4  ;;  %s552_s29 = int_to_ptr.vmem [resolvable:$true] %s551_s29 }
  0x24   :  { %624 = vmatpush3.bf16.msra.mxu0 %v688_v41  ;;  %v417_v3 = vld [vmem:[%s969_s5] sm:$0x3]  ;;  %s541_s28 = sshll.u32 %s747_s2, 4  ;;  %s542_s28 = int_to_ptr.vmem [resolvable:$true] %s541_s28 }
  0x25   :  { %464 = vmatprep.subr.bf16.mxu0 %v691_v42  ;;  %s697_s30 = scalar_lea.vmem %s542_s28, 32  ;;  %p702_p1 = scmp.lt.s32.totalorder %s542_s28, %s542_s28 }
  0x26   :  { %p698_p0 = scmp.ne.s32.totalorder %s542_s28, %s697_s30  ;;  %p703_p2 = scmp.lt.s32.totalorder %s697_s30, %s697_s30 }
  0x27   :  { %229 = vmatmul.mubr.bf16.vlgmr.msra.gmra.mrb[0].mxu0 %v90_v40 }
  0x28   :  { %465 = vmatpush1.bf16.msra.mxu0 %v689_v43  ;;  %496 = vmatprep.mubr.bf16.mxu0 %v746_v46  ;;  %p704_p3 = por %p703_p2, %p702_p1 }
  0x29   :  { %466 = vmatprep.subr.bf16.mxu0 %v694_v44 }
  0x2a   :  { %p705_p4 = pnand %p704_p3, %p698_p0 }
  0x2c   :  { %467 = vmatpush1.bf16.msra.mxu0 %v692_v45 }
  0xf5   :  { %v647_v47 = vpop.f32.mrb[0].mxu1 }
  0xf6   :  { %v648_v49 = vpop.f32.mrb[1].mxu1 }
  0xf7   :  { %v649_v50 = vadd.f32 %v648_v49, %v647_v47  ;;  %v650_v51 = vpop.f32.mrb[2].mxu1 }
  0xf8   :  { %v651_v52 = vpop.f32.mrb[3].mxu1 }
  0xf9   :  { %v409_v53 = vadd.f32 %v649_v50, %v585_v48 }
  0xfa   :  { %v625_v55 = vpop.f32.mrb[0].mxu0 }
  0xfb   :  { %vm414_vm0 = vcmp.ge.f32.partialorder %v409_v53, 0.0  ;;  %v415_v54 = vmul.f32 0.01, %v409_v53  ;;  %v626_v57 = vpop.f32.mrb[1].mxu0 }
  0xfc   :  { %v627_v59 = vadd.f32 %v626_v57, %v625_v55  ;;  %v628_v60 = vpop.f32.mrb[2].mxu0 }
  0xfd   :  { %v416_v58 = vsel %vm414_vm0, %v409_v53, %v415_v54  ;;  %v629_v62 = vpop.f32.mrb[3].mxu0 }
  0xfe   :  { %v418_v61 = vmul.f32 0.5, %v416_v58  ;;  %513 = vst.msk [vmem:[#allocation4] sm:$0x3] %vm511_vm1, %v416_v58  ;;  %v231_v63 = vadd.f32 %v627_v59, %v567_v56 }
 0x100   :  { %v419_v0 = vmul.f32 1.442695, %v418_v61  ;;  %vm236_vm2 = vcmp.ge.f32.partialorder %v231_v63, 0.0  ;;  %v237_v1 = vmul.f32 0.01, %v231_v63 }
 0x102   :  { %695 = vpow2.f32 %v419_v0  ;;  %v238_v2 = vsel %vm236_vm2, %v231_v63, %v237_v1 }
 0x103   :  { %512 = vst.msk [vmem:[#allocation2] sm:$0x3] %vm511_vm1, %v238_v2 }
 0x10c   :  { %v696_v4 = vpop.eup %695 }
 0x10d   :  { %v421_v5 = vmul.f32 %v696_v4, %v417_v3 }
 0x10f   :  { %v422_v6 = vadd.f32 %v421_v5, %v238_v2 }
 0x111   :  { %v423_v7 = vpack.c.bf16 %v422_v6, %v422_v6 }
 0x113   :  { %606 = vmatmul.mubr.msk.bf16.vlgmr.msra.gmra.mrb[4].mxu0 %vm460_vm3, %v423_v7 }
 0x114   :  { %708 = shalt.err (!%p705_p4)
}
 0x115   :  { %s709_s11 = scalar_lea.hbm %s972_s8, 32 }
 0x116   :  { %p710_p5 = scmp.ne.s32.totalorder %s972_s8, %s709_s11  ;;  %p713_p6 = scmp.lt.u32.totalorder %s709_s11, %s972_s8 }
 0x118   :  { %p715_p7 = pnand %p713_p6, %p710_p5 }
 0x11a   :  { %718 = shalt.err (!%p715_p7)
}
 0x11b   :  { %544 = dma.vmem_to_hbm [thread:$0]  %s542_s28, 32, %s972_s8, [#allocation3]  }
 0x11c   :  { %s719_s18 = scalar_lea.vmem %s552_s29, 32  ;;  %p724_p9 = scmp.lt.s32.totalorder %s552_s29, %s552_s29 }
 0x11d   :  { %p720_p8 = scmp.ne.s32.totalorder %s552_s29, %s719_s18  ;;  %p725_p10 = scmp.lt.s32.totalorder %s719_s18, %s719_s18 }
 0x11f   :  { %p726_p11 = por %p725_p10, %p724_p9 }
 0x121   :  { %p727_p12 = pnand %p726_p11, %p720_p8 }
 0x123   :  { %730 = shalt.err (!%p727_p12)
}
 0x124   :  { %s731_s21 = scalar_lea.hbm %s973_s9, 32 }
 0x125   :  { %p732_p13 = scmp.ne.s32.totalorder %s973_s9, %s731_s21  ;;  %p735_p0 = scmp.lt.u32.totalorder %s731_s21, %s973_s9 }
 0x127   :  { %p737_p1 = pnand %p735_p0, %p732_p13 }
 0x129   :  { %740 = shalt.err (!%p737_p1)
}
 0x12a   :  { %554 = dma.vmem_to_hbm [thread:$0]  %s552_s29, 32, %s973_s9, [#allocation5]   ;;  %v432_v8 = vsub.s32 0, %v885_v30  ;;  %v428_v9 = vld [vmem:[%s971_s7] sm:$0x3]  ;;  %v436_v10 = vsub.s32 1, %v885_v30 }
 0x12c   :  { %v433_v11 = vrot.slane %v428_v9, %v432_v8  ;;  %v437_v12 = vrot.slane %v428_v9, %v436_v10 }
 0x1e6   :  { %v498_v13 = vpop.f32.mrb[4].mxu0 }
 0x1e7   :  { %v499_v14 = vadd.f32 %v498_v13, %v433_v11  ;;  %v500_v15 = vpop.f32.mrb[5].mxu0 }
 0x1e8   :  { %v501_v16 = vadd.f32 %v500_v15, %v437_v12  ;;  %v502_v17 = vpop.f32.mrb[6].mxu0 }
 0x1e9   :  { %vm505_vm4 = vcmp.ge.f32.partialorder %v499_v14, 0.0  ;;  %v507_v18 = vmul.f32 0.01, %v499_v14  ;;  %v503_v19 = vpop.f32.mrb[7].mxu0 }
 0x1ea   :  { %vm506_vm5 = vcmp.ge.f32.partialorder %v501_v16, 0.0  ;;  %v508_v20 = vmul.f32 0.01, %v501_v16 }
 0x1eb   :  { %v509_v21 = vsel %vm505_vm4, %v499_v14, %v507_v18 }
 0x1ec   :  { %v510_v22 = vsel %vm506_vm5, %v501_v16, %v508_v20 }
 0x1ed   :  { %v607_v23 = vpack.c.bf16 %v510_v22, %v509_v21 }
 0x1ef   :  { %v525_v24 = vrot.slane %v607_v23, %v897_v36 }
 0x1f1   :  { %608 = vst.sshfl [vmem:[%s974_s10] sm:$0x5 pattern:$0x73625140] %v525_v24 }
 0x1f2   :  { %741 = dma.done.wait [#allocation3], 32  }
 0x1f3   :  { %742 = vsyncadd [#allocation3], 4294967264 }
 0x1f4   :  { %743 = dma.done.wait [#allocation5], 32  }
 0x1f5   :  { %744 = vsyncadd [#allocation5], 4294967264 }
 0x1f6   :  { %565 = vsyncpa [#allocation3], 1 }
 0x1f7   :  { %566 = vsyncpa [#allocation5], 1 }

// kernel: vae_forward.15
= control target key start
LH: loop header
LB: loop body
LE: loop exit
PB: predicated region body
PF: predicated region fallthrough
CT: control target
= control target key end

     0   :  { %vm558_vm0 = vcmask 523264   ;;  %s1774_s1 = inlined_call_operand.vmem [shape: bf16[576,128], index: 1, kind: input, shape index: {}]   ;;  %s1775_s0 = inlined_call_operand.vmem [shape: bf16[128,576], index: 0, kind: input, shape index: {}]   ;;  %s1776_s2 = inlined_call_operand.vmem [shape: f32[1,128], index: 2, kind: input, shape index: {}]   ;;  %s1777_s3 = inlined_call_operand.vmem [shape: bf16[128,128], index: 3, kind: output, shape index: {}]  }
   0x1   :  { %v1342_v0 = vld [vmem:[%s1774_s1 + $0x40] sm:$0xff]   ;;  %v1346_v4 = vld [vmem:[%s1774_s1 + $0x48] sm:$0xff]   ;;  %v1350_v8 = vld [vmem:[%s1774_s1 + $0x50] sm:$0xff]  }
   0x2   :  { %v1343_v1 = vld [vmem:[%s1774_s1 + $0xc0] sm:$0xff]   ;;  %1170 = vmatprep.subr.bf16.mxu0 %v1342_v0  ;;  %v1347_v5 = vld [vmem:[%s1774_s1 + $0xc8] sm:$0xff]   ;;  %v1351_v9 = vld [vmem:[%s1774_s1 + $0xd0] sm:$0xff]  }
   0x3   :  { %v1344_v2 = vld [vmem:[%s1774_s1] sm:$0xff]   ;;  %1234 = vmatprep.subr.bf16.mxu1 %v1343_v1  ;;  %v1348_v6 = vld [vmem:[%s1774_s1 + $0x8] sm:$0xff]   ;;  %v1352_v10 = vld [vmem:[%s1774_s1 + $0x10] sm:$0xff]  }
   0x4   :  { %v1345_v3 = vld [vmem:[%s1774_s1 + $0x80] sm:$0xff]   ;;  %1171 = vmatpush3.bf16.msra.mxu0 %v1344_v2  ;;  %v1349_v7 = vld [vmem:[%s1774_s1 + $0x88] sm:$0xff]   ;;  %v1353_v11 = vld [vmem:[%s1774_s1 + $0x90] sm:$0xff]  }
   0x5   :  { %1235 = vmatpush3.bf16.msra.mxu1 %v1345_v3  ;;  %1172 = vmatprep.subr.bf16.mxu0 %v1346_v4  ;;  %v1354_v12 = vld [vmem:[%s1774_s1 + $0x58] sm:$0xff]   ;;  %v1358_v16 = vld [vmem:[%s1774_s1 + $0x60] sm:$0xff]   ;;  %v1362_v20 = vld [vmem:[%s1774_s1 + $0x68] sm:$0xff]  }
   0x6   :  { %1236 = vmatprep.subr.bf16.mxu1 %v1347_v5  ;;  %v1355_v13 = vld [vmem:[%s1774_s1 + $0xd8] sm:$0xff]   ;;  %v1359_v17 = vld [vmem:[%s1774_s1 + $0xe0] sm:$0xff]   ;;  %v1363_v21 = vld [vmem:[%s1774_s1 + $0xe8] sm:$0xff]  }
   0x7   :  { %v1356_v14 = vld [vmem:[%s1774_s1 + $0x18] sm:$0xff]   ;;  %v1360_v18 = vld [vmem:[%s1774_s1 + $0x20] sm:$0xff]   ;;  %v1364_v22 = vld [vmem:[%s1774_s1 + $0x28] sm:$0xff]  }
   0x8   :  { %1173 = vmatpush3.bf16.msra.mxu0 %v1348_v6  ;;  %v1357_v15 = vld [vmem:[%s1774_s1 + $0x98] sm:$0xff]   ;;  %v1361_v19 = vld [vmem:[%s1774_s1 + $0xa0] sm:$0xff]   ;;  %v1365_v23 = vld [vmem:[%s1774_s1 + $0xa8] sm:$0xff]  }
   0x9   :  { %1237 = vmatpush3.bf16.msra.mxu1 %v1349_v7  ;;  %1174 = vmatprep.subr.bf16.mxu0 %v1350_v8  ;;  %v1366_v24 = vld [vmem:[%s1774_s1 + $0x70] sm:$0xff]   ;;  %v1370_v28 = vld [vmem:[%s1774_s1 + $0x78] sm:$0xff]   ;;  %v1379_v35 = vld [vmem:[%s1775_s0 + $0xc] ss:$20 sps:$4 sm:$0xff]  }
   0xa   :  { %1238 = vmatprep.subr.bf16.mxu1 %v1351_v9  ;;  %v1367_v25 = vld [vmem:[%s1774_s1 + $0xf0] sm:$0xff]   ;;  %v1371_v29 = vld [vmem:[%s1774_s1 + $0xf8] sm:$0xff]   ;;  %v1380_v36 = vld [vmem:[%s1774_s1 + $0x100] sm:$0xff]   ;;  %712 = vmatprep.mubr.bf16.mxu1 %v1379_v35 }
   0xb   :  { %v1368_v26 = vld [vmem:[%s1774_s1 + $0x30] sm:$0xff]   ;;  %v1372_v30 = vld [vmem:[%s1774_s1 + $0x38] sm:$0xff]   ;;  %v1381_v37 = vld [vmem:[%s1775_s0 + $0x2c] ss:$20 sps:$4 sm:$0xff]  }
   0xc   :  { %1175 = vmatpush3.bf16.msra.mxu0 %v1352_v10  ;;  %v1369_v27 = vld [vmem:[%s1774_s1 + $0xb0] sm:$0xff]   ;;  %v1373_v31 = vld [vmem:[%s1774_s1 + $0xb8] sm:$0xff]   ;;  %v1393_v42 = vld [vmem:[%s1774_s1 + $0x108] sm:$0xff]  }
   0xd   :  { %1239 = vmatpush3.bf16.msra.mxu1 %v1353_v11  ;;  %1176 = vmatprep.subr.bf16.mxu0 %v1354_v12  ;;  %v1374_v32 = vld [vmem:[%s1775_s0] ss:$20 sps:$4 sm:$0xff]   ;;  %v1376_v33 = vld [vmem:[%s1775_s0 + $0x4] ss:$20 sps:$4 sm:$0xff]   ;;  %v1377_v34 = vld [vmem:[%s1775_s0 + $0x8] ss:$20 sps:$4 sm:$0xff]  }
   0xe   :  { %1240 = vmatprep.subr.bf16.mxu1 %v1355_v13  ;;  %615 = vmatprep.mubr.bf16.mxu0 %v1376_v33  ;;  %v1383_v38 = vld [vmem:[%s1775_s0 + $0x34] ss:$20 sps:$4 sm:$0xff]   ;;  %v1386_v40 = vld [vmem:[%s1775_s0 + $0x30] ss:$20 sps:$4 sm:$0xff]   ;;  %v1392_v45 = vld [vmem:[%s1775_s0 + $0x58] ss:$20 sps:$4 sm:$0xff]  }
   0xf   :  { %v1385_v39 = vld [vmem:[%s1775_s0 + $0x28] ss:$20 sps:$4 sm:$0xff]   ;;  %v1391_v44 = vld [vmem:[%s1775_s0 + $0x50] ss:$20 sps:$4 sm:$0xff]   ;;  %v1398_v50 = vld [vmem:[%s1775_s0 + $0x78] ss:$20 sps:$4 sm:$0xff]  }
  0x10   :  { %1177 = vmatpush3.bf16.msra.mxu0 %v1356_v14  ;;  %v1387_v41 = vld [vmem:[%s1775_s0 + $0x54] ss:$20 sps:$4 sm:$0xff]   ;;  %v1389_v43 = vld [vmem:[%s1775_s0 + $0x5c] ss:$20 sps:$4 sm:$0xff]   ;;  %v1396_v48 = vld [vmem:[%s1775_s0 + $0x84] ss:$20 sps:$4 sm:$0xff]  }
  0x11   :  { %1241 = vmatpush3.bf16.msra.mxu1 %v1357_v15  ;;  %1178 = vmatprep.subr.bf16.mxu0 %v1358_v16  ;;  %v1406_v46 = vld [vmem:[%s1774_s1 + $0x110] sm:$0xff]   ;;  %v1419_v49 = vld [vmem:[%s1774_s1 + $0x118] sm:$0xff]   ;;  %v1402_v53 = vld [vmem:[%s1775_s0 + $0xac] ss:$20 sps:$4 sm:$0xff]  }
  0x12   :  { %1242 = vmatprep.subr.bf16.mxu1 %v1359_v17  ;;  %v1394_v47 = vld [vmem:[%s1775_s0 + $0x7c] ss:$20 sps:$4 sm:$0xff]   ;;  %v1399_v51 = vld [vmem:[%s1775_s0 + $0x80] ss:$20 sps:$4 sm:$0xff]   ;;  %v1400_v52 = vld [vmem:[%s1775_s0 + $0xa4] ss:$20 sps:$4 sm:$0xff]  }
  0x13   :  { %v1404_v54 = vld [vmem:[%s1775_s0 + $0xa0] ss:$20 sps:$4 sm:$0xff]   ;;  %v1405_v55 = vld [vmem:[%s1775_s0 + $0xa8] ss:$20 sps:$4 sm:$0xff]   ;;  %v1412_v59 = vld [vmem:[%s1775_s0 + $0xd0] ss:$20 sps:$4 sm:$0xff]  }
  0x14   :  { %1179 = vmatpush3.bf16.msra.mxu0 %v1360_v18  ;;  %v1407_v56 = vld [vmem:[%s1775_s0 + $0xcc] ss:$20 sps:$4 sm:$0xff]   ;;  %v1409_v57 = vld [vmem:[%s1775_s0 + $0xd4] ss:$20 sps:$4 sm:$0xff]   ;;  %v1415_v61 = vld [vmem:[%s1775_s0 + $0xfc] ss:$20 sps:$4 sm:$0xff]  }
  0x15   :  { %1243 = vmatpush3.bf16.msra.mxu1 %v1361_v19  ;;  %1180 = vmatprep.subr.bf16.mxu0 %v1362_v20  ;;  %v1411_v58 = vld [vmem:[%s1775_s0 + $0xc8] ss:$20 sps:$4 sm:$0xff]   ;;  %v1417_v62 = vld [vmem:[%s1775_s0 + $0xf0] ss:$20 sps:$4 sm:$0xff]   ;;  %v1418_v63 = vld [vmem:[%s1775_s0 + $0xf8] ss:$20 sps:$4 sm:$0xff]  }
  0x16   :  { %1244 = vmatprep.subr.bf16.mxu1 %v1363_v21  ;;  %v1413_v60 = vld [vmem:[%s1775_s0 + $0xf4] ss:$20 sps:$4 sm:$0xff]   ;;  %v1420_v0 = vld [vmem:[%s1775_s0 + $0x11c] ss:$20 sps:$4 sm:$0xff]   ;;  %v1422_v1 = vld [vmem:[%s1775_s0 + $0x124] ss:$20 sps:$4 sm:$0xff]  }
  0x17   :  { %v1424_v2 = vld [vmem:[%s1775_s0 + $0x118] ss:$20 sps:$4 sm:$0xff]   ;;  %v1425_v3 = vld [vmem:[%s1775_s0 + $0x120] ss:$20 sps:$4 sm:$0xff]   ;;  %v1426_v4 = vld [vmem:[%s1775_s0 + $0x10] ss:$20 sps:$4 sm:$0xff]  }
  0x18   :  { %1181 = vmatpush3.bf16.msra.mxu0 %v1364_v22  ;;  %v1427_v5 = vld [vmem:[%s1775_s0 + $0xb0] ss:$20 sps:$4 sm:$0xff]   ;;  %v1428_v6 = vld [vmem:[%s1775_s0 + $0x38] ss:$20 sps:$4 sm:$0xff]   ;;  %v1430_v8 = vld [vmem:[%s1775_s0 + $0x60] ss:$20 sps:$4 sm:$0xff]  }
  0x19   :  { %1245 = vmatpush3.bf16.msra.mxu1 %v1365_v23  ;;  %1182 = vmatprep.subr.bf16.mxu0 %v1366_v24  ;;  %v1429_v7 = vld [vmem:[%s1775_s0 + $0xd8] ss:$20 sps:$4 sm:$0xff]   ;;  %v1431_v9 = vld [vmem:[%s1775_s0 + $0x100] ss:$20 sps:$4 sm:$0xff]   ;;  %v1432_v10 = vld [vmem:[%s1775_s0 + $0x88] ss:$20 sps:$4 sm:$0xff]  }
  0x1a   :  { %1246 = vmatprep.subr.bf16.mxu1 %v1367_v25  ;;  %v1433_v11 = vld [vmem:[%s1775_s0 + $0x128] ss:$20 sps:$4 sm:$0xff]   ;;  %v1693_v14 = vld [vmem:[%s1776_s2] ss:$0 sm:$0xff] }
  0x1c   :  { %1183 = vmatpush3.bf16.msra.mxu0 %v1368_v26 }
  0x1d   :  { %1247 = vmatpush3.bf16.msra.mxu1 %v1369_v27  ;;  %1184 = vmatprep.subr.bf16.mxu0 %v1370_v28 }
  0x1e   :  { %1248 = vmatprep.subr.bf16.mxu1 %v1371_v29 }
  0x20   :  { %1185 = vmatpush3.bf16.msra.mxu0 %v1372_v30 }
  0x21   :  { %1249 = vmatpush3.bf16.msra.mxu1 %v1373_v31  ;;  %1310 = vmatprep.subr.bf16.mxu0 %v1380_v36 }
  0x22   :  { %1334 = vmatprep.subr.bf16.mxu1 %v1380_v36 }
  0x23   :  { %616 = vmatmul.mubr.bf16.vlgmr.msra.gmra.mrb[0].mxu0 %v1374_v32 }
  0x24   :  { %713 = vmatmul.mubr.bf16.vlgmr.msra.gmra.mrb[0].mxu1 %v1377_v34  ;;  %1311 = vmatpush3.bf16.msra.mxu0 %v1380_v36 }
  0x25   :  { %1338 = vmatpush3.bf16.msra.mxu1 %v1380_v36  ;;  %623 = vmatprep.mubr.bf16.mxu0 %v1381_v37 }
  0x26   :  { %720 = vmatprep.mubr.bf16.mxu1 %v1383_v38  ;;  %1312 = vmatprep.subr.bf16.mxu0 %v1393_v42 }
  0x27   :  { %1335 = vmatprep.subr.bf16.mxu1 %v1393_v42 }
  0x28   :  { %1313 = vmatpush3.bf16.msra.mxu0 %v1393_v42 }
  0x29   :  { %1339 = vmatpush3.bf16.msra.mxu1 %v1393_v42  ;;  %1314 = vmatprep.subr.bf16.mxu0 %v1406_v46 }
  0x2a   :  { %1336 = vmatprep.subr.bf16.mxu1 %v1406_v46 }
  0x2b   :  { %624 = vmatmul.mubr.bf16.gmra.mrb[4].mxu0 %v1385_v39 }
  0x2c   :  { %721 = vmatmul.mubr.bf16.gmra.mrb[4].mxu1 %v1386_v40  ;;  %631 = vmatprep.mubr.bf16.mxu0 %v1387_v41 }
  0x2d   :  { %728 = vmatprep.mubr.bf16.mxu1 %v1389_v43  ;;  %1315 = vmatpush3.bf16.msra.mxu0 %v1406_v46 }
  0x2e   :  { %1340 = vmatpush3.bf16.msra.mxu1 %v1406_v46  ;;  %1316 = vmatprep.subr.bf16.mxu0 %v1419_v49 }
  0x2f   :  { %1337 = vmatprep.subr.bf16.mxu1 %v1419_v49 }
  0x31   :  { %1317 = vmatpush3.bf16.msra.mxu0 %v1419_v49 }
  0x32   :  { %1341 = vmatpush3.bf16.msra.mxu1 %v1419_v49 }
  0x33   :  { %632 = vmatmul.mubr.bf16.gmra.mrb[8].mxu0 %v1391_v44 }
  0x34   :  { %729 = vmatmul.mubr.bf16.gmra.mrb[8].mxu1 %v1392_v45  ;;  %639 = vmatprep.mubr.bf16.mxu0 %v1394_v47 }
  0x35   :  { %736 = vmatprep.mubr.bf16.mxu1 %v1396_v48 }
  0x3b   :  { %640 = vmatmul.mubr.bf16.gmra.mrb[12].mxu0 %v1398_v50 }
  0x3c   :  { %737 = vmatmul.mubr.bf16.gmra.mrb[12].mxu1 %v1399_v51  ;;  %647 = vmatprep.mubr.bf16.mxu0 %v1400_v52 }
  0x3d   :  { %744 = vmatprep.mubr.bf16.mxu1 %v1402_v53 }
  0x43   :  { %648 = vmatmul.mubr.bf16.gmra.mrb[16].mxu0 %v1404_v54 }
  0x44   :  { %745 = vmatmul.mubr.bf16.gmra.mrb[16].mxu1 %v1405_v55  ;;  %655 = vmatprep.mubr.bf16.mxu0 %v1407_v56 }
  0x45   :  { %752 = vmatprep.mubr.bf16.mxu1 %v1409_v57 }
  0x4b   :  { %656 = vmatmul.mubr.bf16.gmra.mrb[20].mxu0 %v1411_v58 }
  0x4c   :  { %753 = vmatmul.mubr.bf16.gmra.mrb[20].mxu1 %v1412_v59  ;;  %663 = vmatprep.mubr.bf16.mxu0 %v1413_v60 }
  0x4d   :  { %760 = vmatprep.mubr.bf16.mxu1 %v1415_v61 }
  0x53   :  { %664 = vmatmul.mubr.bf16.gmra.mrb[24].mxu0 %v1417_v62 }
  0x54   :  { %761 = vmatmul.mubr.bf16.gmra.mrb[24].mxu1 %v1418_v63  ;;  %671 = vmatprep.mubr.bf16.mxu0 %v1420_v0 }
  0x55   :  { %768 = vmatprep.mubr.bf16.mxu1 %v1422_v1 }
  0x5b   :  { %672 = vmatmul.mubr.bf16.gmra.mrb[28].mxu0 %v1424_v2 }
  0x5c   :  { %769 = vmatmul.mubr.bf16.gmra.mrb[28].mxu1 %v1425_v3  ;;  %1318 = vmatprep.mubr.msk.bf16.mxu0 %vm558_vm0, %v1426_v4 }
  0x5d   :  { %1326 = vmatprep.mubr.msk.bf16.mxu1 %vm558_vm0, %v1427_v5 }
  0x63   :  { %1319 = vmatmul.mubr.msk.bf16.vlgmr.msra.gmra.mrb[32].mxu0 %vm558_vm0, %v1428_v6 }
  0x64   :  { %1327 = vmatmul.mubr.msk.bf16.vlgmr.msra.gmra.mrb[32].mxu1 %vm558_vm0, %v1429_v7  ;;  %1322 = vmatprep.mubr.msk.bf16.mxu0 %vm558_vm0, %v1430_v8 }
  0x65   :  { %1330 = vmatprep.mubr.msk.bf16.mxu1 %vm558_vm0, %v1431_v9 }
  0x6b   :  { %1323 = vmatmul.mubr.msk.bf16.gmra.mrb[36].mxu0 %vm558_vm0, %v1432_v10 }
  0x6c   :  { %1331 = vmatmul.mubr.msk.bf16.gmra.mrb[36].mxu1 %vm558_vm0, %v1433_v11 }
  0xf6   :  { %v1186_v12 = vpop.f32.mrb[0].mxu0 }
  0xf7   :  { %v1250_v13 = vpop.f32.mrb[0].mxu1  ;;  %v1187_v15 = vpop.f32.mrb[1].mxu0 }
  0xf8   :  { %v1188_v16 = vadd.f32 %v1187_v15, %v1186_v12  ;;  %v1251_v17 = vpop.f32.mrb[1].mxu1  ;;  %v1189_v18 = vpop.f32.mrb[2].mxu0 }
  0xf9   :  { %v1252_v19 = vadd.f32 %v1251_v17, %v1250_v13  ;;  %v1253_v20 = vpop.f32.mrb[2].mxu1  ;;  %v1190_v21 = vpop.f32.mrb[3].mxu0 }
  0xfa   :  { %v618_v22 = vadd.f32 %v1188_v16, %v1693_v14  ;;  %v1191_v23 = vadd.f32 %v1190_v21, %v1189_v18  ;;  %v1254_v24 = vpop.f32.mrb[3].mxu1 }
  0xfb   :  { %v1255_v25 = vadd.f32 %v1254_v24, %v1253_v20 }
  0xfc   :  { %v621_v26 = vadd.f32 %v1191_v23, %v1693_v14  ;;  %v1697_v27 = vadd.f32 %v1252_v19, %v618_v22 }
  0xfe   :  { %v1192_v28 = vpop.f32.mrb[4].mxu0  ;;  %v1699_v29 = vadd.f32 %v1255_v25, %v621_v26 }
  0xff   :  { %v1256_v30 = vpop.f32.mrb[4].mxu1  ;;  %v1193_v31 = vpop.f32.mrb[5].mxu0 }
 0x100   :  { %v1194_v32 = vadd.f32 %v1193_v31, %v1192_v28  ;;  %v1257_v33 = vpop.f32.mrb[5].mxu1  ;;  %v1195_v34 = vpop.f32.mrb[6].mxu0 }
 0x101   :  { %v1258_v35 = vadd.f32 %v1257_v33, %v1256_v30  ;;  %v1259_v36 = vpop.f32.mrb[6].mxu1  ;;  %v1196_v37 = vpop.f32.mrb[7].mxu0 }
 0x102   :  { %v626_v38 = vadd.f32 %v1194_v32, %v1693_v14  ;;  %v1197_v39 = vadd.f32 %v1196_v37, %v1195_v34  ;;  %v1260_v40 = vpop.f32.mrb[7].mxu1 }
 0x103   :  { %v1261_v41 = vadd.f32 %v1260_v40, %v1259_v36 }
 0x104   :  { %v629_v42 = vadd.f32 %v1197_v39, %v1693_v14  ;;  %v1703_v43 = vadd.f32 %v1258_v35, %v626_v38 }
 0x106   :  { %v1198_v44 = vpop.f32.mrb[8].mxu0  ;;  %v1705_v45 = vadd.f32 %v1261_v41, %v629_v42 }
 0x107   :  { %v1262_v46 = vpop.f32.mrb[8].mxu1  ;;  %v1199_v47 = vpop.f32.mrb[9].mxu0 }
 0x108   :  { %v1200_v48 = vadd.f32 %v1199_v47, %v1198_v44  ;;  %v1263_v49 = vpop.f32.mrb[9].mxu1  ;;  %v1201_v50 = vpop.f32.mrb[10].mxu0 }
 0x109   :  { %v1264_v51 = vadd.f32 %v1263_v49, %v1262_v46  ;;  %v1265_v52 = vpop.f32.mrb[10].mxu1  ;;  %v1202_v53 = vpop.f32.mrb[11].mxu0 }
 0x10a   :  { %v634_v54 = vadd.f32 %v1200_v48, %v1693_v14  ;;  %v1203_v55 = vadd.f32 %v1202_v53, %v1201_v50  ;;  %v1266_v56 = vpop.f32.mrb[11].mxu1 }
 0x10b   :  { %v1267_v57 = vadd.f32 %v1266_v56, %v1265_v52 }
 0x10c   :  { %v637_v58 = vadd.f32 %v1203_v55, %v1693_v14  ;;  %v1709_v59 = vadd.f32 %v1264_v51, %v634_v54 }
 0x10e   :  { %v1204_v60 = vpop.f32.mrb[12].mxu0  ;;  %v1711_v61 = vadd.f32 %v1267_v57, %v637_v58 }
 0x10f   :  { %v1268_v62 = vpop.f32.mrb[12].mxu1  ;;  %v1205_v63 = vpop.f32.mrb[13].mxu0 }
 0x110   :  { %v1206_v0 = vadd.f32 %v1205_v63, %v1204_v60  ;;  %v1269_v1 = vpop.f32.mrb[13].mxu1  ;;  %v1207_v2 = vpop.f32.mrb[14].mxu0 }
 0x111   :  { %v1270_v3 = vadd.f32 %v1269_v1, %v1268_v62  ;;  %v1271_v4 = vpop.f32.mrb[14].mxu1  ;;  %v1208_v5 = vpop.f32.mrb[15].mxu0 }
 0x112   :  { %v642_v6 = vadd.f32 %v1206_v0, %v1693_v14  ;;  %v1209_v7 = vadd.f32 %v1208_v5, %v1207_v2  ;;  %v1272_v8 = vpop.f32.mrb[15].mxu1 }
 0x113   :  { %v1273_v9 = vadd.f32 %v1272_v8, %v1271_v4 }
 0x114   :  { %v645_v10 = vadd.f32 %v1209_v7, %v1693_v14  ;;  %v1715_v11 = vadd.f32 %v1270_v3, %v642_v6 }
 0x116   :  { %v1210_v12 = vpop.f32.mrb[16].mxu0  ;;  %v1717_v13 = vadd.f32 %v1273_v9, %v645_v10 }
 0x117   :  { %v1274_v15 = vpop.f32.mrb[16].mxu1  ;;  %v1211_v16 = vpop.f32.mrb[17].mxu0 }
 0x118   :  { %v1212_v17 = vadd.f32 %v1211_v16, %v1210_v12  ;;  %v1275_v18 = vpop.f32.mrb[17].mxu1  ;;  %v1213_v19 = vpop.f32.mrb[18].mxu0 }
 0x119   :  { %v1276_v20 = vadd.f32 %v1275_v18, %v1274_v15  ;;  %v1277_v21 = vpop.f32.mrb[18].mxu1  ;;  %v1214_v22 = vpop.f32.mrb[19].mxu0 }
 0x11a   :  { %v650_v23 = vadd.f32 %v1212_v17, %v1693_v14  ;;  %v1215_v24 = vadd.f32 %v1214_v22, %v1213_v19  ;;  %v1278_v25 = vpop.f32.mrb[19].mxu1 }
 0x11b   :  { %v1279_v26 = vadd.f32 %v1278_v25, %v1277_v21 }
 0x11c   :  { %v653_v28 = vadd.f32 %v1215_v24, %v1693_v14  ;;  %v747_v30 = vadd.f32 %v1276_v20, %v650_v23 }
 0x11e   :  { %v1216_v31 = vpop.f32.mrb[20].mxu0  ;;  %v1721_v32 = vadd.f32 %v1279_v26, %v653_v28 }
 0x11f   :  { %v1280_v33 = vpop.f32.mrb[20].mxu1  ;;  %v1217_v34 = vpop.f32.mrb[21].mxu0 }
 0x120   :  { %v1218_v35 = vadd.f32 %v1217_v34, %v1216_v31  ;;  %v1281_v36 = vpop.f32.mrb[21].mxu1  ;;  %v1219_v37 = vpop.f32.mrb[22].mxu0 }
 0x121   :  { %v1282_v38 = vadd.f32 %v1281_v36, %v1280_v33  ;;  %v1283_v39 = vpop.f32.mrb[22].mxu1  ;;  %v1220_v40 = vpop.f32.mrb[23].mxu0 }
 0x122   :  { %v658_v41 = vadd.f32 %v1218_v35, %v1693_v14  ;;  %v1221_v42 = vadd.f32 %v1220_v40, %v1219_v37  ;;  %v1284_v44 = vpop.f32.mrb[23].mxu1 }
 0x123   :  { %v1285_v46 = vadd.f32 %v1284_v44, %v1283_v39 }
 0x124   :  { %v661_v47 = vadd.f32 %v1221_v42, %v1693_v14  ;;  %v755_v48 = vadd.f32 %v1282_v38, %v658_v41 }
 0x126   :  { %v1222_v49 = vpop.f32.mrb[24].mxu0  ;;  %v758_v50 = vadd.f32 %v1285_v46, %v661_v47 }
 0x127   :  { %v1286_v51 = vpop.f32.mrb[24].mxu1  ;;  %v1223_v52 = vpop.f32.mrb[25].mxu0 }
 0x128   :  { %v1224_v53 = vadd.f32 %v1223_v52, %v1222_v49  ;;  %v1287_v54 = vpop.f32.mrb[25].mxu1  ;;  %v1225_v55 = vpop.f32.mrb[26].mxu0 }
 0x129   :  { %v1288_v56 = vadd.f32 %v1287_v54, %v1286_v51  ;;  %v1289_v57 = vpop.f32.mrb[26].mxu1  ;;  %v1226_v58 = vpop.f32.mrb[27].mxu0 }
 0x12a   :  { %v666_v60 = vadd.f32 %v1224_v53, %v1693_v14  ;;  %v1227_v62 = vadd.f32 %v1226_v58, %v1225_v55  ;;  %v1290_v63 = vpop.f32.mrb[27].mxu1 }
 0x12b   :  { %v1291_v0 = vadd.f32 %v1290_v63, %v1289_v57 }
 0x12c   :  { %v669_v1 = vadd.f32 %v1227_v62, %v1693_v14  ;;  %v1727_v2 = vadd.f32 %v1288_v56, %v666_v60 }
 0x12e   :  { %v1228_v3 = vpop.f32.mrb[28].mxu0  ;;  %v1729_v4 = vadd.f32 %v1291_v0, %v669_v1 }
 0x12f   :  { %v1292_v5 = vpop.f32.mrb[28].mxu1  ;;  %v1229_v6 = vpop.f32.mrb[29].mxu0 }
 0x130   :  { %v1230_v7 = vadd.f32 %v1229_v6, %v1228_v3  ;;  %v1293_v8 = vpop.f32.mrb[29].mxu1  ;;  %v1231_v9 = vpop.f32.mrb[30].mxu0 }
 0x131   :  { %v1294_v10 = vadd.f32 %v1293_v8, %v1292_v5  ;;  %v1295_v12 = vpop.f32.mrb[30].mxu1  ;;  %v1232_v15 = vpop.f32.mrb[31].mxu0 }
 0x132   :  { %v674_v16 = vadd.f32 %v1230_v7, %v1693_v14  ;;  %v1233_v17 = vadd.f32 %v1232_v15, %v1231_v9  ;;  %v1296_v18 = vpop.f32.mrb[31].mxu1 }
 0x133   :  { %v1297_v19 = vadd.f32 %v1296_v18, %v1295_v12 }
 0x134   :  { %v677_v20 = vadd.f32 %v1233_v17, %v1693_v14  ;;  %v771_v21 = vadd.f32 %v1294_v10, %v674_v16 }
 0x136   :  { %v1320_v22 = vpop.f32.mrb[32].mxu0  ;;  %v1733_v23 = vadd.f32 %v1297_v19, %v677_v20 }
 0x137   :  { %v820_v24 = vadd.f32 %v1320_v22, %v1703_v43  ;;  %v1328_v25 = vpop.f32.mrb[32].mxu1  ;;  %v811_v26 = vpop.f32.mrb[33].mxu0 }
 0x138   :  { %v852_v28 = vadd.f32 %v1328_v25, %v755_v48  ;;  %v812_v31 = vadd.f32 %v811_v26, %v1697_v27  ;;  %v843_v33 = vpop.f32.mrb[33].mxu1  ;;  %v1321_v34 = vpop.f32.mrb[34].mxu0 }
 0x139   :  { %vm876_vm1 = vcmp.ge.f32.partialorder %v820_v24, 0.0  ;;  %v892_v35 = vmul.f32 0.01, %v820_v24  ;;  %v844_v36 = vadd.f32 %v843_v33, %v747_v30  ;;  %v823_v37 = vadd.f32 %v1321_v34, %v1705_v45  ;;  %v1329_v38 = vpop.f32.mrb[34].mxu1  ;;  %v814_v14 = vpop.f32.mrb[35].mxu0 }
 0x13a   :  { %vm884_vm2 = vcmp.ge.f32.partialorder %v852_v28, 0.0  ;;  %v900_v39 = vmul.f32 0.01, %v852_v28  ;;  %v890_v40 = vmul.f32 0.01, %v812_v31  ;;  %vm874_vm3 = vcmp.ge.f32.partialorder %v812_v31, 0.0 }
 0x13b   :  { %vm877_vm4 = vcmp.ge.f32.partialorder %v823_v37, 0.0  ;;  %v846_v43 = vpop.f32.mrb[35].mxu1  ;;  %v908_v41 = vsel %vm876_vm1, %v820_v24, %v892_v35  ;;  %vm882_vm5 = vcmp.ge.f32.partialorder %v844_v36, 0.0  ;;  %v893_v42 = vmul.f32 0.01, %v823_v37 }
 0x13c   :  { %v855_v44 = vadd.f32 %v1329_v38, %v758_v50  ;;  %v916_v27 = vsel %vm884_vm2, %v852_v28, %v900_v39  ;;  %v898_v46 = vmul.f32 0.01, %v844_v36  ;;  %v815_v47 = vadd.f32 %v814_v14, %v1699_v29 }
 0x13d   :  { %v847_v30 = vadd.f32 %v846_v43, %v1721_v32  ;;  %v906_v48 = vsel %vm874_vm3, %v812_v31, %v890_v40  ;;  %v909_v45 = vsel %vm877_vm4, %v823_v37, %v893_v42 }
 0x13e   :  { %vm885_vm6 = vcmp.ge.f32.partialorder %v855_v44, 0.0  ;;  %v901_v49 = vmul.f32 0.01, %v855_v44  ;;  %v1324_v51 = vpop.f32.mrb[36].mxu0  ;;  %v1131_v52 = vpack.c.bf16 %v909_v45, %v908_v41  ;;  %vm875_vm7 = vcmp.ge.f32.partialorder %v815_v47, 0.0 }
 0x13f   :  { %v891_v53 = vmul.f32 0.01, %v815_v47  ;;  %vm883_vm8 = vcmp.ge.f32.partialorder %v847_v30, 0.0  ;;  %v1332_v54 = vpop.f32.mrb[36].mxu1  ;;  %v827_v55 = vpop.f32.mrb[37].mxu0  ;;  %v836_v50 = vadd.f32 %v1324_v51, %v1715_v11  ;;  %v914_v5 = vsel %vm882_vm5, %v844_v36, %v898_v46 }
 0x140   :  { %v917_v56 = vsel %vm885_vm6, %v855_v44, %v901_v49  ;;  %v899_v57 = vmul.f32 0.01, %v847_v30  ;;  %v868_v58 = vadd.f32 %v1332_v54, %v771_v21  ;;  %v859_v60 = vpop.f32.mrb[37].mxu1  ;;  %v1325_v29 = vpop.f32.mrb[38].mxu0  ;;  %1163 = vst [vmem:[%s1777_s3 + $0x8] sm:$0xff] %v1131_v52   ;;  %v828_v63 = vadd.f32 %v827_v55, %v1709_v59 }
 0x141   :  { %v1151_v32 = vpack.c.bf16 %v917_v56, %v916_v27  ;;  %v907_v62 = vsel %vm875_vm7, %v815_v47, %v891_v53  ;;  %v860_v0 = vadd.f32 %v859_v60, %v1727_v2  ;;  %v1333_v1 = vpop.f32.mrb[38].mxu1  ;;  %v830_v3 = vpop.f32.mrb[39].mxu0  ;;  %v896_v7 = vmul.f32 0.01, %v836_v50 }
 0x142   :  { %v1126_v6 = vpack.c.bf16 %v907_v62, %v906_v48  ;;  %v915_v11 = vsel %vm883_vm8, %v847_v30, %v899_v57  ;;  %v862_v8 = vpop.f32.mrb[39].mxu1  ;;  %vm880_vm9 = vcmp.ge.f32.partialorder %v836_v50, 0.0  ;;  %vm888_vm10 = vcmp.ge.f32.partialorder %v868_v58, 0.0 }
 0x143   :  { %1167 = vst [vmem:[%s1777_s3 + $0x28] sm:$0xff] %v1151_v32   ;;  %v1146_v9 = vpack.c.bf16 %v915_v11, %v914_v5  ;;  %v904_v10 = vmul.f32 0.01, %v868_v58  ;;  %vm878_vm11 = vcmp.ge.f32.partialorder %v828_v63, 0.0  ;;  %v894_v59 = vmul.f32 0.01, %v828_v63 }
 0x144   :  { %1127 = vst [vmem:[%s1777_s3] sm:$0xff] %v1126_v6   ;;  %v902_v2 = vmul.f32 0.01, %v860_v0  ;;  %v839_v12 = vadd.f32 %v1325_v29, %v1717_v13  ;;  %v871_v15 = vadd.f32 %v1333_v1, %v1733_v23  ;;  %v831_v16 = vadd.f32 %v830_v3, %v1711_v61 }
 0x145   :  { %1166 = vst [vmem:[%s1777_s3 + $0x20] sm:$0xff] %v1146_v9   ;;  %v912_v17 = vsel %vm880_vm9, %v836_v50, %v896_v7  ;;  %v920_v18 = vsel %vm888_vm10, %v868_v58, %v904_v10  ;;  %vm886_vm12 = vcmp.ge.f32.partialorder %v860_v0, 0.0  ;;  %v863_v19 = vadd.f32 %v862_v8, %v1729_v4 }
 0x146   :  { %vm881_vm13 = vcmp.ge.f32.partialorder %v839_v12, 0.0  ;;  %v897_v20 = vmul.f32 0.01, %v839_v12  ;;  %vm889_vm14 = vcmp.ge.f32.partialorder %v871_v15, 0.0  ;;  %v905_v21 = vmul.f32 0.01, %v871_v15 }
 0x147   :  { %vm879_vm15 = vcmp.ge.f32.partialorder %v831_v16, 0.0  ;;  %v895_v22 = vmul.f32 0.01, %v831_v16  ;;  %vm887_vm0 = vcmp.ge.f32.partialorder %v863_v19, 0.0  ;;  %v903_v24 = vmul.f32 0.01, %v863_v19 }
 0x148   :  { %v910_v25 = vsel %vm878_vm11, %v828_v63, %v894_v59  ;;  %v918_v13 = vsel %vm886_vm12, %v860_v0, %v902_v2  ;;  %v913_v26 = vsel %vm881_vm13, %v839_v12, %v897_v20  ;;  %v921_v23 = vsel %vm889_vm14, %v871_v15, %v905_v21 }
 0x149   :  { %v1141_v28 = vpack.c.bf16 %v913_v26, %v912_v17  ;;  %v1161_v61 = vpack.c.bf16 %v921_v23, %v920_v18  ;;  %v911_v31 = vsel %vm879_vm15, %v831_v16, %v895_v22  ;;  %v919_v33 = vsel %vm887_vm0, %v863_v19, %v903_v24 }
 0x14a   :  { %v1136_v34 = vpack.c.bf16 %v911_v31, %v910_v25  ;;  %v1156_v35 = vpack.c.bf16 %v919_v33, %v918_v13 }
 0x14b   :  { %1165 = vst [vmem:[%s1777_s3 + $0x18] sm:$0xff] %v1141_v28   ;;  %1169 = vst [vmem:[%s1777_s3 + $0x38] sm:$0xff] %v1161_v61  }
 0x14c   :  { %1164 = vst [vmem:[%s1777_s3 + $0x10] sm:$0xff] %v1136_v34   ;;  %1168 = vst [vmem:[%s1777_s3 + $0x30] sm:$0xff] %v1156_v35  }

// kernel: vae_forward.16
= control target key start
LH: loop header
LB: loop body
LE: loop exit
PB: predicated region body
PF: predicated region fallthrough
CT: control target
= control target key end

     0   :  { %s2601_s12 = smov 0   ;;  %s2994_s0 = inlined_call_operand.vmem [shape: bf16[512,576], index: 0, kind: input, shape index: {}]   ;;  %s2995_s1 = inlined_call_operand.vmem [shape: bf16[576,128], index: 1, kind: input, shape index: {}]   ;;  %s2996_s2 = inlined_call_operand.vmem [shape: f32[1,128], index: 2, kind: input, shape index: {}]   ;;  %s2997_s3 = inlined_call_operand.vmem [shape: bf16[512,128], index: 3, kind: output, shape index: {}]  }
   0x1 LB: > { %s1813_s13 = sadd.s32 4294967295, %s2579_s12   ;;  %p1817_p0 = scmp.ge.s32.totalorder %s2579_s12, 1  ;;  %s2579_s12 = sphi %s2601_s12, %s13_s12  }
   0x2   : > { %p139_p1 = scmp.lt.s32.totalorder %s2579_s12, 3 }
   0x4   : > { %p140_p2 = pnand %p1817_p0, %p139_p1 }
   0x5   : > { %v2425_v0 = vld [vmem:[%s2995_s1 + $0x40] sm:$0xff] (!%p140_p2)   ;;  %s1818_s16 = sshll.u32 (!%p140_p2), %s1813_s13, 5  ;;  %v2427_v2 = vld [vmem:[%s2995_s1 + $0x48] sm:$0xff] (!%p140_p2)   ;;  %v2429_v4 = vld [vmem:[%s2995_s1 + $0x50] sm:$0xff] (!%p140_p2)   ;;  %vm969_vm0 = vcmask (!%p140_p2), 523264  }
   0x6   : > { %143 = sbr.rel (%p140_p2) target bundleno = 417 (0x1a1), region = 32  ;;  %v2426_v1 = vld [vmem:[%s2995_s1] sm:$0xff] (!%p140_p2)   ;;  %2116 = vmatprep.subr.bf16.mxu0 (!%p140_p2), %v2425_v0  ;;  %2400 = vmatprep.subr.bf16.mxu1 (!%p140_p2), %v2425_v0  ;;  %p165_p3 = scmp.lt.s32.totalorder (!%p140_p2), %s1818_s16, 63  ;;  %v2428_v3 = vld [vmem:[%s2995_s1 + $0x8] sm:$0xff] (!%p140_p2)   ;;  %v2430_v5 = vld [vmem:[%s2995_s1 + $0x10] sm:$0xff] (!%p140_p2)  }
   0x7   : > { %2117 = vmatpush3.bf16.msra.mxu0 (!%p140_p2), %v2426_v1  ;;  %2408 = vmatpush3.bf16.msra.mxu1 (!%p140_p2), %v2426_v1  ;;  %v2431_v6 = vld [vmem:[%s2995_s1 + $0x58] sm:$0xff] (!%p140_p2)   ;;  %v2433_v8 = vld [vmem:[%s2995_s1 + $0x60] sm:$0xff] (!%p140_p2)   ;;  %v2435_v10 = vld [vmem:[%s2995_s1 + $0x68] sm:$0xff] (!%p140_p2)  }
   0x8   : > { %2118 = vmatprep.subr.bf16.mxu0 (!%p140_p2), %v2427_v2  ;;  %2401 = vmatprep.subr.bf16.mxu1 (!%p140_p2), %v2427_v2  ;;  %v2432_v7 = vld [vmem:[%s2995_s1 + $0x18] sm:$0xff] (!%p140_p2)   ;;  %v2434_v9 = vld [vmem:[%s2995_s1 + $0x20] sm:$0xff] (!%p140_p2)   ;;  %v2436_v13 = vld [vmem:[%s2995_s1 + $0x28] sm:$0xff] (!%p140_p2)  }
   0x9   : > { %v2437_v14 = vld [vmem:[%s2995_s1 + $0x70] sm:$0xff] (!%p140_p2)   ;;  %v2439_v16 = vld [vmem:[%s2995_s1 + $0x78] sm:$0xff] (!%p140_p2)   ;;  %v2447_v18 = vld [vmem:[%s2995_s1 + $0xc0] sm:$0xff] (!%p140_p2)  }
   0xa   : > { %v2438_v15 = vld [vmem:[%s2995_s1 + $0x30] sm:$0xff] (!%p140_p2)   ;;  %v2440_v17 = vld [vmem:[%s2995_s1 + $0x38] sm:$0xff] (!%p140_p2)   ;;  %v2450_v19 = vld [vmem:[%s2995_s1 + $0x100] sm:$0xff] (!%p140_p2)  }
   0xb   : > { %2119 = vmatpush3.bf16.msra.mxu0 (!%p140_p2), %v2428_v3  ;;  %2409 = vmatpush3.bf16.msra.mxu1 (!%p140_p2), %v2428_v3  ;;  %v2448_v22 = vld [vmem:[%s2995_s1 + $0x80] sm:$0xff] (!%p140_p2)   ;;  %v2449_v23 = vld [vmem:[%s2995_s1 + $0xc8] sm:$0xff] (!%p140_p2)   ;;  %v2458_v28 = vld [vmem:[%s2995_s1 + $0xd0] sm:$0xff] (!%p140_p2)  }
   0xc   : > { %2120 = vmatprep.subr.bf16.mxu0 (!%p140_p2), %v2429_v4  ;;  %2402 = vmatprep.subr.bf16.mxu1 (!%p140_p2), %v2429_v4  ;;  %v2451_v26 = vld [vmem:[%s2995_s1 + $0x88] sm:$0xff] (!%p140_p2)   ;;  %v2459_v30 = vld [vmem:[%s2995_s1 + $0x90] sm:$0xff] (!%p140_p2)   ;;  %v2460_v31 = vld [vmem:[%s2995_s1 + $0xd8] sm:$0xff] (!%p140_p2)  }
   0xd   : > { %s2999_s16 = smov (!%p165_p3, %s1818_s16), 63  ;;  %v2461_v34 = vld [vmem:[%s2995_s1 + $0x98] sm:$0xff]   ;;  %v2481_v35 = vld [vmem:[%s2995_s1 + $0x108] sm:$0xff]   ;;  %v2468_v37 = vld [vmem:[%s2995_s1 + $0xe0] sm:$0xff]  }
   0xe   : > { %s2416_s29 = smul.u32 20, %s2999_s16  ;;  %v2469_v39 = vld [vmem:[%s2995_s1 + $0xa0] sm:$0xff]   ;;  %v2470_v40 = vld [vmem:[%s2995_s1 + $0xe8] sm:$0xff]   ;;  %v2478_v46 = vld [vmem:[%s2995_s1 + $0xf0] sm:$0xff]   ;;  %s1821_s19 = sshll.u32 %s2999_s16, 2 }
   0xf   : > { %2121 = vmatpush3.bf16.msra.mxu0 %v2430_v5  ;;  %2410 = vmatpush3.bf16.msra.mxu1 %v2430_v5  ;;  %v2471_v43 = vld [vmem:[%s2995_s1 + $0xa8] sm:$0xff]   ;;  %v2501_v47 = vld [vmem:[%s2995_s1 + $0x110] sm:$0xff]   ;;  %v2480_v49 = vld [vmem:[%s2995_s1 + $0xf8] sm:$0xff]   ;;  %s2919_s22 = scalar_lea.vmem %s2997_s3, %s1821_s19 }
  0x10   : > { %2122 = vmatprep.subr.bf16.mxu0 %v2431_v6  ;;  %2403 = vmatprep.subr.bf16.mxu1 %v2431_v6  ;;  %s2642_s9 = scalar_lea.vmem %s2994_s0, %s2416_s29  ;;  %v2479_v48 = vld [vmem:[%s2995_s1 + $0xb0] sm:$0xff]   ;;  %v2482_v52 = vld [vmem:[%s2995_s1 + $0xb8] sm:$0xff]  }
  0x11   : > { %v2443_v11 = vld [vmem:[%s2642_s9 + $0x4] ss:$20 sps:$4 sm:$0xff]   ;;  %v2441_v20 = vld [vmem:[%s2642_s9] ss:$20 sps:$4 sm:$0xff]   ;;  %v2456_v27 = vld [vmem:[%s2642_s9 + $0x28] ss:$20 sps:$4 sm:$0xff]  }
  0x12   : > { %v2446_v12 = vld [vmem:[%s2642_s9 + $0x1e4] ss:$20 sps:$4 sm:$0xff]   ;;  %1050 = vmatprep.mubr.bf16.mxu0 %v2443_v11  ;;  %v2444_v21 = vld [vmem:[%s2642_s9 + $0x1e0] ss:$20 sps:$4 sm:$0xff]   ;;  %v2457_v29 = vld [vmem:[%s2642_s9 + $0x208] ss:$20 sps:$4 sm:$0xff]  }
  0x13   : > { %2123 = vmatpush3.bf16.msra.mxu0 %v2432_v7  ;;  %2411 = vmatpush3.bf16.msra.mxu1 %v2432_v7  ;;  %v2452_v24 = vld [vmem:[%s2642_s9 + $0x2c] ss:$20 sps:$4 sm:$0xff]   ;;  %v2462_v32 = vld [vmem:[%s2642_s9 + $0x54] ss:$20 sps:$4 sm:$0xff]   ;;  %v2466_v36 = vld [vmem:[%s2642_s9 + $0x50] ss:$20 sps:$4 sm:$0xff]  }
  0x14   : > { %2124 = vmatprep.subr.bf16.mxu0 %v2433_v8  ;;  %2404 = vmatprep.subr.bf16.mxu1 %v2433_v8  ;;  %v2454_v25 = vld [vmem:[%s2642_s9 + $0x20c] ss:$20 sps:$4 sm:$0xff]   ;;  %v2464_v33 = vld [vmem:[%s2642_s9 + $0x234] ss:$20 sps:$4 sm:$0xff]   ;;  %v2467_v38 = vld [vmem:[%s2642_s9 + $0x230] ss:$20 sps:$4 sm:$0xff]  }
  0x15   : > { %1146 = vmatprep.mubr.bf16.mxu1 %v2446_v12  ;;  %v2472_v41 = vld [vmem:[%s2642_s9 + $0x7c] ss:$20 sps:$4 sm:$0xff]   ;;  %v2476_v44 = vld [vmem:[%s2642_s9 + $0x78] ss:$20 sps:$4 sm:$0xff]   ;;  %v2488_v54 = vld [vmem:[%s2642_s9 + $0xa0] ss:$20 sps:$4 sm:$0xff]  }
  0x16   : > { %v2474_v42 = vld [vmem:[%s2642_s9 + $0x25c] ss:$20 sps:$4 sm:$0xff]   ;;  %v2477_v45 = vld [vmem:[%s2642_s9 + $0x258] ss:$20 sps:$4 sm:$0xff]   ;;  %v2491_v57 = vld [vmem:[%s2642_s9 + $0x34] ss:$20 sps:$4 sm:$0xff]  }
  0x17   : > { %2125 = vmatpush3.bf16.msra.mxu0 %v2434_v9  ;;  %2412 = vmatpush3.bf16.msra.mxu1 %v2434_v9  ;;  %v2483_v50 = vld [vmem:[%s2642_s9 + $0xa4] ss:$20 sps:$4 sm:$0xff]   ;;  %v2487_v51 = vld [vmem:[%s2642_s9 + $0xc] ss:$20 sps:$4 sm:$0xff]   ;;  %v2485_v53 = vld [vmem:[%s2642_s9 + $0x8] ss:$20 sps:$4 sm:$0xff]  }
  0x18   : > { %2126 = vmatprep.subr.bf16.mxu0 %v2435_v10  ;;  %2405 = vmatprep.subr.bf16.mxu1 %v2435_v10  ;;  %v2489_v55 = vld [vmem:[%s2642_s9 + $0xcc] ss:$20 sps:$4 sm:$0xff]   ;;  %v2520_v56 = vld [vmem:[%s2995_s1 + $0x118] sm:$0xff]   ;;  %v2494_v59 = vld [vmem:[%s2642_s9 + $0x30] ss:$20 sps:$4 sm:$0xff]  }
  0x19   : > { %v2493_v58 = vld [vmem:[%s2642_s9 + $0xc8] ss:$20 sps:$4 sm:$0xff]   ;;  %v2499_v62 = vld [vmem:[%s2642_s9 + $0xf0] ss:$20 sps:$4 sm:$0xff]   ;;  %v2500_v63 = vld [vmem:[%s2642_s9 + $0x58] ss:$20 sps:$4 sm:$0xff]  }
  0x1a   : > { %v2495_v60 = vld [vmem:[%s2642_s9 + $0xf4] ss:$20 sps:$4 sm:$0xff]   ;;  %v2497_v61 = vld [vmem:[%s2642_s9 + $0x5c] ss:$20 sps:$4 sm:$0xff]   ;;  %v2504_v1 = vld [vmem:[%s2642_s9 + $0x84] ss:$20 sps:$4 sm:$0xff]  }
  0x1b   : > { %2127 = vmatpush3.bf16.msra.mxu0 %v2436_v13  ;;  %2413 = vmatpush3.bf16.msra.mxu1 %v2436_v13  ;;  %v2502_v0 = vld [vmem:[%s2642_s9 + $0x11c] ss:$20 sps:$4 sm:$0xff]   ;;  %v2506_v2 = vld [vmem:[%s2642_s9 + $0x118] ss:$20 sps:$4 sm:$0xff]   ;;  %v2507_v3 = vld [vmem:[%s2642_s9 + $0x80] ss:$20 sps:$4 sm:$0xff]  }
  0x1c   : > { %2128 = vmatprep.subr.bf16.mxu0 %v2437_v14  ;;  %2406 = vmatprep.subr.bf16.mxu1 %v2437_v14  ;;  %v2508_v4 = vld [vmem:[%s2642_s9 + $0x144] ss:$20 sps:$4 sm:$0xff]   ;;  %v2510_v5 = vld [vmem:[%s2642_s9 + $0xac] ss:$20 sps:$4 sm:$0xff]   ;;  %v2513_v7 = vld [vmem:[%s2642_s9 + $0xa8] ss:$20 sps:$4 sm:$0xff]  }
  0x1d   : > { %v2512_v6 = vld [vmem:[%s2642_s9 + $0x140] ss:$20 sps:$4 sm:$0xff]   ;;  %v2518_v10 = vld [vmem:[%s2642_s9 + $0x168] ss:$20 sps:$4 sm:$0xff]   ;;  %v2519_v11 = vld [vmem:[%s2642_s9 + $0xd0] ss:$20 sps:$4 sm:$0xff]  }
  0x1e   : > { %v2514_v8 = vld [vmem:[%s2642_s9 + $0x16c] ss:$20 sps:$4 sm:$0xff]   ;;  %v2516_v9 = vld [vmem:[%s2642_s9 + $0xd4] ss:$20 sps:$4 sm:$0xff]   ;;  %v2523_v13 = vld [vmem:[%s2642_s9 + $0xfc] ss:$20 sps:$4 sm:$0xff]  }
  0x1f   : > { %2129 = vmatpush3.bf16.msra.mxu0 %v2438_v15  ;;  %2414 = vmatpush3.bf16.msra.mxu1 %v2438_v15  ;;  %v2521_v12 = vld [vmem:[%s2642_s9 + $0x194] ss:$20 sps:$4 sm:$0xff]   ;;  %v2525_v14 = vld [vmem:[%s2642_s9 + $0x190] ss:$20 sps:$4 sm:$0xff]   ;;  %v2526_v15 = vld [vmem:[%s2642_s9 + $0xf8] ss:$20 sps:$4 sm:$0xff]  }
  0x20   : > { %2130 = vmatprep.subr.bf16.mxu0 %v2439_v16  ;;  %2407 = vmatprep.subr.bf16.mxu1 %v2439_v16  ;;  %v2527_v16 = vld [vmem:[%s2642_s9 + $0x1bc] ss:$20 sps:$4 sm:$0xff]  }
  0x23   : > { %2131 = vmatpush3.bf16.msra.mxu0 %v2440_v17  ;;  %2415 = vmatpush3.bf16.msra.mxu1 %v2440_v17  ;;  %v2529_v17 = vld [vmem:[%s2642_s9 + $0x124] ss:$20 sps:$4 sm:$0xff]  }
  0x24   : > { %2228 = vmatprep.subr.bf16.mxu1 %v2447_v18  ;;  %2360 = vmatprep.subr.bf16.mxu0 %v2450_v19  ;;  %v2531_v18 = vld [vmem:[%s2642_s9 + $0x1b8] ss:$20 sps:$4 sm:$0xff]  }
  0x26   : > { %1051 = vmatmul.mubr.bf16.vlgmr.msra.gmra.mrb[0].mxu0 %v2441_v20  ;;  %1147 = vmatmul.mubr.bf16.vlgmr.msra.gmra.mrb[0].mxu1 %v2444_v21  ;;  %v2533_v20 = vld [vmem:[%s2642_s9 + $0x14c] ss:$20 sps:$4 sm:$0xff]   ;;  %v2535_v21 = vld [vmem:[%s2642_s9 + $0x10] ss:$20 sps:$4 sm:$0xff]  }
  0x27   : > { %2229 = vmatpush3.bf16.msra.mxu1 %v2448_v22  ;;  %2361 = vmatpush3.bf16.msra.mxu0 %v2450_v19  ;;  %v2532_v19 = vld [vmem:[%s2642_s9 + $0x120] ss:$20 sps:$4 sm:$0xff]   ;;  %v2536_v22 = vld [vmem:[%s2642_s9 + $0x148] ss:$20 sps:$4 sm:$0xff]  }
  0x28   : > { %2230 = vmatprep.subr.bf16.mxu1 %v2449_v23  ;;  %1058 = vmatprep.mubr.bf16.mxu0 %v2452_v24  ;;  %v2537_v23 = vld [vmem:[%s2642_s9 + $0x38] ss:$20 sps:$4 sm:$0xff]   ;;  %v2538_v24 = vld [vmem:[%s2642_s9 + $0x174] ss:$20 sps:$4 sm:$0xff]  }
  0x29   : > { %1154 = vmatprep.mubr.bf16.mxu1 %v2454_v25  ;;  %2362 = vmatprep.subr.bf16.mxu0 %v2481_v35  ;;  %v2540_v25 = vld [vmem:[%s2642_s9 + $0x60] ss:$20 sps:$4 sm:$0xff]  }
  0x2b   : > { %2231 = vmatpush3.bf16.msra.mxu1 %v2451_v26  ;;  %2363 = vmatpush3.bf16.msra.mxu0 %v2481_v35  ;;  %v2541_v26 = vld [vmem:[%s2642_s9 + $0x170] ss:$20 sps:$4 sm:$0xff]   ;;  %v2552_v35 = vld [vmem:[%s2642_s9 + $0x128] ss:$20 sps:$4 sm:$0xff]  }
  0x2c   : > { %2232 = vmatprep.subr.bf16.mxu1 %v2458_v28  ;;  %2364 = vmatprep.subr.bf16.mxu0 %v2501_v47  ;;  %v2543_v28 = vld [vmem:[%s2642_s9 + $0x19c] ss:$20 sps:$4 sm:$0xff]  }
  0x2e   : > { %1059 = vmatmul.mubr.bf16.gmra.mrb[4].mxu0 %v2456_v27  ;;  %1155 = vmatmul.mubr.bf16.gmra.mrb[4].mxu1 %v2457_v29  ;;  %v2542_v27 = vld [vmem:[%s2642_s9 + $0x88] ss:$20 sps:$4 sm:$0xff]   ;;  %v2545_v29 = vld [vmem:[%s2642_s9 + $0xb0] ss:$20 sps:$4 sm:$0xff]  }
  0x2f   : > { %2233 = vmatpush3.bf16.msra.mxu1 %v2459_v30  ;;  %1066 = vmatprep.mubr.bf16.mxu0 %v2462_v32  ;;  %v2546_v30 = vld [vmem:[%s2642_s9 + $0x198] ss:$20 sps:$4 sm:$0xff]  }
  0x30   : > { %2234 = vmatprep.subr.bf16.mxu1 %v2460_v31  ;;  %1162 = vmatprep.mubr.bf16.mxu1 %v2464_v33  ;;  %v2547_v31 = vld [vmem:[%s2642_s9 + $0xd8] ss:$20 sps:$4 sm:$0xff]   ;;  %v2550_v33 = vld [vmem:[%s2642_s9 + $0x100] ss:$20 sps:$4 sm:$0xff]  }
  0x31   : > { %2365 = vmatpush3.bf16.msra.mxu0 %v2501_v47  ;;  %v2548_v32 = vld [vmem:[%s2642_s9 + $0x1c4] ss:$20 sps:$4 sm:$0xff]  }
  0x32   : > { %2366 = vmatprep.subr.bf16.mxu0 %v2520_v56  ;;  %v2567_v47 = vld [vmem:[%s2642_s9 + $0x218] ss:$20 sps:$4 sm:$0xff]  }
  0x33   : > { %2235 = vmatpush3.bf16.msra.mxu1 %v2461_v34  ;;  %v2551_v34 = vld [vmem:[%s2642_s9 + $0x1c0] ss:$20 sps:$4 sm:$0xff]  }
  0x34   : > { %2236 = vmatprep.subr.bf16.mxu1 %v2468_v37  ;;  %v2555_v37 = vld [vmem:[%s2642_s9 + $0x150] ss:$20 sps:$4 sm:$0xff]  }
  0x35   : > { %2367 = vmatpush3.bf16.msra.mxu0 %v2520_v56 }
  0x36   : > { %1067 = vmatmul.mubr.bf16.gmra.mrb[8].mxu0 %v2466_v36  ;;  %1163 = vmatmul.mubr.bf16.gmra.mrb[8].mxu1 %v2467_v38  ;;  %v2553_v36 = vld [vmem:[%s2642_s9 + $0x1ec] ss:$20 sps:$4 sm:$0xff]   ;;  %v2556_v38 = vld [vmem:[%s2642_s9 + $0x1e8] ss:$20 sps:$4 sm:$0xff]  }
  0x37   : > { %2237 = vmatpush3.bf16.msra.mxu1 %v2469_v39  ;;  %1074 = vmatprep.mubr.bf16.mxu0 %v2472_v41  ;;  %v2557_v39 = vld [vmem:[%s2642_s9 + $0x178] ss:$20 sps:$4 sm:$0xff]   ;;  %v2560_v41 = vld [vmem:[%s2642_s9 + $0x1a0] ss:$20 sps:$4 sm:$0xff]  }
  0x38   : > { %2238 = vmatprep.subr.bf16.mxu1 %v2470_v40  ;;  %1170 = vmatprep.mubr.bf16.mxu1 %v2474_v42  ;;  %v2558_v40 = vld [vmem:[%s2642_s9 + $0x214] ss:$20 sps:$4 sm:$0xff]   ;;  %v2561_v42 = vld [vmem:[%s2642_s9 + $0x210] ss:$20 sps:$4 sm:$0xff]  }
  0x3b   : > { %2239 = vmatpush3.bf16.msra.mxu1 %v2471_v43  ;;  %v2562_v43 = vld [vmem:[%s2642_s9 + $0x1c8] ss:$20 sps:$4 sm:$0xff]  }
  0x3c   : > { %2240 = vmatprep.subr.bf16.mxu1 %v2478_v46  ;;  %v2566_v46 = vld [vmem:[%s2642_s9 + $0x238] ss:$20 sps:$4 sm:$0xff]  }
  0x3e   : > { %1075 = vmatmul.mubr.bf16.gmra.mrb[12].mxu0 %v2476_v44  ;;  %1171 = vmatmul.mubr.bf16.gmra.mrb[12].mxu1 %v2477_v45  ;;  %v2563_v44 = vld [vmem:[%s2642_s9 + $0x23c] ss:$20 sps:$4 sm:$0xff]  }
  0x3f   : > { %2241 = vmatpush3.bf16.msra.mxu1 %v2479_v48  ;;  %1082 = vmatprep.mubr.bf16.mxu0 %v2483_v50  ;;  %v2565_v45 = vld [vmem:[%s2642_s9 + $0x1f0] ss:$20 sps:$4 sm:$0xff]   ;;  %v2571_v50 = vld [vmem:[%s2642_s9 + $0x260] ss:$20 sps:$4 sm:$0xff]  }
  0x40   : > { %2242 = vmatprep.subr.bf16.mxu1 %v2480_v49  ;;  %1211 = vmatprep.mubr.bf16.mxu1 %v2487_v51  ;;  %v2568_v48 = vld [vmem:[%s2642_s9 + $0x264] ss:$20 sps:$4 sm:$0xff]   ;;  %v2570_v49 = vld [vmem:[%s2642_s9 + $0x240] ss:$20 sps:$4 sm:$0xff]   ;;  %v2572_v51 = vld [vmem:[%s2642_s9 + $0x268] ss:$20 sps:$4 sm:$0xff]  }
  0x43   : > { %2243 = vmatpush3.bf16.msra.mxu1 %v2482_v52 }
  0x46   : > { %1083 = vmatmul.mubr.bf16.gmra.mrb[16].mxu0 %v2488_v54  ;;  %1212 = vmatmul.mubr.bf16.vlgmr.msra.gmra.mrb[16].mxu1 %v2485_v53 }
  0x47   : > { %1090 = vmatprep.mubr.bf16.mxu0 %v2489_v55  ;;  %1219 = vmatprep.mubr.bf16.mxu1 %v2491_v57 }
  0x4e   : > { %1091 = vmatmul.mubr.bf16.gmra.mrb[20].mxu0 %v2493_v58  ;;  %1220 = vmatmul.mubr.bf16.gmra.mrb[20].mxu1 %v2494_v59 }
  0x4f   : > { %1098 = vmatprep.mubr.bf16.mxu0 %v2495_v60  ;;  %1227 = vmatprep.mubr.bf16.mxu1 %v2497_v61 }
  0x56   : > { %1099 = vmatmul.mubr.bf16.gmra.mrb[24].mxu0 %v2499_v62  ;;  %1228 = vmatmul.mubr.bf16.gmra.mrb[24].mxu1 %v2500_v63 }
  0x57   : > { %1106 = vmatprep.mubr.bf16.mxu0 %v2502_v0  ;;  %1235 = vmatprep.mubr.bf16.mxu1 %v2504_v1 }
  0x5e   : > { %1107 = vmatmul.mubr.bf16.gmra.mrb[28].mxu0 %v2506_v2  ;;  %1236 = vmatmul.mubr.bf16.gmra.mrb[28].mxu1 %v2507_v3 }
  0x5f   : > { %1114 = vmatprep.mubr.bf16.mxu0 %v2508_v4  ;;  %1243 = vmatprep.mubr.bf16.mxu1 %v2510_v5 }
  0x66   : > { %1115 = vmatmul.mubr.bf16.gmra.mrb[32].mxu0 %v2512_v6  ;;  %1244 = vmatmul.mubr.bf16.gmra.mrb[32].mxu1 %v2513_v7 }
  0x67   : > { %1122 = vmatprep.mubr.bf16.mxu0 %v2514_v8  ;;  %1251 = vmatprep.mubr.bf16.mxu1 %v2516_v9 }
  0x6e   : > { %1123 = vmatmul.mubr.bf16.gmra.mrb[36].mxu0 %v2518_v10  ;;  %1252 = vmatmul.mubr.bf16.gmra.mrb[36].mxu1 %v2519_v11 }
  0x6f   : > { %1130 = vmatprep.mubr.bf16.mxu0 %v2521_v12  ;;  %1259 = vmatprep.mubr.bf16.mxu1 %v2523_v13 }
  0x76   : > { %1131 = vmatmul.mubr.bf16.gmra.mrb[40].mxu0 %v2525_v14  ;;  %1260 = vmatmul.mubr.bf16.gmra.mrb[40].mxu1 %v2526_v15 }
  0x77   : > { %1138 = vmatprep.mubr.bf16.mxu0 %v2527_v16  ;;  %1267 = vmatprep.mubr.bf16.mxu1 %v2529_v17 }
  0x7e   : > { %1139 = vmatmul.mubr.bf16.gmra.mrb[44].mxu0 %v2531_v18  ;;  %1268 = vmatmul.mubr.bf16.gmra.mrb[44].mxu1 %v2532_v19 }
  0x7f   : > { %1275 = vmatprep.mubr.bf16.mxu1 %v2533_v20  ;;  %2368 = vmatprep.mubr.msk.bf16.mxu0 %vm969_vm0, %v2535_v21 }
  0x86   : > { %1276 = vmatmul.mubr.bf16.gmra.mrb[48].mxu1 %v2536_v22  ;;  %2369 = vmatmul.mubr.msk.bf16.vlgmr.msra.gmra.mrb[48].mxu0 %vm969_vm0, %v2537_v23 }
  0x87   : > { %1283 = vmatprep.mubr.bf16.mxu1 %v2538_v24  ;;  %2372 = vmatprep.mubr.msk.bf16.mxu0 %vm969_vm0, %v2540_v25 }
  0x8e   : > { %1284 = vmatmul.mubr.bf16.gmra.mrb[52].mxu1 %v2541_v26  ;;  %2373 = vmatmul.mubr.msk.bf16.gmra.mrb[52].mxu0 %vm969_vm0, %v2542_v27 }
  0x8f   : > { %1291 = vmatprep.mubr.bf16.mxu1 %v2543_v28  ;;  %2376 = vmatprep.mubr.msk.bf16.mxu0 %vm969_vm0, %v2545_v29 }
  0x96   : > { %1292 = vmatmul.mubr.bf16.gmra.mrb[56].mxu1 %v2546_v30  ;;  %2377 = vmatmul.mubr.msk.bf16.gmra.mrb[56].mxu0 %vm969_vm0, %v2547_v31 }
  0x97   : > { %1299 = vmatprep.mubr.bf16.mxu1 %v2548_v32  ;;  %2380 = vmatprep.mubr.msk.bf16.mxu0 %vm969_vm0, %v2550_v33 }
  0x9e   : > { %1300 = vmatmul.mubr.bf16.gmra.mrb[60].mxu1 %v2551_v34  ;;  %2381 = vmatmul.mubr.msk.bf16.gmra.mrb[60].mxu0 %vm969_vm0, %v2552_v35 }
  0x9f   : > { %1307 = vmatprep.mubr.bf16.mxu1 %v2553_v36  ;;  %2384 = vmatprep.mubr.msk.bf16.mxu0 %vm969_vm0, %v2555_v37 }
  0xa6   : > { %1308 = vmatmul.mubr.bf16.gmra.mrb[64].mxu1 %v2556_v38  ;;  %2385 = vmatmul.mubr.msk.bf16.gmra.mrb[64].mxu0 %vm969_vm0, %v2557_v39  ;;  %v2840_v38 = vld [vmem:[%s2996_s2] ss:$0 sm:$0xff] }
  0xa7   : > { %1315 = vmatprep.mubr.bf16.mxu1 %v2558_v40  ;;  %2388 = vmatprep.mubr.msk.bf16.mxu0 %vm969_vm0, %v2560_v41 }
  0xae   : > { %1316 = vmatmul.mubr.bf16.gmra.mrb[68].mxu1 %v2561_v42  ;;  %2389 = vmatmul.mubr.msk.bf16.gmra.mrb[68].mxu0 %vm969_vm0, %v2562_v43 }
  0xaf   : > { %1323 = vmatprep.mubr.bf16.mxu1 %v2563_v44  ;;  %2392 = vmatprep.mubr.msk.bf16.mxu0 %vm969_vm0, %v2565_v45 }
  0xb6   : > { %1324 = vmatmul.mubr.bf16.gmra.mrb[72].mxu1 %v2566_v46  ;;  %2393 = vmatmul.mubr.msk.bf16.gmra.mrb[72].mxu0 %vm969_vm0, %v2567_v47 }
  0xb7   : > { %1331 = vmatprep.mubr.bf16.mxu1 %v2568_v48  ;;  %2396 = vmatprep.mubr.msk.bf16.mxu0 %vm969_vm0, %v2570_v49 }
  0xbe   : > { %1332 = vmatmul.mubr.bf16.gmra.mrb[76].mxu1 %v2571_v50  ;;  %2397 = vmatmul.mubr.msk.bf16.gmra.mrb[76].mxu0 %vm969_vm0, %v2572_v51 }
  0xf9   : > { %v2204_v52 = vpop.f32.mrb[0].mxu1  ;;  %v2132_v53 = vpop.f32.mrb[0].mxu0 }
  0xfa   : > { %v2205_v54 = vpop.f32.mrb[1].mxu1  ;;  %v2133_v55 = vpop.f32.mrb[1].mxu0 }
  0xfb   : > { %v2821_v56 = vadd.f32 %v2205_v54, %v2204_v52  ;;  %v2207_v57 = vpop.f32.mrb[2].mxu1  ;;  %v2134_v58 = vadd.f32 %v2133_v55, %v2132_v53  ;;  %v2135_v59 = vpop.f32.mrb[2].mxu0 }
  0xfc   : > { %v2208_v60 = vpop.f32.mrb[3].mxu1  ;;  %v2136_v61 = vpop.f32.mrb[3].mxu0 }
  0xfd   : > { %v2823_v62 = vadd.f32 %v2208_v60, %v2207_v57  ;;  %v2137_v63 = vadd.f32 %v2136_v61, %v2135_v59  ;;  %v1053_v41 = vadd.f32 %v2134_v58, %v2840_v38 }
  0xff   : > { %v1056_v48 = vadd.f32 %v2137_v63, %v2840_v38 }
 0x101   : > { %v2210_v0 = vpop.f32.mrb[4].mxu1  ;;  %v2138_v1 = vpop.f32.mrb[4].mxu0 }
 0x102   : > { %v2211_v2 = vpop.f32.mrb[5].mxu1  ;;  %v2139_v3 = vpop.f32.mrb[5].mxu0 }
 0x103   : > { %v2825_v4 = vadd.f32 %v2211_v2, %v2210_v0  ;;  %v2213_v5 = vpop.f32.mrb[6].mxu1  ;;  %v2140_v6 = vadd.f32 %v2139_v3, %v2138_v1  ;;  %v2141_v7 = vpop.f32.mrb[6].mxu0 }
 0x104   : > { %v2214_v8 = vpop.f32.mrb[7].mxu1  ;;  %v2142_v9 = vpop.f32.mrb[7].mxu0 }
 0x105   : > { %v2827_v10 = vadd.f32 %v2214_v8, %v2213_v5  ;;  %v2143_v11 = vadd.f32 %v2142_v9, %v2141_v7  ;;  %v1061_v58 = vadd.f32 %v2140_v6, %v2840_v38 }
 0x107   : > { %v1064_v63 = vadd.f32 %v2143_v11, %v2840_v38 }
 0x109   : > { %v2216_v12 = vpop.f32.mrb[8].mxu1  ;;  %v2144_v13 = vpop.f32.mrb[8].mxu0 }
 0x10a   : > { %v2217_v14 = vpop.f32.mrb[9].mxu1  ;;  %v2145_v15 = vpop.f32.mrb[9].mxu0 }
 0x10b   : > { %v2829_v16 = vadd.f32 %v2217_v14, %v2216_v12  ;;  %v2219_v17 = vpop.f32.mrb[10].mxu1  ;;  %v2146_v18 = vadd.f32 %v2145_v15, %v2144_v13  ;;  %v2147_v19 = vpop.f32.mrb[10].mxu0 }
 0x10c   : > { %v2220_v20 = vpop.f32.mrb[11].mxu1  ;;  %v2148_v21 = vpop.f32.mrb[11].mxu0 }
 0x10d   : > { %v2831_v22 = vadd.f32 %v2220_v20, %v2219_v17  ;;  %v2149_v23 = vadd.f32 %v2148_v21, %v2147_v19  ;;  %v1069_v6 = vadd.f32 %v2146_v18, %v2840_v38 }
 0x10f   : > { %v1072_v11 = vadd.f32 %v2149_v23, %v2840_v38 }
 0x111   : > { %v2222_v24 = vpop.f32.mrb[12].mxu1  ;;  %v2150_v25 = vpop.f32.mrb[12].mxu0 }
 0x112   : > { %v2223_v26 = vpop.f32.mrb[13].mxu1  ;;  %v2151_v27 = vpop.f32.mrb[13].mxu0 }
 0x113   : > { %v2833_v28 = vadd.f32 %v2223_v26, %v2222_v24  ;;  %v2225_v29 = vpop.f32.mrb[14].mxu1  ;;  %v2152_v30 = vadd.f32 %v2151_v27, %v2150_v25  ;;  %v2153_v31 = vpop.f32.mrb[14].mxu0 }
 0x114   : > { %v2226_v32 = vpop.f32.mrb[15].mxu1  ;;  %v2154_v33 = vpop.f32.mrb[15].mxu0 }
 0x115   : > { %v2835_v34 = vadd.f32 %v2226_v32, %v2225_v29  ;;  %v2155_v35 = vadd.f32 %v2154_v33, %v2153_v31  ;;  %v1077_v18 = vadd.f32 %v2152_v30, %v2840_v38 }
 0x117   : > { %v1080_v23 = vadd.f32 %v2155_v35, %v2840_v38 }
 0x119   : > { %v2244_v36 = vpop.f32.mrb[16].mxu1  ;;  %v2156_v37 = vpop.f32.mrb[16].mxu0 }
 0x11a   : > { %v2245_v39 = vpop.f32.mrb[17].mxu1  ;;  %v2157_v40 = vpop.f32.mrb[17].mxu0 }
 0x11b   : > { %v2246_v42 = vadd.f32 %v2245_v39, %v2244_v36  ;;  %v2247_v43 = vpop.f32.mrb[18].mxu1  ;;  %v2158_v44 = vadd.f32 %v2157_v40, %v2156_v37  ;;  %v2159_v45 = vpop.f32.mrb[18].mxu0 }
 0x11c   : > { %v2248_v46 = vpop.f32.mrb[19].mxu1  ;;  %v2160_v47 = vpop.f32.mrb[19].mxu0 }
 0x11d   : > { %v2249_v49 = vadd.f32 %v2248_v46, %v2247_v43  ;;  %v2161_v50 = vadd.f32 %v2160_v47, %v2159_v45  ;;  %v2844_v51 = vadd.f32 %v2246_v42, %v1053_v41  ;;  %v1085_v30 = vadd.f32 %v2158_v44, %v2840_v38 }
 0x11f   : > { %v2846_v52 = vadd.f32 %v2249_v49, %v1056_v48  ;;  %v1088_v35 = vadd.f32 %v2161_v50, %v2840_v38 }
 0x121   : > { %v2250_v53 = vpop.f32.mrb[20].mxu1  ;;  %v2162_v54 = vpop.f32.mrb[20].mxu0 }
 0x122   : > { %v2251_v55 = vpop.f32.mrb[21].mxu1  ;;  %v2163_v57 = vpop.f32.mrb[21].mxu0 }
 0x123   : > { %v2252_v59 = vadd.f32 %v2251_v55, %v2250_v53  ;;  %v2253_v60 = vpop.f32.mrb[22].mxu1  ;;  %v2164_v61 = vadd.f32 %v2163_v57, %v2162_v54  ;;  %v2165_v0 = vpop.f32.mrb[22].mxu0 }
 0x124   : > { %v2254_v1 = vpop.f32.mrb[23].mxu1  ;;  %v2166_v2 = vpop.f32.mrb[23].mxu0 }
 0x125   : > { %v2255_v3 = vadd.f32 %v2254_v1, %v2253_v60  ;;  %v2167_v5 = vadd.f32 %v2166_v2, %v2165_v0  ;;  %v2850_v7 = vadd.f32 %v2252_v59, %v1061_v58  ;;  %v1093_v44 = vadd.f32 %v2164_v61, %v2840_v38 }
 0x127   : > { %v2852_v8 = vadd.f32 %v2255_v3, %v1064_v63  ;;  %v1096_v50 = vadd.f32 %v2167_v5, %v2840_v38 }
 0x129   : > { %v2256_v9 = vpop.f32.mrb[24].mxu1  ;;  %v2168_v12 = vpop.f32.mrb[24].mxu0 }
 0x12a   : > { %v2257_v13 = vpop.f32.mrb[25].mxu1  ;;  %v2169_v14 = vpop.f32.mrb[25].mxu0 }
 0x12b   : > { %v2258_v15 = vadd.f32 %v2257_v13, %v2256_v9  ;;  %v2259_v17 = vpop.f32.mrb[26].mxu1  ;;  %v2170_v19 = vadd.f32 %v2169_v14, %v2168_v12  ;;  %v2171_v20 = vpop.f32.mrb[26].mxu0 }
 0x12c   : > { %v2260_v21 = vpop.f32.mrb[27].mxu1  ;;  %v2172_v24 = vpop.f32.mrb[27].mxu0 }
 0x12d   : > { %v2261_v25 = vadd.f32 %v2260_v21, %v2259_v17  ;;  %v2173_v26 = vadd.f32 %v2172_v24, %v2171_v20  ;;  %v2856_v27 = vadd.f32 %v2258_v15, %v1069_v6 }
 0x12f   : > { %v2858_v29 = vadd.f32 %v2261_v25, %v1072_v11 }
 0x131   : > { %v2262_v31 = vpop.f32.mrb[28].mxu1  ;;  %v2174_v32 = vpop.f32.mrb[28].mxu0 }
 0x132   : > { %v2263_v33 = vpop.f32.mrb[29].mxu1  ;;  %v2175_v36 = vpop.f32.mrb[29].mxu0 }
 0x133   : > { %v2264_v37 = vadd.f32 %v2263_v33, %v2262_v31  ;;  %v2265_v39 = vpop.f32.mrb[30].mxu1  ;;  %v2176_v40 = vadd.f32 %v2175_v36, %v2174_v32  ;;  %v2177_v41 = vpop.f32.mrb[30].mxu0 }
 0x134   : > { %v2266_v42 = vpop.f32.mrb[31].mxu1  ;;  %v2178_v43 = vpop.f32.mrb[31].mxu0 }
 0x135   : > { %v2267_v45 = vadd.f32 %v2266_v42, %v2265_v39  ;;  %v2179_v46 = vadd.f32 %v2178_v43, %v2177_v41  ;;  %v2862_v47 = vadd.f32 %v2264_v37, %v1077_v18  ;;  %v1101_v39 = vadd.f32 %v2170_v19, %v2840_v38 }
 0x137   : > { %v2864_v48 = vadd.f32 %v2267_v45, %v1080_v23 }
 0x139   : > { %v2268_v49 = vpop.f32.mrb[32].mxu1  ;;  %v2180_v53 = vpop.f32.mrb[32].mxu0 }
 0x13a   : > { %v2269_v54 = vpop.f32.mrb[33].mxu1  ;;  %v2181_v55 = vpop.f32.mrb[33].mxu0 }
 0x13b   : > { %v2270_v57 = vadd.f32 %v2269_v54, %v2268_v49  ;;  %v2271_v58 = vpop.f32.mrb[34].mxu1  ;;  %v2867_v59 = vadd.f32 %v2181_v55, %v2180_v53  ;;  %v2183_v60 = vpop.f32.mrb[34].mxu0  ;;  %v1104_v49 = vadd.f32 %v2173_v26, %v2840_v38 }
 0x13c   : > { %v2272_v0 = vpop.f32.mrb[35].mxu1  ;;  %v2184_v1 = vpop.f32.mrb[35].mxu0 }
 0x13d   : > { %v2273_v2 = vadd.f32 %v2272_v0, %v2271_v58  ;;  %v2185_v63 = vadd.f32 %v2184_v1, %v2183_v60  ;;  %v2870_v3 = vadd.f32 %v2270_v57, %v1085_v30  ;;  %v1109_v0 = vadd.f32 %v2176_v40, %v2840_v38 }
 0x13f   : > { %v2872_v9 = vadd.f32 %v2273_v2, %v1088_v35 }
 0x141   : > { %v2274_v12 = vpop.f32.mrb[36].mxu1  ;;  %v2186_v13 = vpop.f32.mrb[36].mxu0 }
 0x142   : > { %v2275_v14 = vpop.f32.mrb[37].mxu1  ;;  %v2187_v6 = vpop.f32.mrb[37].mxu0 }
 0x143   : > { %v2276_v15 = vadd.f32 %v2275_v14, %v2274_v12  ;;  %v2277_v17 = vpop.f32.mrb[38].mxu1  ;;  %v2875_v20 = vadd.f32 %v2187_v6, %v2186_v13  ;;  %v2189_v21 = vpop.f32.mrb[38].mxu0  ;;  %v1112_v14 = vadd.f32 %v2179_v46, %v2840_v38  ;;  %v1117_v46 = vadd.f32 %v2867_v59, %v2840_v38 }
 0x144   : > { %v2278_v24 = vpop.f32.mrb[39].mxu1  ;;  %v2190_v11 = vpop.f32.mrb[39].mxu0 }
 0x145   : > { %v2279_v25 = vadd.f32 %v2278_v24, %v2277_v17  ;;  %v2878_v31 = vadd.f32 %v2190_v11, %v2189_v21  ;;  %v2880_v32 = vadd.f32 %v2276_v15, %v1093_v44 }
 0x147   : > { %v2882_v33 = vadd.f32 %v2279_v25, %v1096_v50 }
 0x149   : > { %v2280_v36 = vpop.f32.mrb[40].mxu1  ;;  %v2192_v18 = vpop.f32.mrb[40].mxu0 }
 0x14a   : > { %v2281_v37 = vpop.f32.mrb[41].mxu1  ;;  %v2193_v61 = vpop.f32.mrb[41].mxu0 }
 0x14b   : > { %v2282_v41 = vadd.f32 %v2281_v37, %v2280_v36  ;;  %v2283_v42 = vpop.f32.mrb[42].mxu1  ;;  %v2885_v43 = vadd.f32 %v2193_v61, %v2192_v18  ;;  %v2195_v23 = vpop.f32.mrb[42].mxu0  ;;  %v1120_v61 = vadd.f32 %v2185_v63, %v2840_v38 }
 0x14c   : > { %v2284_v45 = vpop.f32.mrb[43].mxu1  ;;  %v2196_v5 = vpop.f32.mrb[43].mxu0 }
 0x14d   : > { %v2285_v53 = vadd.f32 %v2284_v45, %v2283_v42  ;;  %v2888_v54 = vadd.f32 %v2196_v5, %v2195_v23  ;;  %v2890_v55 = vadd.f32 %v2282_v41, %v1101_v39 }
 0x14f   : > { %v2892_v30 = vadd.f32 %v2285_v53, %v1104_v49 }
 0x151   : > { %v2286_v57 = vpop.f32.mrb[44].mxu1  ;;  %v2198_v58 = vpop.f32.mrb[44].mxu0 }
 0x152   : > { %v2287_v60 = vpop.f32.mrb[45].mxu1  ;;  %v2199_v19 = vpop.f32.mrb[45].mxu0 }
 0x153   : > { %v2288_v1 = vadd.f32 %v2287_v60, %v2286_v57  ;;  %v2289_v35 = vpop.f32.mrb[46].mxu1  ;;  %v2895_v2 = vadd.f32 %v2199_v19, %v2198_v58  ;;  %v2201_v12 = vpop.f32.mrb[46].mxu0 }
 0x154   : > { %v2290_v13 = vpop.f32.mrb[47].mxu1  ;;  %v2202_v26 = vpop.f32.mrb[47].mxu0 }
 0x155   : > { %v2291_v6 = vadd.f32 %v2290_v13, %v2289_v35  ;;  %v2898_v44 = vadd.f32 %v2202_v26, %v2201_v12  ;;  %v2900_v15 = vadd.f32 %v2288_v1, %v1109_v0 }
 0x157   : > { %v2902_v17 = vadd.f32 %v2291_v6, %v1112_v14 }
 0x159   : > { %v2292_v21 = vpop.f32.mrb[48].mxu1  ;;  %v2370_v24 = vpop.f32.mrb[48].mxu0 }
 0x15a   : > { %v1383_v40 = vadd.f32 %v2370_v24, %v2850_v7  ;;  %v2293_v11 = vpop.f32.mrb[49].mxu1  ;;  %v1374_v50 = vpop.f32.mrb[49].mxu0  ;;  %v1128_v24 = vadd.f32 %v2878_v31, %v2840_v38 }
 0x15b   : > { %v2294_v25 = vadd.f32 %v2293_v11, %v2292_v21  ;;  %v1375_v36 = vadd.f32 %v1374_v50, %v2844_v51  ;;  %v2295_v18 = vpop.f32.mrb[50].mxu1  ;;  %v2371_v37 = vpop.f32.mrb[50].mxu0  ;;  %v1125_v21 = vadd.f32 %v2875_v20, %v2840_v38 }
 0x15c   : > { %v1535_v39 = vmul.f32 0.01, %v1383_v40  ;;  %v1386_v41 = vadd.f32 %v2371_v37, %v2852_v8  ;;  %v2296_v42 = vpop.f32.mrb[51].mxu1  ;;  %v1377_v23 = vpop.f32.mrb[51].mxu0  ;;  %vm1503_vm1 = vcmp.ge.f32.partialorder %v1383_v40, 0.0 }
 0x15d   : > { %v1533_v45 = vmul.f32 0.01, %v1375_v36  ;;  %v2297_v7 = vadd.f32 %v2296_v42, %v2295_v18  ;;  %v1378_v5 = vadd.f32 %v1377_v23, %v2846_v52  ;;  %vm1501_vm2 = vcmp.ge.f32.partialorder %v1375_v36, 0.0 }
 0x15e   : > { %vm1504_vm3 = vcmp.ge.f32.partialorder %v1386_v41, 0.0  ;;  %v1536_v51 = vmul.f32 0.01, %v1386_v41  ;;  %v2912_v49 = vadd.f32 %v2294_v25, %v1117_v46  ;;  %v1567_v63 = vsel %vm1503_vm1, %v1383_v40, %v1535_v39 }
 0x15f   : > { %vm1502_vm4 = vcmp.ge.f32.partialorder %v1378_v5, 0.0  ;;  %v1534_v59 = vmul.f32 0.01, %v1378_v5  ;;  %v2914_v53 = vadd.f32 %v2297_v7, %v1120_v61  ;;  %v1565_v57 = vsel %vm1501_vm2, %v1375_v36, %v1533_v45 }
 0x160   : > { %v1568_v8 = vsel %vm1504_vm3, %v1386_v41, %v1536_v51 }
 0x161   : > { %v2029_v52 = vpack.c.bf16 %v1568_v8, %v1567_v63  ;;  %v1566_v58 = vsel %vm1502_vm4, %v1378_v5, %v1534_v59  ;;  %v2298_v60 = vpop.f32.mrb[52].mxu1  ;;  %v2374_v19 = vpop.f32.mrb[52].mxu0 }
 0x162   : > { %v2024_v0 = vpack.c.bf16 %v1566_v58, %v1565_v57  ;;  %v1399_v1 = vadd.f32 %v2374_v19, %v2862_v47  ;;  %v2299_v35 = vpop.f32.mrb[53].mxu1  ;;  %v1390_v12 = vpop.f32.mrb[53].mxu0  ;;  %v1133_v57 = vadd.f32 %v2885_v43, %v2840_v38 }
 0x163   : > { %2101 = vst [vmem:[%s2919_s22 + $0x8] sm:$0xff] %v2029_v52   ;;  %v2300_v13 = vadd.f32 %v2299_v35, %v2298_v60  ;;  %v1391_v26 = vadd.f32 %v1390_v12, %v2856_v27  ;;  %v2301_v14 = vpop.f32.mrb[54].mxu1  ;;  %v2375_v6 = vpop.f32.mrb[54].mxu0  ;;  %v1136_v52 = vadd.f32 %v2888_v54, %v2840_v38 }
 0x164   : > { %2025 = vst [vmem:[%s2919_s22] sm:$0xff] %v2024_v0   ;;  %v1539_v40 = vmul.f32 0.01, %v1399_v1  ;;  %v1402_v11 = vadd.f32 %v2375_v6, %v2864_v48  ;;  %v2302_v50 = vpop.f32.mrb[55].mxu1  ;;  %v1393_v47 = vpop.f32.mrb[55].mxu0  ;;  %vm1507_vm5 = vcmp.ge.f32.partialorder %v1399_v1, 0.0 }
 0x165   : > { %v1537_v25 = vmul.f32 0.01, %v1391_v26  ;;  %v2303_v36 = vadd.f32 %v2302_v50, %v2301_v14  ;;  %v1394_v18 = vadd.f32 %v1393_v47, %v2858_v29  ;;  %vm1505_vm6 = vcmp.ge.f32.partialorder %v1391_v26, 0.0 }
 0x166   : > { %vm1508_vm7 = vcmp.ge.f32.partialorder %v1402_v11, 0.0  ;;  %v1540_v27 = vmul.f32 0.01, %v1402_v11  ;;  %v2931_v37 = vadd.f32 %v2300_v13, %v1125_v21  ;;  %v1571_v46 = vsel %vm1507_vm5, %v1399_v1, %v1539_v40 }
 0x167   : > { %vm1506_vm8 = vcmp.ge.f32.partialorder %v1394_v18, 0.0  ;;  %v1538_v20 = vmul.f32 0.01, %v1394_v18  ;;  %v2933_v31 = vadd.f32 %v2303_v36, %v1128_v24  ;;  %v1569_v48 = vsel %vm1505_vm6, %v1391_v26, %v1537_v25 }
 0x168   : > { %v1572_v61 = vsel %vm1508_vm7, %v1402_v11, %v1540_v27  ;;  %v1141_v27 = vadd.f32 %v2895_v2, %v2840_v38 }
 0x169   : > { %v2039_v39 = vpack.c.bf16 %v1572_v61, %v1571_v46  ;;  %v1570_v41 = vsel %vm1506_vm8, %v1394_v18, %v1538_v20  ;;  %v2304_v42 = vpop.f32.mrb[56].mxu1  ;;  %v2378_v23 = vpop.f32.mrb[56].mxu0  ;;  %v1144_v20 = vadd.f32 %v2898_v44, %v2840_v38 }
 0x16a   : > { %v2034_v45 = vpack.c.bf16 %v1570_v41, %v1569_v48  ;;  %v1415_v29 = vadd.f32 %v2378_v23, %v2880_v32  ;;  %v2305_v7 = vpop.f32.mrb[57].mxu1  ;;  %v1406_v5 = vpop.f32.mrb[57].mxu0 }
 0x16b   : > { %2103 = vst [vmem:[%s2919_s22 + $0x18] sm:$0xff] %v2039_v39   ;;  %v2306_v51 = vadd.f32 %v2305_v7, %v2304_v42  ;;  %v1407_v59 = vadd.f32 %v1406_v5, %v2870_v3  ;;  %v2307_v63 = vpop.f32.mrb[58].mxu1  ;;  %v2379_v8 = vpop.f32.mrb[58].mxu0 }
 0x16c   : > { %2102 = vst [vmem:[%s2919_s22 + $0x10] sm:$0xff] %v2034_v45   ;;  %v1543_v58 = vmul.f32 0.01, %v1415_v29  ;;  %v1418_v60 = vadd.f32 %v2379_v8, %v2882_v33  ;;  %v2308_v19 = vpop.f32.mrb[59].mxu1  ;;  %v1409_v32 = vpop.f32.mrb[59].mxu0  ;;  %vm1511_vm9 = vcmp.ge.f32.partialorder %v1415_v29, 0.0 }
 0x16d   : > { %v1541_v0 = vmul.f32 0.01, %v1407_v59  ;;  %v2309_v1 = vadd.f32 %v2308_v19, %v2307_v63  ;;  %v1410_v35 = vadd.f32 %v1409_v32, %v2872_v9  ;;  %vm1509_vm10 = vcmp.ge.f32.partialorder %v1407_v59, 0.0 }
 0x16e   : > { %vm1512_vm11 = vcmp.ge.f32.partialorder %v1418_v60, 0.0  ;;  %v1544_v3 = vmul.f32 0.01, %v1418_v60  ;;  %v2945_v12 = vadd.f32 %v2306_v51, %v1133_v57  ;;  %v1575_v13 = vsel %vm1511_vm9, %v1415_v29, %v1543_v58 }
 0x16f   : > { %vm1510_vm12 = vcmp.ge.f32.partialorder %v1410_v35, 0.0  ;;  %v1542_v43 = vmul.f32 0.01, %v1410_v35  ;;  %v2947_v54 = vadd.f32 %v2309_v1, %v1136_v52  ;;  %v1573_v33 = vsel %vm1509_vm10, %v1407_v59, %v1541_v0 }
 0x170   : > { %v1576_v26 = vsel %vm1512_vm11, %v1418_v60, %v1544_v3  ;;  %v1149_v32 = vadd.f32 %v2821_v56, %v2840_v38  ;;  %v1152_v0 = vadd.f32 %v2823_v62, %v2840_v38 }
 0x171   : > { %v2049_v14 = vpack.c.bf16 %v1576_v26, %v1575_v13  ;;  %v1574_v6 = vsel %vm1510_vm12, %v1410_v35, %v1542_v43  ;;  %v2310_v21 = vpop.f32.mrb[60].mxu1  ;;  %v2382_v24 = vpop.f32.mrb[60].mxu0 }
 0x172   : > { %v2044_v40 = vpack.c.bf16 %v1574_v6, %v1573_v33  ;;  %v1431_v9 = vadd.f32 %v2382_v24, %v2900_v15  ;;  %v2311_v11 = vpop.f32.mrb[61].mxu1  ;;  %v1422_v50 = vpop.f32.mrb[61].mxu0 }
 0x173   : > { %2105 = vst [vmem:[%s2919_s22 + $0x28] sm:$0xff] %v2049_v14   ;;  %v2312_v47 = vadd.f32 %v2311_v11, %v2310_v21  ;;  %v1423_v25 = vadd.f32 %v1422_v50, %v2890_v55  ;;  %v2313_v36 = vpop.f32.mrb[62].mxu1  ;;  %v2383_v18 = vpop.f32.mrb[62].mxu0 }
 0x174   : > { %2104 = vst [vmem:[%s2919_s22 + $0x20] sm:$0xff] %v2044_v40   ;;  %v1547_v46 = vmul.f32 0.01, %v1431_v9  ;;  %v1434_v61 = vadd.f32 %v2383_v18, %v2902_v17  ;;  %v2314_v48 = vpop.f32.mrb[63].mxu1  ;;  %v1425_v15 = vpop.f32.mrb[63].mxu0  ;;  %vm1515_vm13 = vcmp.ge.f32.partialorder %v1431_v9, 0.0 }
 0x175   : > { %v1545_v39 = vmul.f32 0.01, %v1423_v25  ;;  %v2315_v41 = vadd.f32 %v2314_v48, %v2313_v36  ;;  %v1426_v42 = vadd.f32 %v1425_v15, %v2892_v30  ;;  %vm1513_vm14 = vcmp.ge.f32.partialorder %v1423_v25, 0.0 }
 0x176   : > { %vm1516_vm15 = vcmp.ge.f32.partialorder %v1434_v61, 0.0  ;;  %v1548_v55 = vmul.f32 0.01, %v1434_v61  ;;  %v1302_v23 = vadd.f32 %v2312_v47, %v1141_v27  ;;  %v1579_v44 = vsel %vm1515_vm13, %v1431_v9, %v1547_v46 }
 0x177   : > { %vm1514_vm0 = vcmp.ge.f32.partialorder %v1426_v42, 0.0  ;;  %v1546_v2 = vmul.f32 0.01, %v1426_v42  ;;  %v1305_v45 = vadd.f32 %v2315_v41, %v1144_v20  ;;  %v1577_v7 = vsel %vm1513_vm14, %v1423_v25, %v1545_v39 }
 0x178   : > { %v1580_v29 = vsel %vm1516_vm15, %v1434_v61, %v1548_v55  ;;  %v1157_v20 = vadd.f32 %v2825_v4, %v2840_v38  ;;  %v1160_v46 = vadd.f32 %v2827_v10, %v2840_v38 }
 0x179   : > { %v2059_v17 = vpack.c.bf16 %v1580_v29, %v1579_v44  ;;  %v1578_v5 = vsel %vm1514_vm0, %v1426_v42, %v1546_v2  ;;  %v2316_v51 = vpop.f32.mrb[64].mxu1  ;;  %v2386_v59 = vpop.f32.mrb[64].mxu0 }
 0x17a   : > { %v2054_v63 = vpack.c.bf16 %v1578_v5, %v1577_v7  ;;  %v1447_v8 = vadd.f32 %v2386_v59, %v2931_v37  ;;  %v2317_v30 = vpop.f32.mrb[65].mxu1  ;;  %v1438_v57 = vpop.f32.mrb[65].mxu0 }
 0x17b   : > { %2107 = vst [vmem:[%s2919_s22 + $0x38] sm:$0xff] %v2059_v17   ;;  %v2318_v52 = vadd.f32 %v2317_v30, %v2316_v51  ;;  %v1439_v58 = vadd.f32 %v1438_v57, %v2912_v49  ;;  %v2319_v60 = vpop.f32.mrb[66].mxu1  ;;  %v2387_v19 = vpop.f32.mrb[66].mxu0 }
 0x17c   : > { %2106 = vst [vmem:[%s2919_s22 + $0x30] sm:$0xff] %v2054_v63   ;;  %v1551_v1 = vmul.f32 0.01, %v1447_v8  ;;  %v1450_v35 = vadd.f32 %v2387_v19, %v2933_v31  ;;  %v2320_v3 = vpop.f32.mrb[67].mxu1  ;;  %v1441_v37 = vpop.f32.mrb[67].mxu0  ;;  %vm1519_vm1 = vcmp.ge.f32.partialorder %v1447_v8, 0.0 }
 0x17d   : > { %v1549_v43 = vmul.f32 0.01, %v1439_v58  ;;  %v2321_v13 = vadd.f32 %v2320_v3, %v2319_v60  ;;  %v1442_v26 = vadd.f32 %v1441_v37, %v2914_v53  ;;  %vm1517_vm2 = vcmp.ge.f32.partialorder %v1439_v58, 0.0 }
 0x17e   : > { %vm1520_vm3 = vcmp.ge.f32.partialorder %v1450_v35, 0.0  ;;  %v1552_v49 = vmul.f32 0.01, %v1450_v35  ;;  %v1310_v33 = vadd.f32 %v2318_v52, %v1149_v32  ;;  %v1583_v62 = vsel %vm1519_vm1, %v1447_v8, %v1551_v1 }
 0x17f   : > { %vm1518_vm4 = vcmp.ge.f32.partialorder %v1442_v26, 0.0  ;;  %v1550_v56 = vmul.f32 0.01, %v1442_v26  ;;  %v1313_v14 = vadd.f32 %v2321_v13, %v1152_v0  ;;  %v1581_v21 = vsel %vm1517_vm2, %v1439_v58, %v1549_v43 }
 0x180   : > { %v1584_v6 = vsel %vm1520_vm3, %v1450_v35, %v1552_v49  ;;  %v1165_v58 = vadd.f32 %v2829_v16, %v2840_v38  ;;  %v1168_v60 = vadd.f32 %v2831_v22, %v2840_v38 }
 0x181   : > { %v2069_v31 = vpack.c.bf16 %v1584_v6, %v1583_v62  ;;  %v1582_v24 = vsel %vm1518_vm4, %v1442_v26, %v1550_v56  ;;  %v2322_v40 = vpop.f32.mrb[68].mxu1  ;;  %v2390_v9 = vpop.f32.mrb[68].mxu0 }
 0x182   : > { %v2064_v11 = vpack.c.bf16 %v1582_v24, %v1581_v21  ;;  %v1463_v50 = vadd.f32 %v2390_v9, %v1302_v23  ;;  %v2323_v47 = vpop.f32.mrb[69].mxu1  ;;  %v1454_v53 = vpop.f32.mrb[69].mxu0 }
 0x183   : > { %2109 = vst [vmem:[%s2919_s22 + $0x48] sm:$0xff] %v2069_v31   ;;  %v2324_v25 = vadd.f32 %v2323_v47, %v2322_v40  ;;  %v1455_v36 = vadd.f32 %v1454_v53, %v2945_v12  ;;  %v2325_v18 = vpop.f32.mrb[70].mxu1  ;;  %v2391_v27 = vpop.f32.mrb[70].mxu0 }
 0x184   : > { %2108 = vst [vmem:[%s2919_s22 + $0x40] sm:$0xff] %v2064_v11   ;;  %v1555_v61 = vmul.f32 0.01, %v1463_v50  ;;  %v1466_v48 = vadd.f32 %v2391_v27, %v1305_v45  ;;  %v2326_v15 = vpop.f32.mrb[71].mxu1  ;;  %v1457_v39 = vpop.f32.mrb[71].mxu0  ;;  %vm1523_vm5 = vcmp.ge.f32.partialorder %v1463_v50, 0.0 }
 0x185   : > { %v1553_v41 = vmul.f32 0.01, %v1455_v36  ;;  %v2327_v42 = vadd.f32 %v2326_v15, %v2325_v18  ;;  %v1458_v55 = vadd.f32 %v1457_v39, %v2947_v54  ;;  %vm1521_vm6 = vcmp.ge.f32.partialorder %v1455_v36, 0.0 }
 0x186   : > { %vm1524_vm7 = vcmp.ge.f32.partialorder %v1466_v48, 0.0  ;;  %v1556_v12 = vmul.f32 0.01, %v1466_v48  ;;  %v1318_v23 = vadd.f32 %v2324_v25, %v1157_v20  ;;  %v1587_v44 = vsel %vm1523_vm5, %v1463_v50, %v1555_v61 }
 0x187   : > { %vm1522_vm8 = vcmp.ge.f32.partialorder %v1458_v55, 0.0  ;;  %v1554_v4 = vmul.f32 0.01, %v1458_v55  ;;  %v1321_v2 = vadd.f32 %v2327_v42, %v1160_v46  ;;  %v1585_v29 = vsel %vm1521_vm6, %v1455_v36, %v1553_v41 }
 0x188   : > { %v1588_v10 = vsel %vm1524_vm7, %v1466_v48, %v1556_v12  ;;  %v1176_v36 = vadd.f32 %v2835_v34, %v2840_v38 }
 0x189   : > { %v2079_v45 = vpack.c.bf16 %v1588_v10, %v1587_v44  ;;  %v1586_v7 = vsel %vm1522_vm8, %v1458_v55, %v1554_v4  ;;  %v2328_v17 = vpop.f32.mrb[72].mxu1  ;;  %v2394_v5 = vpop.f32.mrb[72].mxu0 }
 0x18a   : > { %v2074_v51 = vpack.c.bf16 %v1586_v7, %v1585_v29  ;;  %v1479_v59 = vadd.f32 %v2394_v5, %v1318_v23  ;;  %v2329_v63 = vpop.f32.mrb[73].mxu1  ;;  %v1470_v54 = vpop.f32.mrb[73].mxu0 }
 0x18b   : > { %2111 = vst [vmem:[%s2919_s22 + $0x58] sm:$0xff] %v2079_v45   ;;  %v2330_v8 = vadd.f32 %v2329_v63, %v2328_v17  ;;  %v1471_v30 = vadd.f32 %v1470_v54, %v1310_v33  ;;  %v2331_v57 = vpop.f32.mrb[74].mxu1  ;;  %v2395_v52 = vpop.f32.mrb[74].mxu0 }
 0x18c   : > { %2110 = vst [vmem:[%s2919_s22 + $0x50] sm:$0xff] %v2074_v51   ;;  %v1559_v19 = vmul.f32 0.01, %v1479_v59  ;;  %v1482_v32 = vadd.f32 %v2395_v52, %v1321_v2  ;;  %v2332_v0 = vpop.f32.mrb[75].mxu1  ;;  %v1473_v1 = vpop.f32.mrb[75].mxu0  ;;  %vm1527_vm9 = vcmp.ge.f32.partialorder %v1479_v59, 0.0 }
 0x18d   : > { %v1557_v35 = vmul.f32 0.01, %v1471_v30  ;;  %v2333_v3 = vadd.f32 %v2332_v0, %v2331_v57  ;;  %v1474_v37 = vadd.f32 %v1473_v1, %v1313_v14  ;;  %vm1525_vm10 = vcmp.ge.f32.partialorder %v1471_v30, 0.0 }
 0x18e   : > { %vm1528_vm11 = vcmp.ge.f32.partialorder %v1482_v32, 0.0  ;;  %v1560_v43 = vmul.f32 0.01, %v1482_v32  ;;  %v1326_v13 = vadd.f32 %v2330_v8, %v1165_v58  ;;  %v1591_v49 = vsel %vm1527_vm9, %v1479_v59, %v1559_v19 }
 0x18f   : > { %vm1526_vm12 = vcmp.ge.f32.partialorder %v1474_v37, 0.0  ;;  %v1558_v26 = vmul.f32 0.01, %v1474_v37  ;;  %v1329_v16 = vadd.f32 %v2333_v3, %v1168_v60  ;;  %v1589_v33 = vsel %vm1525_vm10, %v1471_v30, %v1557_v35 }
 0x190   : > { %v1592_v22 = vsel %vm1528_vm11, %v1482_v32, %v1560_v43  ;;  %v1173_v14 = vadd.f32 %v2833_v28, %v2840_v38 }
 0x191   : > { %v2089_v56 = vpack.c.bf16 %v1592_v22, %v1591_v49  ;;  %v1590_v62 = vsel %vm1526_vm12, %v1474_v37, %v1558_v26  ;;  %v2334_v6 = vpop.f32.mrb[76].mxu1  ;;  %v2398_v21 = vpop.f32.mrb[76].mxu0 }
 0x192   : > { %v2084_v31 = vpack.c.bf16 %v1590_v62, %v1589_v33  ;;  %v2335_v24 = vpop.f32.mrb[77].mxu1  ;;  %v1486_v40 = vpop.f32.mrb[77].mxu0 }
 0x193   : > { %2113 = vst [vmem:[%s2919_s22 + $0x68] sm:$0xff] %v2089_v56   ;;  %v2336_v9 = vadd.f32 %v2335_v24, %v2334_v6  ;;  %v1487_v11 = vadd.f32 %v1486_v40, %v1326_v13  ;;  %v2337_v50 = vpop.f32.mrb[78].mxu1  ;;  %v2399_v47 = vpop.f32.mrb[78].mxu0 }
 0x194   : > { %2112 = vst [vmem:[%s2919_s22 + $0x60] sm:$0xff] %v2084_v31   ;;  %v2338_v53 = vpop.f32.mrb[79].mxu1  ;;  %v1489_v25 = vpop.f32.mrb[79].mxu0 }
 0x195   : > { %v1334_v18 = vadd.f32 %v2336_v9, %v1173_v14  ;;  %v2339_v27 = vadd.f32 %v2338_v53, %v2337_v50  ;;  %v1561_v20 = vmul.f32 0.01, %v1487_v11  ;;  %v1490_v46 = vadd.f32 %v1489_v25, %v1329_v16 }
 0x196   : > { %vm1529_vm13 = vcmp.ge.f32.partialorder %v1487_v11, 0.0 }
 0x197   : > { %v1495_v61 = vadd.f32 %v2398_v21, %v1334_v18  ;;  %v1337_v28 = vadd.f32 %v2339_v27, %v1176_v36  ;;  %vm1530_vm14 = vcmp.ge.f32.partialorder %v1490_v46, 0.0  ;;  %v1562_v48 = vmul.f32 0.01, %v1490_v46 }
 0x198   : > { %v1593_v41 = vsel %vm1529_vm13, %v1487_v11, %v1561_v20 }
 0x199   : > { %v1563_v15 = vmul.f32 0.01, %v1495_v61  ;;  %v1498_v39 = vadd.f32 %v2399_v47, %v1337_v28  ;;  %vm1531_vm15 = vcmp.ge.f32.partialorder %v1495_v61, 0.0  ;;  %v1594_v42 = vsel %vm1530_vm14, %v1490_v46, %v1562_v48 }
 0x19a   : > { %v2094_v12 = vpack.c.bf16 %v1594_v42, %v1593_v41 }
 0x19b   : > { %vm1532_vm0 = vcmp.ge.f32.partialorder %v1498_v39, 0.0  ;;  %v1564_v55 = vmul.f32 0.01, %v1498_v39  ;;  %v1595_v34 = vsel %vm1531_vm15, %v1495_v61, %v1563_v15 }
 0x19c   : > { %2114 = vst [vmem:[%s2919_s22 + $0x70] sm:$0xff] %v2094_v12  }
 0x19d   : > { %v1596_v38 = vsel %vm1532_vm0, %v1498_v39, %v1564_v55 }
 0x19e   : > { %v2099_v23 = vpack.c.bf16 %v1596_v38, %v1595_v34 }
 0x1a0   : > { %2115 = vst [vmem:[%s2919_s22 + $0x78] sm:$0xff] %v2099_v23  }
 0x1a1 PF: > { %s13_s12 = sadd.s32 1, %s2579_s12  }
 0x1a2   : > { %p10_p4 = scmp.ge.s32.totalorder %s13_s12, 4  }
 0x1a4   :  { %12 = sbr.rel (!%p10_p4) target bundleno = 1 (0x1), region = 62 }

// kernel: vae_forward.17
= control target key start
LH: loop header
LB: loop body
LE: loop exit
PB: predicated region body
PF: predicated region fallthrough
CT: control target
= control target key end

     0   :  { %s1839_s12 = smov 0   ;;  %s2099_s0 = inlined_call_operand.vmem [shape: bf16[2048,288], index: 0, kind: input, shape index: {}]   ;;  %s2100_s1 = inlined_call_operand.vmem [shape: bf16[288,128], index: 1, kind: input, shape index: {}]   ;;  %s2101_s2 = inlined_call_operand.vmem [shape: f32[1,128], index: 2, kind: input, shape index: {}]   ;;  %s2102_s3 = inlined_call_operand.vmem [shape: f32[2048,128], index: 3, kind: output, shape index: {}]  }
   0x1 LB: > { %s1316_s13 = sadd.s32 4294967295, %s1817_s12   ;;  %p1320_p0 = scmp.ge.s32.totalorder %s1817_s12, 1  ;;  %s1817_s12 = sphi %s1839_s12, %s13_s12  }
   0x2   : > { %p139_p1 = scmp.lt.s32.totalorder %s1817_s12, 9 }
   0x4   : > { %p140_p2 = pnand %p1320_p0, %p139_p1 }
   0x5   : > { %v1601_v0 = vld [vmem:[%s2100_s1 + $0x40] sm:$0xff] (!%p140_p2)   ;;  %s1321_s16 = sshll.u32 (!%p140_p2), %s1316_s13, 5  ;;  %v1603_v2 = vld [vmem:[%s2100_s1 + $0x48] sm:$0xff] (!%p140_p2)   ;;  %v1605_v4 = vld [vmem:[%s2100_s1 + $0x50] sm:$0xff] (!%p140_p2)   ;;  %vm633_vm0 = vcmask (!%p140_p2), 261120  }
   0x6   : > { %143 = sbr.rel (%p140_p2) target bundleno = 390 (0x186), region = 32  ;;  %v1602_v1 = vld [vmem:[%s2100_s1] sm:$0xff] (!%p140_p2)   ;;  %1410 = vmatprep.subr.bf16.mxu0 (!%p140_p2), %v1601_v0  ;;  %1576 = vmatprep.subr.bf16.mxu1 (!%p140_p2), %v1601_v0  ;;  %p165_p3 = scmp.lt.s32.totalorder (!%p140_p2), %s1321_s16, 255  ;;  %v1604_v3 = vld [vmem:[%s2100_s1 + $0x8] sm:$0xff] (!%p140_p2)   ;;  %v1606_v5 = vld [vmem:[%s2100_s1 + $0x10] sm:$0xff] (!%p140_p2)  }
   0x7   : > { %1411 = vmatpush3.bf16.msra.mxu0 (!%p140_p2), %v1602_v1  ;;  %1584 = vmatpush3.bf16.msra.mxu1 (!%p140_p2), %v1602_v1  ;;  %v1607_v6 = vld [vmem:[%s2100_s1 + $0x58] sm:$0xff] (!%p140_p2)   ;;  %v1609_v8 = vld [vmem:[%s2100_s1 + $0x60] sm:$0xff] (!%p140_p2)   ;;  %v1611_v10 = vld [vmem:[%s2100_s1 + $0x68] sm:$0xff] (!%p140_p2)  }
   0x8   : > { %1412 = vmatprep.subr.bf16.mxu0 (!%p140_p2), %v1603_v2  ;;  %1577 = vmatprep.subr.bf16.mxu1 (!%p140_p2), %v1603_v2  ;;  %v1608_v7 = vld [vmem:[%s2100_s1 + $0x18] sm:$0xff] (!%p140_p2)   ;;  %v1610_v9 = vld [vmem:[%s2100_s1 + $0x20] sm:$0xff] (!%p140_p2)   ;;  %v1612_v13 = vld [vmem:[%s2100_s1 + $0x28] sm:$0xff] (!%p140_p2)  }
   0x9   : > { %v1613_v14 = vld [vmem:[%s2100_s1 + $0x70] sm:$0xff] (!%p140_p2)   ;;  %v1615_v16 = vld [vmem:[%s2100_s1 + $0x78] sm:$0xff] (!%p140_p2)   ;;  %v1623_v18 = vld [vmem:[%s2100_s1 + $0x80] sm:$0xff] (!%p140_p2)  }
   0xa   : > { %v1614_v15 = vld [vmem:[%s2100_s1 + $0x30] sm:$0xff] (!%p140_p2)   ;;  %v1616_v17 = vld [vmem:[%s2100_s1 + $0x38] sm:$0xff] (!%p140_p2)   ;;  %v1636_v23 = vld [vmem:[%s2100_s1 + $0x88] sm:$0xff] (!%p140_p2)  }
   0xb   : > { %1413 = vmatpush3.bf16.msra.mxu0 (!%p140_p2), %v1604_v3  ;;  %1585 = vmatpush3.bf16.msra.mxu1 (!%p140_p2), %v1604_v3 }
   0xc   : > { %1414 = vmatprep.subr.bf16.mxu0 (!%p140_p2), %v1605_v4  ;;  %1578 = vmatprep.subr.bf16.mxu1 (!%p140_p2), %v1605_v4 }
   0xd   : > { %s2104_s16 = smov (!%p165_p3, %s1321_s16), 255 }
   0xe   : > { %s1592_s29 = smul.u32 12, %s2104_s16  ;;  %s1324_s5 = sshll.u32 %s2104_s16, 3 }
   0xf   : > { %1415 = vmatpush3.bf16.msra.mxu0 %v1606_v5  ;;  %1586 = vmatpush3.bf16.msra.mxu1 %v1606_v5  ;;  %s2014_s8 = scalar_lea.vmem %s2102_s3, %s1324_s5 }
  0x10   : > { %1416 = vmatprep.subr.bf16.mxu0 %v1607_v6  ;;  %1579 = vmatprep.subr.bf16.mxu1 %v1607_v6  ;;  %s1880_s9 = scalar_lea.vmem %s2099_s0, %s1592_s29 }
  0x11   : > { %v1619_v11 = vld [vmem:[%s1880_s9 + $0x4] ss:$12 sps:$4 sm:$0xff]   ;;  %v1617_v19 = vld [vmem:[%s1880_s9] ss:$12 sps:$4 sm:$0xff]   ;;  %v1624_v21 = vld [vmem:[%s1880_s9 + $0x1c] ss:$12 sps:$4 sm:$0xff]  }
  0x12   : > { %v1622_v12 = vld [vmem:[%s1880_s9 + $0x124] ss:$12 sps:$4 sm:$0xff]   ;;  %714 = vmatprep.mubr.bf16.mxu0 %v1619_v11  ;;  %v1620_v20 = vld [vmem:[%s1880_s9 + $0x120] ss:$12 sps:$4 sm:$0xff]   ;;  %v1626_v22 = vld [vmem:[%s1880_s9 + $0x13c] ss:$12 sps:$4 sm:$0xff]  }
  0x13   : > { %1417 = vmatpush3.bf16.msra.mxu0 %v1608_v7  ;;  %1587 = vmatpush3.bf16.msra.mxu1 %v1608_v7  ;;  %v1628_v24 = vld [vmem:[%s1880_s9 + $0x18] ss:$12 sps:$4 sm:$0xff]   ;;  %v1630_v26 = vld [vmem:[%s1880_s9 + $0x34] ss:$12 sps:$4 sm:$0xff]   ;;  %v1634_v28 = vld [vmem:[%s1880_s9 + $0x30] ss:$12 sps:$4 sm:$0xff]  }
  0x14   : > { %1418 = vmatprep.subr.bf16.mxu0 %v1609_v8  ;;  %1580 = vmatprep.subr.bf16.mxu1 %v1609_v8  ;;  %v1629_v25 = vld [vmem:[%s1880_s9 + $0x138] ss:$12 sps:$4 sm:$0xff]   ;;  %v1632_v27 = vld [vmem:[%s1880_s9 + $0x154] ss:$12 sps:$4 sm:$0xff]   ;;  %v1635_v29 = vld [vmem:[%s1880_s9 + $0x150] ss:$12 sps:$4 sm:$0xff]  }
  0x15   : > { %810 = vmatprep.mubr.bf16.mxu1 %v1622_v12  ;;  %v1637_v30 = vld [vmem:[%s1880_s9 + $0x4c] ss:$12 sps:$4 sm:$0xff]   ;;  %v1641_v32 = vld [vmem:[%s1880_s9 + $0x48] ss:$12 sps:$4 sm:$0xff]   ;;  %v1643_v34 = vld [vmem:[%s1880_s9 + $0x64] ss:$12 sps:$4 sm:$0xff]  }
  0x16   : > { %v1639_v31 = vld [vmem:[%s1880_s9 + $0x16c] ss:$12 sps:$4 sm:$0xff]   ;;  %v1642_v33 = vld [vmem:[%s1880_s9 + $0x168] ss:$12 sps:$4 sm:$0xff]   ;;  %v1652_v41 = vld [vmem:[%s1880_s9 + $0x50] ss:$12 sps:$4 sm:$0xff]  }
  0x17   : > { %1419 = vmatpush3.bf16.msra.mxu0 %v1610_v9  ;;  %1588 = vmatpush3.bf16.msra.mxu1 %v1610_v9  ;;  %v1645_v35 = vld [vmem:[%s1880_s9 + $0x8] ss:$12 sps:$4 sm:$0xff]   ;;  %v1646_v36 = vld [vmem:[%s1880_s9 + $0x60] ss:$12 sps:$4 sm:$0xff]   ;;  %v1650_v39 = vld [vmem:[%s1880_s9 + $0x38] ss:$12 sps:$4 sm:$0xff]  }
  0x18   : > { %1420 = vmatprep.subr.bf16.mxu0 %v1611_v10  ;;  %1581 = vmatprep.subr.bf16.mxu1 %v1611_v10  ;;  %v1647_v37 = vld [vmem:[%s1880_s9 + $0x20] ss:$12 sps:$4 sm:$0xff]   ;;  %v1648_v38 = vld [vmem:[%s1880_s9 + $0x7c] ss:$12 sps:$4 sm:$0xff]   ;;  %v1651_v40 = vld [vmem:[%s1880_s9 + $0x78] ss:$12 sps:$4 sm:$0xff]  }
  0x19   : > { %v1653_v42 = vld [vmem:[%s1880_s9 + $0x94] ss:$12 sps:$4 sm:$0xff]   ;;  %v1656_v44 = vld [vmem:[%s1880_s9 + $0x90] ss:$12 sps:$4 sm:$0xff]   ;;  %v1658_v46 = vld [vmem:[%s1880_s9 + $0xac] ss:$12 sps:$4 sm:$0xff]  }
  0x1a   : > { %v1655_v43 = vld [vmem:[%s1880_s9 + $0x68] ss:$12 sps:$4 sm:$0xff]   ;;  %v1657_v45 = vld [vmem:[%s1880_s9 + $0x80] ss:$12 sps:$4 sm:$0xff]   ;;  %v1660_v47 = vld [vmem:[%s1880_s9 + $0x98] ss:$12 sps:$4 sm:$0xff]  }
  0x1b   : > { %1421 = vmatpush3.bf16.msra.mxu0 %v1612_v13  ;;  %1589 = vmatpush3.bf16.msra.mxu1 %v1612_v13  ;;  %v1661_v48 = vld [vmem:[%s1880_s9 + $0xa8] ss:$12 sps:$4 sm:$0xff]   ;;  %v1662_v49 = vld [vmem:[%s1880_s9 + $0xb0] ss:$12 sps:$4 sm:$0xff]   ;;  %v1666_v52 = vld [vmem:[%s1880_s9 + $0xc0] ss:$12 sps:$4 sm:$0xff]  }
  0x1c   : > { %1422 = vmatprep.subr.bf16.mxu0 %v1613_v14  ;;  %1582 = vmatprep.subr.bf16.mxu1 %v1613_v14  ;;  %v1663_v50 = vld [vmem:[%s1880_s9 + $0xc4] ss:$12 sps:$4 sm:$0xff]   ;;  %v1665_v51 = vld [vmem:[%s1880_s9 + $0xc8] ss:$12 sps:$4 sm:$0xff]   ;;  %v1667_v53 = vld [vmem:[%s1880_s9 + $0xe0] ss:$12 sps:$4 sm:$0xff]  }
  0x1d   : > { %v1668_v54 = vld [vmem:[%s1880_s9 + $0xdc] ss:$12 sps:$4 sm:$0xff]   ;;  %v1670_v55 = vld [vmem:[%s1880_s9 + $0xf8] ss:$12 sps:$4 sm:$0xff]   ;;  %v1673_v58 = vld [vmem:[%s1880_s9 + $0xf4] ss:$12 sps:$4 sm:$0xff]  }
  0x1e   : > { %v1671_v56 = vld [vmem:[%s1880_s9 + $0xd8] ss:$12 sps:$4 sm:$0xff]   ;;  %v1672_v57 = vld [vmem:[%s1880_s9 + $0x110] ss:$12 sps:$4 sm:$0xff]   ;;  %v1675_v59 = vld [vmem:[%s1880_s9 + $0x128] ss:$12 sps:$4 sm:$0xff]  }
  0x1f   : > { %1423 = vmatpush3.bf16.msra.mxu0 %v1614_v15  ;;  %1590 = vmatpush3.bf16.msra.mxu1 %v1614_v15  ;;  %v1676_v60 = vld [vmem:[%s1880_s9 + $0xf0] ss:$12 sps:$4 sm:$0xff]   ;;  %v1677_v61 = vld [vmem:[%s1880_s9 + $0x140] ss:$12 sps:$4 sm:$0xff]   ;;  %v1680_v63 = vld [vmem:[%s1880_s9 + $0x158] ss:$12 sps:$4 sm:$0xff]  }
  0x20   : > { %1424 = vmatprep.subr.bf16.mxu0 %v1615_v16  ;;  %1583 = vmatprep.subr.bf16.mxu1 %v1615_v16  ;;  %v1678_v62 = vld [vmem:[%s1880_s9 + $0x10c] ss:$12 sps:$4 sm:$0xff]   ;;  %v1681_v0 = vld [vmem:[%s1880_s9 + $0x108] ss:$12 sps:$4 sm:$0xff]   ;;  %v1682_v1 = vld [vmem:[%s1880_s9 + $0x170] ss:$12 sps:$4 sm:$0xff]  }
  0x23   : > { %1425 = vmatpush3.bf16.msra.mxu0 %v1616_v17  ;;  %1591 = vmatpush3.bf16.msra.mxu1 %v1616_v17 }
  0x24   : > { %1540 = vmatprep.subr.bf16.mxu1 %v1623_v18 }
  0x26   : > { %715 = vmatmul.mubr.bf16.vlgmr.msra.gmra.mrb[0].mxu0 %v1617_v19  ;;  %811 = vmatmul.mubr.bf16.vlgmr.msra.gmra.mrb[0].mxu1 %v1620_v20 }
  0x27   : > { %1541 = vmatpush3.bf16.msra.mxu1 %v1623_v18  ;;  %722 = vmatprep.mubr.bf16.mxu0 %v1624_v21 }
  0x28   : > { %818 = vmatprep.mubr.bf16.mxu1 %v1626_v22  ;;  %1542 = vmatprep.subr.bf16.mxu1 %v1636_v23 }
  0x2b   : > { %1543 = vmatpush3.bf16.msra.mxu1 %v1636_v23 }
  0x2e   : > { %723 = vmatmul.mubr.bf16.gmra.mrb[4].mxu0 %v1628_v24  ;;  %819 = vmatmul.mubr.bf16.gmra.mrb[4].mxu1 %v1629_v25 }
  0x2f   : > { %730 = vmatprep.mubr.bf16.mxu0 %v1630_v26  ;;  %826 = vmatprep.mubr.bf16.mxu1 %v1632_v27 }
  0x36   : > { %731 = vmatmul.mubr.bf16.gmra.mrb[8].mxu0 %v1634_v28  ;;  %827 = vmatmul.mubr.bf16.gmra.mrb[8].mxu1 %v1635_v29 }
  0x37   : > { %738 = vmatprep.mubr.bf16.mxu0 %v1637_v30  ;;  %834 = vmatprep.mubr.bf16.mxu1 %v1639_v31 }
  0x3e   : > { %739 = vmatmul.mubr.bf16.gmra.mrb[12].mxu0 %v1641_v32  ;;  %835 = vmatmul.mubr.bf16.gmra.mrb[12].mxu1 %v1642_v33 }
  0x3f   : > { %746 = vmatprep.mubr.bf16.mxu0 %v1643_v34  ;;  %1544 = vmatprep.mubr.msk.bf16.mxu1 %vm633_vm0, %v1645_v35 }
  0x46   : > { %747 = vmatmul.mubr.bf16.gmra.mrb[16].mxu0 %v1646_v36  ;;  %1545 = vmatmul.mubr.msk.bf16.vlgmr.msra.gmra.mrb[16].mxu1 %vm633_vm0, %v1647_v37 }
  0x47   : > { %754 = vmatprep.mubr.bf16.mxu0 %v1648_v38  ;;  %1548 = vmatprep.mubr.msk.bf16.mxu1 %vm633_vm0, %v1650_v39 }
  0x4e   : > { %755 = vmatmul.mubr.bf16.gmra.mrb[20].mxu0 %v1651_v40  ;;  %1549 = vmatmul.mubr.msk.bf16.gmra.mrb[20].mxu1 %vm633_vm0, %v1652_v41 }
  0x4f   : > { %762 = vmatprep.mubr.bf16.mxu0 %v1653_v42  ;;  %1552 = vmatprep.mubr.msk.bf16.mxu1 %vm633_vm0, %v1655_v43 }
  0x56   : > { %763 = vmatmul.mubr.bf16.gmra.mrb[24].mxu0 %v1656_v44  ;;  %1553 = vmatmul.mubr.msk.bf16.gmra.mrb[24].mxu1 %vm633_vm0, %v1657_v45 }
  0x57   : > { %770 = vmatprep.mubr.bf16.mxu0 %v1658_v46  ;;  %1556 = vmatprep.mubr.msk.bf16.mxu1 %vm633_vm0, %v1660_v47 }
  0x5e   : > { %771 = vmatmul.mubr.bf16.gmra.mrb[28].mxu0 %v1661_v48  ;;  %1557 = vmatmul.mubr.msk.bf16.gmra.mrb[28].mxu1 %vm633_vm0, %v1662_v49 }
  0x5f   : > { %778 = vmatprep.mubr.bf16.mxu0 %v1663_v50  ;;  %1560 = vmatprep.mubr.msk.bf16.mxu1 %vm633_vm0, %v1665_v51  ;;  %v1992_v50 = vld [vmem:[%s2101_s2] ss:$0 sm:$0xff] }
  0x66   : > { %779 = vmatmul.mubr.bf16.gmra.mrb[32].mxu0 %v1666_v52  ;;  %1561 = vmatmul.mubr.msk.bf16.gmra.mrb[32].mxu1 %vm633_vm0, %v1667_v53 }
  0x67   : > { %786 = vmatprep.mubr.bf16.mxu0 %v1668_v54  ;;  %1564 = vmatprep.mubr.msk.bf16.mxu1 %vm633_vm0, %v1670_v55 }
  0x6e   : > { %787 = vmatmul.mubr.bf16.gmra.mrb[36].mxu0 %v1671_v56  ;;  %1565 = vmatmul.mubr.msk.bf16.gmra.mrb[36].mxu1 %vm633_vm0, %v1672_v57 }
  0x6f   : > { %794 = vmatprep.mubr.bf16.mxu0 %v1673_v58  ;;  %1568 = vmatprep.mubr.msk.bf16.mxu1 %vm633_vm0, %v1675_v59 }
  0x76   : > { %795 = vmatmul.mubr.bf16.gmra.mrb[40].mxu0 %v1676_v60  ;;  %1569 = vmatmul.mubr.msk.bf16.gmra.mrb[40].mxu1 %vm633_vm0, %v1677_v61 }
  0x77   : > { %802 = vmatprep.mubr.bf16.mxu0 %v1678_v62  ;;  %1572 = vmatprep.mubr.msk.bf16.mxu1 %vm633_vm0, %v1680_v63 }
  0x7e   : > { %803 = vmatmul.mubr.bf16.gmra.mrb[44].mxu0 %v1681_v0  ;;  %1573 = vmatmul.mubr.msk.bf16.gmra.mrb[44].mxu1 %vm633_vm0, %v1682_v1 }
  0xf9   : > { %v1426_v2 = vpop.f32.mrb[0].mxu0  ;;  %v1498_v3 = vpop.f32.mrb[0].mxu1 }
  0xfa   : > { %v1427_v4 = vpop.f32.mrb[1].mxu0  ;;  %v1499_v5 = vpop.f32.mrb[1].mxu1 }
  0xfb   : > { %v1428_v6 = vadd.f32 %v1427_v4, %v1426_v2  ;;  %v1429_v7 = vpop.f32.mrb[2].mxu0  ;;  %v1973_v8 = vadd.f32 %v1499_v5, %v1498_v3  ;;  %v1501_v9 = vpop.f32.mrb[2].mxu1 }
  0xfc   : > { %v1430_v10 = vpop.f32.mrb[3].mxu0  ;;  %v1502_v11 = vpop.f32.mrb[3].mxu1 }
  0xfd   : > { %v1431_v12 = vadd.f32 %v1430_v10, %v1429_v7  ;;  %v1975_v13 = vadd.f32 %v1502_v11, %v1501_v9  ;;  %v717_v54 = vadd.f32 %v1428_v6, %v1992_v50 }
  0xff   : > { %v720_v63 = vadd.f32 %v1431_v12, %v1992_v50 }
 0x101   : > { %v1432_v14 = vpop.f32.mrb[4].mxu0  ;;  %v1504_v15 = vpop.f32.mrb[4].mxu1 }
 0x102   : > { %v1433_v16 = vpop.f32.mrb[5].mxu0  ;;  %v1505_v17 = vpop.f32.mrb[5].mxu1 }
 0x103   : > { %v1434_v18 = vadd.f32 %v1433_v16, %v1432_v14  ;;  %v1435_v19 = vpop.f32.mrb[6].mxu0  ;;  %v1977_v20 = vadd.f32 %v1505_v17, %v1504_v15  ;;  %v1507_v21 = vpop.f32.mrb[6].mxu1 }
 0x104   : > { %v1436_v22 = vpop.f32.mrb[7].mxu0  ;;  %v1508_v23 = vpop.f32.mrb[7].mxu1 }
 0x105   : > { %v1437_v24 = vadd.f32 %v1436_v22, %v1435_v19  ;;  %v1979_v25 = vadd.f32 %v1508_v23, %v1507_v21  ;;  %v725_v51 = vadd.f32 %v1434_v18, %v1992_v50 }
 0x107   : > { %v728_v58 = vadd.f32 %v1437_v24, %v1992_v50 }
 0x109   : > { %v1438_v26 = vpop.f32.mrb[8].mxu0  ;;  %v1510_v27 = vpop.f32.mrb[8].mxu1 }
 0x10a   : > { %v1439_v28 = vpop.f32.mrb[9].mxu0  ;;  %v1511_v29 = vpop.f32.mrb[9].mxu1 }
 0x10b   : > { %v1440_v30 = vadd.f32 %v1439_v28, %v1438_v26  ;;  %v1441_v31 = vpop.f32.mrb[10].mxu0  ;;  %v1981_v32 = vadd.f32 %v1511_v29, %v1510_v27  ;;  %v1513_v33 = vpop.f32.mrb[10].mxu1 }
 0x10c   : > { %v1442_v34 = vpop.f32.mrb[11].mxu0  ;;  %v1514_v35 = vpop.f32.mrb[11].mxu1 }
 0x10d   : > { %v1443_v36 = vadd.f32 %v1442_v34, %v1441_v31  ;;  %v1983_v37 = vadd.f32 %v1514_v35, %v1513_v33  ;;  %v733_v12 = vadd.f32 %v1440_v30, %v1992_v50 }
 0x10f   : > { %v736_v29 = vadd.f32 %v1443_v36, %v1992_v50 }
 0x111   : > { %v1444_v38 = vpop.f32.mrb[12].mxu0  ;;  %v1516_v39 = vpop.f32.mrb[12].mxu1 }
 0x112   : > { %v1445_v40 = vpop.f32.mrb[13].mxu0  ;;  %v1517_v41 = vpop.f32.mrb[13].mxu1 }
 0x113   : > { %v1446_v42 = vadd.f32 %v1445_v40, %v1444_v38  ;;  %v1447_v43 = vpop.f32.mrb[14].mxu0  ;;  %v1985_v44 = vadd.f32 %v1517_v41, %v1516_v39  ;;  %v1519_v45 = vpop.f32.mrb[14].mxu1 }
 0x114   : > { %v1448_v46 = vpop.f32.mrb[15].mxu0  ;;  %v1520_v47 = vpop.f32.mrb[15].mxu1 }
 0x115   : > { %v1449_v48 = vadd.f32 %v1448_v46, %v1447_v43  ;;  %v1987_v49 = vadd.f32 %v1520_v47, %v1519_v45  ;;  %v741_v15 = vadd.f32 %v1446_v42, %v1992_v50 }
 0x117   : > { %v744_v23 = vadd.f32 %v1449_v48, %v1992_v50 }
 0x119   : > { %v1450_v52 = vpop.f32.mrb[16].mxu0  ;;  %v1546_v53 = vpop.f32.mrb[16].mxu1 }
 0x11a   : > { %v886_v55 = vadd.f32 %v1546_v53, %v725_v51  ;;  %v1451_v56 = vpop.f32.mrb[17].mxu0  ;;  %v877_v57 = vpop.f32.mrb[17].mxu1 }
 0x11b   : > { %v1452_v59 = vadd.f32 %v1451_v56, %v1450_v52  ;;  %v878_v60 = vadd.f32 %v877_v57, %v717_v54  ;;  %v1453_v61 = vpop.f32.mrb[18].mxu0  ;;  %v1547_v62 = vpop.f32.mrb[18].mxu1 }
 0x11c   : > { %v1006_v0 = vsub.f32 0.0, %v886_v55  ;;  %v889_v1 = vadd.f32 %v1547_v62, %v728_v58  ;;  %v1454_v2 = vpop.f32.mrb[19].mxu0  ;;  %v880_v3 = vpop.f32.mrb[19].mxu1 }
 0x11d   : > { %v1004_v4 = vsub.f32 0.0, %v878_v60  ;;  %v1455_v5 = vadd.f32 %v1454_v2, %v1453_v61  ;;  %v881_v7 = vadd.f32 %v880_v3, %v720_v63  ;;  %v749_v36 = vadd.f32 %v1452_v59, %v1992_v50 }
 0x11e   : > { %v1040_v9 = vmul.f32 1.442695, %v1006_v0  ;;  %v1007_v6 = vsub.f32 0.0, %v889_v1 }
 0x11f   : > { %v1036_v10 = vmul.f32 1.442695, %v1004_v4  ;;  %v1005_v11 = vsub.f32 0.0, %v881_v7  ;;  %v752_v59 = vadd.f32 %v1455_v5, %v1992_v50 }
 0x120   : > { %1683 = vpow2.f32 %v1040_v9  ;;  %v1042_v14 = vmul.f32 1.442695, %v1007_v6 }
 0x121   : > { %1685 = vpow2.f32 %v1036_v10  ;;  %v1038_v16 = vmul.f32 1.442695, %v1005_v11  ;;  %v1456_v17 = vpop.f32.mrb[20].mxu0  ;;  %v1550_v18 = vpop.f32.mrb[20].mxu1 }
 0x122   : > { %1687 = vpow2.f32 %v1042_v14  ;;  %v902_v19 = vadd.f32 %v1550_v18, %v741_v15  ;;  %v1457_v21 = vpop.f32.mrb[21].mxu0  ;;  %v893_v22 = vpop.f32.mrb[21].mxu1 }
 0x123   : > { %1689 = vpow2.f32 %v1038_v16  ;;  %v1458_v24 = vadd.f32 %v1457_v21, %v1456_v17  ;;  %v894_v26 = vadd.f32 %v893_v22, %v733_v12  ;;  %v1459_v27 = vpop.f32.mrb[22].mxu0  ;;  %v1551_v28 = vpop.f32.mrb[22].mxu1 }
 0x124   : > { %v1010_v31 = vsub.f32 0.0, %v902_v19  ;;  %v905_v33 = vadd.f32 %v1551_v28, %v744_v23  ;;  %v1460_v34 = vpop.f32.mrb[23].mxu0  ;;  %v896_v35 = vpop.f32.mrb[23].mxu1 }
 0x125   : > { %v1008_v38 = vsub.f32 0.0, %v894_v26  ;;  %v1461_v39 = vadd.f32 %v1460_v34, %v1459_v27  ;;  %v897_v30 = vadd.f32 %v896_v35, %v736_v29  ;;  %v757_v46 = vadd.f32 %v1458_v24, %v1992_v50 }
 0x126   : > { %v1048_v40 = vmul.f32 1.442695, %v1010_v31  ;;  %v1011_v41 = vsub.f32 0.0, %v905_v33 }
 0x127   : > { %v1044_v42 = vmul.f32 1.442695, %v1008_v38  ;;  %v1009_v43 = vsub.f32 0.0, %v897_v30  ;;  %v760_v56 = vadd.f32 %v1461_v39, %v1992_v50 }
 0x128   : > { %1691 = vpow2.f32 %v1048_v40  ;;  %v1050_v45 = vmul.f32 1.442695, %v1011_v41 }
 0x129   : > { %1693 = vpow2.f32 %v1044_v42  ;;  %v1046_v47 = vmul.f32 1.442695, %v1009_v43  ;;  %v1462_v48 = vpop.f32.mrb[24].mxu0  ;;  %v1554_v51 = vpop.f32.mrb[24].mxu1 }
 0x12a   : > { %v1684_v52 = vpop.eup %1683  ;;  %1695 = vpow2.f32 %v1050_v45  ;;  %v918_v53 = vadd.f32 %v1554_v51, %v757_v46  ;;  %v1463_v54 = vpop.f32.mrb[25].mxu0 }
 0x12b   : > { %v909_v55 = vpop.f32.mrb[25].mxu1  ;;  %v1686_v57 = vpop.eup %1685  ;;  %v1102_v58 = vadd.f32 1.0, %v1684_v52  ;;  %1697 = vpow2.f32 %v1046_v47  ;;  %v1464_v60 = vadd.f32 %v1463_v54, %v1462_v48 }
 0x12c   : > { %v910_v61 = vadd.f32 %v909_v55, %v749_v36  ;;  %v1465_v62 = vpop.f32.mrb[26].mxu0  ;;  %v1555_v63 = vpop.f32.mrb[26].mxu1  ;;  %v1100_v1 = vadd.f32 1.0, %v1686_v57  ;;  %v1014_v2 = vsub.f32 0.0, %v918_v53 }
 0x12d   : > { %v1688_v0 = vpop.eup %1687  ;;  %v921_v3 = vadd.f32 %v1555_v63, %v760_v56  ;;  %v1466_v4 = vpop.f32.mrb[27].mxu0  ;;  %1699 = vrcp.f32 %v1102_v58  ;;  %v765_v24 = vadd.f32 %v1464_v60, %v1992_v50 }
 0x12e   : > { %v912_v7 = vpop.f32.mrb[27].mxu1  ;;  %v1690_v9 = vpop.eup %1689  ;;  %v1103_v6 = vadd.f32 1.0, %v1688_v0  ;;  %v1012_v10 = vsub.f32 0.0, %v910_v61  ;;  %v1467_v11 = vadd.f32 %v1466_v4, %v1465_v62  ;;  %1701 = vrcp.f32 %v1100_v1 }
 0x12f   : > { %v1101_v14 = vadd.f32 1.0, %v1690_v9  ;;  %v1056_v15 = vmul.f32 1.442695, %v1014_v2  ;;  %v1015_v16 = vsub.f32 0.0, %v921_v3  ;;  %v913_v18 = vadd.f32 %v912_v7, %v752_v59 }
 0x130   : > { %1703 = vrcp.f32 %v1103_v6  ;;  %v1052_v17 = vmul.f32 1.442695, %v1012_v10  ;;  %v768_v40 = vadd.f32 %v1467_v11, %v1992_v50 }
 0x131   : > { %1705 = vrcp.f32 %v1101_v14  ;;  %v1058_v12 = vmul.f32 1.442695, %v1015_v16  ;;  %v1013_v19 = vsub.f32 0.0, %v913_v18  ;;  %v1468_v21 = vpop.f32.mrb[28].mxu0  ;;  %v1558_v22 = vpop.f32.mrb[28].mxu1 }
 0x132   : > { %1707 = vpow2.f32 %v1056_v15  ;;  %v1692_v5 = vpop.eup %1691  ;;  %v1469_v23 = vpop.f32.mrb[29].mxu0 }
 0x133   : > { %1709 = vpow2.f32 %v1052_v17  ;;  %v925_v26 = vpop.f32.mrb[29].mxu1  ;;  %v1694_v27 = vpop.eup %1693  ;;  %v1106_v28 = vadd.f32 1.0, %v1692_v5  ;;  %v1470_v29 = vadd.f32 %v1469_v23, %v1468_v21  ;;  %v1054_v38 = vmul.f32 1.442695, %v1013_v19 }
 0x134   : > { %1711 = vpow2.f32 %v1058_v12  ;;  %v1471_v31 = vpop.f32.mrb[30].mxu0  ;;  %v1559_v33 = vpop.f32.mrb[30].mxu1  ;;  %v1104_v35 = vadd.f32 1.0, %v1694_v27  ;;  %v926_v39 = vadd.f32 %v925_v26, %v765_v24 }
 0x135   : > { %v1696_v34 = vpop.eup %1695  ;;  %v1472_v30 = vpop.f32.mrb[31].mxu0  ;;  %1713 = vrcp.f32 %v1106_v28  ;;  %v773_v45 = vadd.f32 %v1470_v29, %v1992_v50 }
 0x136   : > { %v928_v41 = vpop.f32.mrb[31].mxu1  ;;  %v1698_v42 = vpop.eup %1697  ;;  %v1107_v43 = vadd.f32 1.0, %v1696_v34  ;;  %v1473_v46 = vadd.f32 %v1472_v30, %v1471_v31  ;;  %1715 = vrcp.f32 %v1104_v35  ;;  %v1016_v48 = vsub.f32 0.0, %v926_v39 }
 0x137   : > { %v1105_v47 = vadd.f32 1.0, %v1698_v42  ;;  %v929_v51 = vadd.f32 %v928_v41, %v768_v40  ;;  %v1700_v36 = vpop.eup %1699  ;;  %v934_v52 = vadd.f32 %v1558_v22, %v773_v45 }
 0x138   : > { %1717 = vrcp.f32 %v1107_v43  ;;  %v776_v53 = vadd.f32 %v1473_v46, %v1992_v50  ;;  %v1702_v54 = vpop.eup %1701  ;;  %v1166_v55 = vmax.f32 %v1700_v36, 0.0  ;;  %v1060_v56 = vmul.f32 1.442695, %v1016_v48 }
 0x139   : > { %1719 = vrcp.f32 %v1105_v47  ;;  %v1017_v57 = vsub.f32 0.0, %v929_v51  ;;  %v1164_v60 = vmax.f32 %v1702_v54, 0.0  ;;  %v1018_v61 = vsub.f32 0.0, %v934_v52  ;;  %v1474_v63 = vpop.f32.mrb[32].mxu0  ;;  %v2016_v0 = vpop.f32.mrb[32].mxu1 }
 0x13a   : > { %v1704_v58 = vpop.eup %1703  ;;  %1721 = vpow2.f32 %v1054_v38  ;;  %v937_v62 = vadd.f32 %v1559_v33, %v776_v53  ;;  %v1198_v2 = vmin.f32 %v1166_v55, 1.0  ;;  %v1475_v59 = vpop.f32.mrb[33].mxu0 }
 0x13b   : > { %v1706_v1 = vpop.eup %1705  ;;  %v1167_v3 = vmax.f32 %v1704_v58, 0.0  ;;  %1723 = vpow2.f32 %v1060_v56  ;;  %v1062_v4 = vmul.f32 1.442695, %v1017_v57  ;;  %v941_v7 = vpop.f32.mrb[33].mxu1  ;;  %v1196_v6 = vmin.f32 %v1164_v60, 1.0 }
 0x13c   : > { %v1708_v9 = vpop.eup %1707  ;;  %v1165_v10 = vmax.f32 %v1706_v1, 0.0  ;;  %v1064_v11 = vmul.f32 1.442695, %v1018_v61  ;;  %v1019_v14 = vsub.f32 0.0, %v937_v62  ;;  %v1477_v15 = vpop.f32.mrb[34].mxu0  ;;  %1230 = vst [vmem:[%s2014_s8 + $0x10] sm:$0xff] %v1198_v2  ;;  %v1476_v12 = vadd.f32 %v1475_v59, %v1474_v63 }
 0x13d   : > { %v1710_v16 = vpop.eup %1709  ;;  %v1199_v17 = vmin.f32 %v1167_v3, 1.0  ;;  %v1110_v18 = vadd.f32 1.0, %v1708_v9  ;;  %1725 = vpow2.f32 %v1062_v4  ;;  %v1478_v19 = vpop.f32.mrb[35].mxu0  ;;  %1228 = vst [vmem:[%s2014_s8] sm:$0xff] %v1196_v6  ;;  %v813_v57 = vadd.f32 %v1973_v8, %v1992_v50 }
 0x13e   : > { %v2019_v21 = vpop.f32.mrb[34].mxu1  ;;  %v1712_v22 = vpop.eup %1711  ;;  %v1197_v5 = vmin.f32 %v1165_v10, 1.0  ;;  %v1108_v23 = vadd.f32 1.0, %v1710_v16  ;;  %1727 = vpow2.f32 %v1064_v11  ;;  %v1066_v24 = vmul.f32 1.442695, %v1019_v14 }
 0x13f   : > { %v944_v26 = vpop.f32.mrb[35].mxu1  ;;  %1231 = vst [vmem:[%s2014_s8 + $0x18] sm:$0xff] %v1199_v17  ;;  %1729 = vrcp.f32 %v1110_v18  ;;  %v1111_v27 = vadd.f32 1.0, %v1712_v22  ;;  %v781_v28 = vadd.f32 %v1476_v12, %v1992_v50  ;;  %v1479_v29 = vadd.f32 %v1478_v19, %v1477_v15  ;;  %v1714_v31 = vpop.eup %1713 }
 0x140   : > { %1229 = vst [vmem:[%s2014_s8 + $0x8] sm:$0xff] %v1197_v5  ;;  %1731 = vrcp.f32 %v1108_v23  ;;  %v1716_v33 = vpop.eup %1715  ;;  %v1170_v34 = vmax.f32 %v1714_v31, 0.0  ;;  %v821_v6 = vadd.f32 %v1977_v20, %v1992_v50  ;;  %v816_v10 = vadd.f32 %v1975_v13, %v1992_v50 }
 0x141   : > { %1733 = vrcp.f32 %v1111_v27  ;;  %v942_v35 = vadd.f32 %v941_v7, %v781_v28  ;;  %v784_v38 = vadd.f32 %v1479_v29, %v1992_v50  ;;  %v1168_v30 = vmax.f32 %v1716_v33, 0.0  ;;  %v1480_v40 = vpop.f32.mrb[36].mxu0  ;;  %v2026_v41 = vpop.f32.mrb[36].mxu1 }
 0x142   : > { %v1718_v39 = vpop.eup %1717  ;;  %1735 = vpow2.f32 %v1066_v24  ;;  %v1202_v43 = vmin.f32 %v1170_v34, 1.0  ;;  %v1481_v48 = vpop.f32.mrb[37].mxu0  ;;  %v824_v12 = vadd.f32 %v1979_v25, %v1992_v50  ;;  %v2051_v20 = vadd.f32 %v1981_v32, %v1992_v50 }
 0x143   : > { %v1720_v42 = vpop.eup %1719  ;;  %v1171_v45 = vmax.f32 %v1718_v39, 0.0  ;;  %v1020_v46 = vsub.f32 0.0, %v942_v35  ;;  %v945_v47 = vadd.f32 %v944_v26, %v784_v38  ;;  %v2028_v51 = vpop.f32.mrb[37].mxu1  ;;  %v1200_v52 = vmin.f32 %v1168_v30, 1.0 }
 0x144   : > { %v1722_v36 = vpop.eup %1721  ;;  %v1169_v53 = vmax.f32 %v1720_v42, 0.0  ;;  %v1482_v54 = vadd.f32 %v1481_v48, %v1480_v40  ;;  %v1483_v55 = vpop.f32.mrb[38].mxu0  ;;  %1234 = vst [vmem:[%s2014_s8 + $0x30] sm:$0xff] %v1202_v43  ;;  %v2056_v25 = vadd.f32 %v1983_v37, %v1992_v50 }
 0x145   : > { %v2030_v56 = vpop.f32.mrb[38].mxu1  ;;  %v1724_v58 = vpop.eup %1723  ;;  %v1203_v60 = vmin.f32 %v1171_v45, 1.0  ;;  %v1109_v61 = vadd.f32 1.0, %v1722_v36  ;;  %v1068_v62 = vmul.f32 1.442695, %v1020_v46  ;;  %v1021_v63 = vsub.f32 0.0, %v945_v47 }
 0x146   : > { %v1484_v1 = vpop.f32.mrb[39].mxu0  ;;  %1232 = vst [vmem:[%s2014_s8 + $0x20] sm:$0xff] %v1200_v52  ;;  %v1201_v2 = vmin.f32 %v1169_v53, 1.0  ;;  %v1112_v3 = vadd.f32 1.0, %v1724_v58  ;;  %v789_v4 = vadd.f32 %v1482_v54, %v1992_v50  ;;  %v2037_v7 = vpop.f32.mrb[39].mxu1 }
 0x147   : > { %v1485_v59 = vadd.f32 %v1484_v1, %v1483_v55  ;;  %v1726_v9 = vpop.eup %1725  ;;  %1235 = vst [vmem:[%s2014_s8 + $0x38] sm:$0xff] %v1203_v60  ;;  %1737 = vrcp.f32 %v1109_v61  ;;  %v1070_v8 = vmul.f32 1.442695, %v1021_v63  ;;  %v837_v61 = vadd.f32 %v1985_v44, %v1992_v50 }
 0x148   : > { %v1728_v11 = vpop.eup %1727  ;;  %1233 = vst [vmem:[%s2014_s8 + $0x28] sm:$0xff] %v1201_v2  ;;  %1739 = vrcp.f32 %v1112_v3  ;;  %v1113_v14 = vadd.f32 1.0, %v1726_v9  ;;  %v950_v15 = vadd.f32 %v2016_v0, %v789_v4 }
 0x149   : > { %v792_v16 = vadd.f32 %v1485_v59, %v1992_v50  ;;  %v1730_v17 = vpop.eup %1729  ;;  %v1114_v18 = vadd.f32 1.0, %v1728_v11  ;;  %1741 = vpow2.f32 %v1068_v62  ;;  %v1486_v23 = vpop.f32.mrb[40].mxu0 }
 0x14a   : > { %v1732_v19 = vpop.eup %1731  ;;  %v1174_v13 = vmax.f32 %v1730_v17, 0.0  ;;  %1743 = vrcp.f32 %v1113_v14  ;;  %v1022_v22 = vsub.f32 0.0, %v950_v15  ;;  %v1570_v0 = vpop.f32.mrb[40].mxu1 }
 0x14b   : > { %v953_v5 = vadd.f32 %v2019_v21, %v792_v16  ;;  %v1734_v24 = vpop.eup %1733  ;;  %v1172_v26 = vmax.f32 %v1732_v19, 0.0  ;;  %1745 = vrcp.f32 %v1114_v18  ;;  %v982_v27 = vadd.f32 %v1570_v0, %v821_v6  ;;  %v1487_v28 = vpop.f32.mrb[41].mxu0 }
 0x14c   : > { %v973_v29 = vpop.f32.mrb[41].mxu1  ;;  %v1736_v32 = vpop.eup %1735  ;;  %v1206_v31 = vmin.f32 %v1174_v13, 1.0  ;;  %v1175_v33 = vmax.f32 %v1734_v24, 0.0  ;;  %1747 = vpow2.f32 %v1070_v8  ;;  %v1072_v34 = vmul.f32 1.442695, %v1022_v22 }
 0x14d   : > { %v1489_v21 = vpop.f32.mrb[42].mxu0  ;;  %v1571_v35 = vpop.f32.mrb[42].mxu1  ;;  %v1204_v38 = vmin.f32 %v1172_v26, 1.0  ;;  %v1115_v39 = vadd.f32 1.0, %v1736_v32  ;;  %v1023_v30 = vsub.f32 0.0, %v953_v5  ;;  %v1030_v40 = vsub.f32 0.0, %v982_v27 }
 0x14e   : > { %v1490_v42 = vpop.f32.mrb[43].mxu0  ;;  %v976_v43 = vpop.f32.mrb[43].mxu1  ;;  %1238 = vst [vmem:[%s2014_s8 + $0x50] sm:$0xff] %v1206_v31  ;;  %v1207_v45 = vmin.f32 %v1175_v33, 1.0  ;;  %1749 = vpow2.f32 %v1072_v34  ;;  %v1488_v37 = vadd.f32 %v1487_v28, %v1486_v23  ;;  %v974_v46 = vadd.f32 %v973_v29, %v813_v57 }
 0x14f   : > { %1236 = vst [vmem:[%s2014_s8 + $0x40] sm:$0xff] %v1204_v38  ;;  %1751 = vrcp.f32 %v1115_v39  ;;  %v1074_v47 = vmul.f32 1.442695, %v1023_v30  ;;  %v1088_v48 = vmul.f32 1.442695, %v1030_v40  ;;  %v985_v36 = vadd.f32 %v1571_v35, %v824_v12 }
 0x150   : > { %1239 = vst [vmem:[%s2014_s8 + $0x58] sm:$0xff] %v1207_v45  ;;  %v797_v52 = vadd.f32 %v1488_v37, %v1992_v50  ;;  %v1028_v53 = vsub.f32 0.0, %v974_v46  ;;  %v1491_v54 = vadd.f32 %v1490_v42, %v1489_v21  ;;  %v977_v55 = vadd.f32 %v976_v43, %v816_v10 }
 0x151   : > { %v1738_v58 = vpop.eup %1737  ;;  %1753 = vpow2.f32 %v1074_v47  ;;  %v1031_v60 = vsub.f32 0.0, %v985_v36  ;;  %v840_v57 = vadd.f32 %v1987_v49, %v1992_v50  ;;  %v1492_v3 = vpop.f32.mrb[44].mxu0 }
 0x152   : > { %v1740_v62 = vpop.eup %1739  ;;  %v1173_v63 = vmax.f32 %v1738_v58, 0.0  ;;  %1755 = vpow2.f32 %v1088_v48  ;;  %v958_v1 = vadd.f32 %v2028_v51, %v797_v52  ;;  %v1084_v2 = vmul.f32 1.442695, %v1028_v53  ;;  %v1574_v4 = vpop.f32.mrb[44].mxu1 }
 0x153   : > { %v1742_v59 = vpop.eup %1741  ;;  %v1176_v9 = vmax.f32 %v1740_v62, 0.0  ;;  %v1090_v8 = vmul.f32 1.442695, %v1031_v60  ;;  %v800_v6 = vadd.f32 %v1491_v54, %v1992_v50  ;;  %v1029_v10 = vsub.f32 0.0, %v977_v55  ;;  %v1493_v11 = vpop.f32.mrb[45].mxu0 }
 0x154   : > { %v989_v14 = vpop.f32.mrb[45].mxu1  ;;  %v1744_v44 = vpop.eup %1743  ;;  %v1205_v15 = vmin.f32 %v1173_v63, 1.0  ;;  %v1116_v49 = vadd.f32 1.0, %v1742_v59  ;;  %v1024_v16 = vsub.f32 0.0, %v958_v1  ;;  %1757 = vpow2.f32 %v1084_v2 }
 0x155   : > { %v1495_v17 = vpop.f32.mrb[46].mxu0  ;;  %v1575_v51 = vpop.f32.mrb[46].mxu1  ;;  %v1208_v12 = vmin.f32 %v1176_v9, 1.0  ;;  %v1177_v19 = vmax.f32 %v1744_v44, 0.0  ;;  %1759 = vpow2.f32 %v1090_v8  ;;  %v961_v13 = vadd.f32 %v2037_v7, %v800_v6 }
 0x156   : > { %v1746_v18 = vpop.eup %1745  ;;  %v1496_v22 = vpop.f32.mrb[47].mxu0  ;;  %1237 = vst [vmem:[%s2014_s8 + $0x48] sm:$0xff] %v1205_v15  ;;  %1761 = vrcp.f32 %v1116_v49  ;;  %v1076_v24 = vmul.f32 1.442695, %v1024_v16  ;;  %v1086_v26 = vmul.f32 1.442695, %v1029_v10  ;;  %v998_v32 = vadd.f32 %v1574_v4, %v837_v61 }
 0x157   : > { %v992_v5 = vpop.f32.mrb[47].mxu1  ;;  %v1748_v23 = vpop.eup %1747  ;;  %v1178_v0 = vmax.f32 %v1746_v18, 0.0  ;;  %1240 = vst [vmem:[%s2014_s8 + $0x60] sm:$0xff] %v1208_v12  ;;  %v1209_v27 = vmin.f32 %v1177_v19, 1.0  ;;  %v1025_v29 = vsub.f32 0.0, %v961_v13  ;;  %v1494_v34 = vadd.f32 %v1493_v11, %v1492_v3 }
 0x158   : > { %v1117_v28 = vadd.f32 1.0, %v1748_v23  ;;  %v1750_v31 = vpop.eup %1749  ;;  %1763 = vpow2.f32 %v1076_v24  ;;  %v990_v7 = vadd.f32 %v989_v14, %v2051_v20  ;;  %v1034_v39 = vsub.f32 0.0, %v998_v32 }
 0x159   : > { %v1210_v33 = vmin.f32 %v1178_v0, 1.0  ;;  %v1752_v21 = vpop.eup %1751  ;;  %1241 = vst [vmem:[%s2014_s8 + $0x68] sm:$0xff] %v1209_v27  ;;  %v1118_v35 = vadd.f32 1.0, %v1750_v31  ;;  %v1078_v38 = vmul.f32 1.442695, %v1025_v29  ;;  %v805_v40 = vadd.f32 %v1494_v34, %v1992_v50 }
 0x15a   : > { %1765 = vrcp.f32 %v1117_v28  ;;  %v1179_v30 = vmax.f32 %v1752_v21, 0.0  ;;  %v1032_v42 = vsub.f32 0.0, %v990_v7  ;;  %v1096_v45 = vmul.f32 1.442695, %v1034_v39 }
 0x15b   : > { %1242 = vst [vmem:[%s2014_s8 + $0x70] sm:$0xff] %v1210_v33  ;;  %1767 = vpow2.f32 %v1086_v26  ;;  %v1754_v43 = vpop.eup %1753  ;;  %v1001_v37 = vadd.f32 %v1575_v51, %v840_v57  ;;  %v1497_v46 = vadd.f32 %v1496_v22, %v1495_v17  ;;  %v966_v36 = vadd.f32 %v2026_v41, %v805_v40 }
 0x15c   : > { %1769 = vrcp.f32 %v1118_v35  ;;  %v1756_v47 = vpop.eup %1755  ;;  %v1211_v20 = vmin.f32 %v1179_v30, 1.0  ;;  %v1119_v48 = vadd.f32 1.0, %v1754_v43  ;;  %v1092_v53 = vmul.f32 1.442695, %v1032_v42 }
 0x15d   : > { %1771 = vpow2.f32 %v1078_v38  ;;  %v1126_v52 = vadd.f32 1.0, %v1756_v47  ;;  %v1035_v54 = vsub.f32 0.0, %v1001_v37  ;;  %v1026_v58 = vsub.f32 0.0, %v966_v36 }
 0x15e   : > { %1773 = vpow2.f32 %v1096_v45  ;;  %v1758_v55 = vpop.eup %1757  ;;  %1243 = vst [vmem:[%s2014_s8 + $0x78] sm:$0xff] %v1211_v20  ;;  %v808_v60 = vadd.f32 %v1497_v46, %v1992_v50  ;;  %v993_v61 = vadd.f32 %v992_v5, %v2056_v25 }
 0x15f   : > { %1775 = vrcp.f32 %v1119_v48  ;;  %v1760_v57 = vpop.eup %1759  ;;  %v1124_v62 = vadd.f32 1.0, %v1758_v55  ;;  %v1098_v63 = vmul.f32 1.442695, %v1035_v54  ;;  %v1080_v3 = vmul.f32 1.442695, %v1026_v58 }
 0x160   : > { %1777 = vrcp.f32 %v1126_v52  ;;  %v1762_v1 = vpop.eup %1761  ;;  %v1127_v2 = vadd.f32 1.0, %v1760_v57  ;;  %v969_v41 = vadd.f32 %v2030_v56, %v808_v60  ;;  %v1033_v59 = vsub.f32 0.0, %v993_v61 }
 0x161   : > { %1779 = vpow2.f32 %v1092_v53  ;;  %v1180_v4 = vmax.f32 %v1762_v1, 0.0 }
 0x162   : > { %1781 = vrcp.f32 %v1124_v62  ;;  %v1764_v9 = vpop.eup %1763  ;;  %v1027_v8 = vsub.f32 0.0, %v969_v41  ;;  %v1094_v44 = vmul.f32 1.442695, %v1033_v59 }
 0x163   : > { %1783 = vrcp.f32 %v1127_v2  ;;  %v1212_v6 = vmin.f32 %v1180_v4, 1.0  ;;  %v1120_v25 = vadd.f32 1.0, %v1764_v9 }
 0x164   : > { %v1766_v50 = vpop.eup %1765  ;;  %1785 = vpow2.f32 %v1080_v3  ;;  %v1082_v14 = vmul.f32 1.442695, %v1027_v8 }
 0x165   : > { %v1768_v10 = vpop.eup %1767  ;;  %v1181_v11 = vmax.f32 %v1766_v50, 0.0  ;;  %1787 = vpow2.f32 %v1098_v63  ;;  %1244 = vst [vmem:[%s2014_s8 + $0x80] sm:$0xff] %v1212_v6 }
 0x166   : > { %v1770_v15 = vpop.eup %1769  ;;  %1789 = vrcp.f32 %v1120_v25  ;;  %v1125_v56 = vadd.f32 1.0, %v1768_v10 }
 0x167   : > { %v1772_v49 = vpop.eup %1771  ;;  %v1213_v16 = vmin.f32 %v1181_v11, 1.0  ;;  %v1182_v17 = vmax.f32 %v1770_v15, 0.0  ;;  %1791 = vpow2.f32 %v1082_v14 }
 0x168   : > { %v1774_v51 = vpop.eup %1773  ;;  %v1121_v18 = vadd.f32 1.0, %v1772_v49  ;;  %1793 = vrcp.f32 %v1125_v56 }
 0x169   : > { %v1776_v12 = vpop.eup %1775  ;;  %1245 = vst [vmem:[%s2014_s8 + $0x88] sm:$0xff] %v1213_v16  ;;  %v1214_v19 = vmin.f32 %v1182_v17, 1.0  ;;  %v1130_v13 = vadd.f32 1.0, %v1774_v51  ;;  %1795 = vpow2.f32 %v1094_v44 }
 0x16a   : > { %v1778_v22 = vpop.eup %1777  ;;  %v1183_v5 = vmax.f32 %v1776_v12, 0.0  ;;  %1797 = vrcp.f32 %v1121_v18 }
 0x16b   : > { %v1780_v23 = vpop.eup %1779  ;;  %1246 = vst [vmem:[%s2014_s8 + $0x90] sm:$0xff] %v1214_v19  ;;  %v1190_v0 = vmax.f32 %v1778_v22, 0.0  ;;  %1799 = vrcp.f32 %v1130_v13 }
 0x16c   : > { %v1782_v24 = vpop.eup %1781  ;;  %v1215_v26 = vmin.f32 %v1183_v5, 1.0  ;;  %v1128_v27 = vadd.f32 1.0, %v1780_v23 }
 0x16d   : > { %v1784_v28 = vpop.eup %1783  ;;  %v1222_v29 = vmin.f32 %v1190_v0, 1.0  ;;  %v1188_v32 = vmax.f32 %v1782_v24, 0.0 }
 0x16e   : > { %v1786_v31 = vpop.eup %1785  ;;  %1247 = vst [vmem:[%s2014_s8 + $0x98] sm:$0xff] %v1215_v26  ;;  %v1191_v33 = vmax.f32 %v1784_v28, 0.0  ;;  %1801 = vrcp.f32 %v1128_v27 }
 0x16f   : > { %v1788_v34 = vpop.eup %1787  ;;  %1254 = vst [vmem:[%s2014_s8 + $0xd0] sm:$0xff] %v1222_v29  ;;  %v1220_v7 = vmin.f32 %v1188_v32, 1.0  ;;  %v1122_v21 = vadd.f32 1.0, %v1786_v31 }
 0x170   : > { %v1790_v35 = vpop.eup %1789  ;;  %v1223_v38 = vmin.f32 %v1191_v33, 1.0  ;;  %v1131_v39 = vadd.f32 1.0, %v1788_v34 }
 0x171   : > { %v1792_v30 = vpop.eup %1791  ;;  %v1184_v40 = vmax.f32 %v1790_v35, 0.0  ;;  %1252 = vst [vmem:[%s2014_s8 + $0xc0] sm:$0xff] %v1220_v7  ;;  %1803 = vrcp.f32 %v1122_v21 }
 0x172   : > { %v1794_v42 = vpop.eup %1793  ;;  %1255 = vst [vmem:[%s2014_s8 + $0xd8] sm:$0xff] %v1223_v38  ;;  %1805 = vrcp.f32 %v1131_v39  ;;  %v1123_v43 = vadd.f32 1.0, %v1792_v30 }
 0x173   : > { %v1796_v45 = vpop.eup %1795  ;;  %v1216_v37 = vmin.f32 %v1184_v40, 1.0  ;;  %v1189_v46 = vmax.f32 %v1794_v42, 0.0 }
 0x174   : > { %v1798_v47 = vpop.eup %1797  ;;  %1807 = vrcp.f32 %v1123_v43  ;;  %v1129_v20 = vadd.f32 1.0, %v1796_v45 }
 0x175   : > { %v1800_v48 = vpop.eup %1799  ;;  %1248 = vst [vmem:[%s2014_s8 + $0xa0] sm:$0xff] %v1216_v37  ;;  %v1185_v36 = vmax.f32 %v1798_v47, 0.0  ;;  %v1221_v52 = vmin.f32 %v1189_v46, 1.0 }
 0x176   : > { %v1194_v53 = vmax.f32 %v1800_v48, 0.0  ;;  %1809 = vrcp.f32 %v1129_v20 }
 0x177   : > { %v1217_v54 = vmin.f32 %v1185_v36, 1.0  ;;  %1253 = vst [vmem:[%s2014_s8 + $0xc8] sm:$0xff] %v1221_v52 }
 0x178   : > { %v1802_v55 = vpop.eup %1801  ;;  %v1226_v58 = vmin.f32 %v1194_v53, 1.0 }
 0x179   : > { %1249 = vst [vmem:[%s2014_s8 + $0xa8] sm:$0xff] %v1217_v54  ;;  %v1192_v60 = vmax.f32 %v1802_v55, 0.0 }
 0x17a   : > { %1258 = vst [vmem:[%s2014_s8 + $0xf0] sm:$0xff] %v1226_v58 }
 0x17b   : > { %v1804_v61 = vpop.eup %1803  ;;  %v1224_v57 = vmin.f32 %v1192_v60, 1.0 }
 0x17c   : > { %v1806_v62 = vpop.eup %1805  ;;  %v1186_v63 = vmax.f32 %v1804_v61, 0.0 }
 0x17d   : > { %1256 = vst [vmem:[%s2014_s8 + $0xe0] sm:$0xff] %v1224_v57  ;;  %v1195_v1 = vmax.f32 %v1806_v62, 0.0 }
 0x17e   : > { %v1808_v2 = vpop.eup %1807  ;;  %v1218_v3 = vmin.f32 %v1186_v63, 1.0 }
 0x17f   : > { %v1227_v41 = vmin.f32 %v1195_v1, 1.0  ;;  %v1187_v4 = vmax.f32 %v1808_v2, 0.0 }
 0x180   : > { %v1810_v59 = vpop.eup %1809  ;;  %1250 = vst [vmem:[%s2014_s8 + $0xb0] sm:$0xff] %v1218_v3 }
 0x181   : > { %1259 = vst [vmem:[%s2014_s8 + $0xf8] sm:$0xff] %v1227_v41  ;;  %v1219_v9 = vmin.f32 %v1187_v4, 1.0  ;;  %v1193_v8 = vmax.f32 %v1810_v59, 0.0 }
 0x183   : > { %1251 = vst [vmem:[%s2014_s8 + $0xb8] sm:$0xff] %v1219_v9  ;;  %v1225_v50 = vmin.f32 %v1193_v8, 1.0 }
 0x185   : > { %1257 = vst [vmem:[%s2014_s8 + $0xe8] sm:$0xff] %v1225_v50 }
 0x186 PF: > { %s13_s12 = sadd.s32 1, %s1817_s12  }
 0x187   : > { %p10_p4 = scmp.ge.s32.totalorder %s13_s12, 10  }
 0x189   :  { %12 = sbr.rel (!%p10_p4) target bundleno = 1 (0x1), region = 62 }

</bundles_post_ra>
